<compile_context>
chip_gen: v5e
topology: v5e:2x2
jax: 0.10.0
libtpu: 0.0.40
codegen_flags: <defaults>
</compile_context>

<pallas_src>
import functools

import jax
import jax.numpy as jnp
from jax.experimental import pallas as pl
from jax.experimental.pallas import tpu as pltpu

# ----------------------------- tiny CLIP config ------------------------------
D = 32          # hidden size
N_HEADS = 4
HEAD_DIM = D // N_HEADS
MLP = 4 * D     # 128
LAYERS = 2
PROJ = 16       # projection dim

VOCAB = 64
S_TEXT = 8
BATCH = 2

IMG = 16
PATCH = 8
C_IN = 3
N_PATCH = (IMG // PATCH) ** 2          # 4
S_VIS = N_PATCH + 1                    # 5 (CLS + patches)
IMG_NUM = 2

LN_EPS = 1e-5

# MXU operand dtype. f32 keeps exact reference numerics at this toy size.
# Set to jnp.bfloat16 on v6e/v7x for ~2x MXU throughput at real CLIP sizes
# (accumulation stays f32 via preferred_element_type).
MATMUL_DTYPE = jnp.float32


# ------------------------------- small helpers --------------------------------
def _compiler_params(**kw):
    cls = getattr(pltpu, "CompilerParams", None)
    if cls is None:  # older jax fallback
        cls = getattr(pltpu, "TPUCompilerParams")
    return cls(**kw)


def _recip(x):
    # EUP reciprocal (separate issue slot) when available.
    if hasattr(pl, "reciprocal"):
        return pl.reciprocal(x, approx=True)
    return 1.0 / x


def _mm(a, b):
    return jnp.dot(a.astype(MATMUL_DTYPE), b.astype(MATMUL_DTYPE),
                   preferred_element_type=jnp.float32)


def _ln(x, g, b):
    # x: (M, D) f32, g/b: (1, D)
    mu = jnp.mean(x, axis=-1, keepdims=True)
    var = jnp.mean((x - mu) ** 2, axis=-1, keepdims=True)
    return (x - mu) * jax.lax.rsqrt(var + LN_EPS) * g + b


# --------------------------- fused transformer stack --------------------------
def clip_stack_kernel(x_ref, mask_ref,
                      ln1g_ref, ln1b_ref, wqkv_ref, bqkv_ref, wo_ref, bo_ref,
                      ln2g_ref, ln2b_ref, w1_ref, b1_ref, w2_ref, b2_ref,
                      preg_ref, preb_ref, postg_ref, postb_ref,
                      o_ref, *, n_heads, head_dim, use_pre_ln):
    """One grid step = one encoder layer of one batch element.

    grid = (batch, layers); layers is the inner ('arbitrary') axis. The running
    activation is carried in the resident output block o_ref (constant block
    index across the layer axis), so nothing touches HBM between layers.
    """
    layer = pl.program_id(1)
    n_layers = pl.num_programs(1)
    scale = head_dim ** -0.5

    @pl.when(layer == 0)
    def _init():
        x0 = x_ref[0].astype(jnp.float32)            # (S, D) embeddings
        if use_pre_ln:                               # vision pre_layernorm
            x0 = _ln(x0, preg_ref[...], preb_ref[...])
        o_ref[0] = x0

    x = o_ref[0]                                     # (S, D) running activation

    # ---------------- attention sublayer (pre-LN, fused QKV) ----------------
    h = _ln(x, ln1g_ref[0], ln1b_ref[0])
    qkv = _mm(h, wqkv_ref[0]) + bqkv_ref[0]          # (S, 3D) single matmul
    d = h.shape[-1]
    q = qkv[:, :d]
    k = qkv[:, d:2 * d]
    v = qkv[:, 2 * d:]
    mask = mask_ref[0]                               # (S, S) additive

    head_outs = []
    for hh in range(n_heads):                        # static unroll, all in VMEM
        lo = hh * head_dim
        qh = q[:, lo:lo + head_dim]
        kh = k[:, lo:lo + head_dim]
        vh = v[:, lo:lo + head_dim]
        # contract last dims of both operands -> no materialized K transpose
        s = jax.lax.dot_general(
            qh.astype(MATMUL_DTYPE), kh.astype(MATMUL_DTYPE),
            (((1,), (1,)), ((), ())),
            preferred_element_type=jnp.float32) * scale + mask
        s = s - jnp.max(s, axis=-1, keepdims=True)
        p = jnp.exp(s)
        p = p * _recip(jnp.sum(p, axis=-1, keepdims=True))
        head_outs.append(_mm(p, vh))                 # (S, head_dim)
    attn = jnp.concatenate(head_outs, axis=-1)       # (S, D)
    attn = _mm(attn, wo_ref[0]) + bo_ref[0]
    x = x + attn                                     # residual, stays in vregs

    # ---------------- MLP sublayer (pre-LN, quick_gelu) ----------------
    h = _ln(x, ln2g_ref[0], ln2b_ref[0])
    hm = _mm(h, w1_ref[0]) + b1_ref[0]
    hm = hm * jax.nn.sigmoid(1.702 * hm)             # quick_gelu
    x = x + _mm(hm, w2_ref[0]) + b2_ref[0]           # residual

    o_ref[0] = x

    @pl.when(layer == n_layers - 1)
    def _final():
        # final_layer_norm (text) / post_layernorm (vision). LN is per-token,
        # so applying it to all tokens and gathering later is equivalent.
        o_ref[0] = _ln(o_ref[0], postg_ref[...], postb_ref[...])


def run_encoder_stack(x_emb, mask, lp, pre_g, pre_b, post_g, post_b, *, use_pre_ln):
    B, S, Dd = x_emb.shape
    L = lp["wqkv"].shape[0]
    H = lp["w1"].shape[-1]
    kern = functools.partial(clip_stack_kernel, n_heads=N_HEADS,
                             head_dim=HEAD_DIM, use_pre_ln=use_pre_ln)

    def per_layer_vec(dim):
        return pl.BlockSpec((1, 1, dim), lambda b, l: (l, 0, 0))

    def per_layer_mat(din, dout):
        return pl.BlockSpec((1, din, dout), lambda b, l: (l, 0, 0))

    def shared_vec(dim):
        return pl.BlockSpec((1, dim), lambda b, l: (0, 0))

    return pl.pallas_call(
        kern,
        out_shape=jax.ShapeDtypeStruct((B, S, Dd), jnp.float32),
        grid=(B, L),
        in_specs=[
            pl.BlockSpec((1, S, Dd), lambda b, l: (b, 0, 0)),   # embeddings
            pl.BlockSpec((1, S, S), lambda b, l: (b, 0, 0)),    # additive mask
            per_layer_vec(Dd), per_layer_vec(Dd),               # ln1 g, b
            per_layer_mat(Dd, 3 * Dd), per_layer_vec(3 * Dd),   # wqkv, bqkv
            per_layer_mat(Dd, Dd), per_layer_vec(Dd),           # wo, bo
            per_layer_vec(Dd), per_layer_vec(Dd),               # ln2 g, b
            per_layer_mat(Dd, H), per_layer_vec(H),             # w1, b1
            per_layer_mat(H, Dd), per_layer_vec(Dd),            # w2, b2
            shared_vec(Dd), shared_vec(Dd),                     # pre-LN g, b
            shared_vec(Dd), shared_vec(Dd),                     # post-LN g, b
        ],
        out_specs=pl.BlockSpec((1, S, Dd), lambda b, l: (b, 0, 0)),
        compiler_params=_compiler_params(
            dimension_semantics=("parallel", "arbitrary")),
    )(x_emb, mask,
      lp["ln1_g"], lp["ln1_b"], lp["wqkv"], lp["bqkv"], lp["wo"], lp["bo"],
      lp["ln2_g"], lp["ln2_b"], lp["w1"], lp["b1"], lp["w2"], lp["b2"],
      pre_g.reshape(1, Dd), pre_b.reshape(1, Dd),
      post_g.reshape(1, Dd), post_b.reshape(1, Dd))


# ----------------------- single-block no-bias matmul --------------------------
def matmul_kernel(x_ref, w_ref, o_ref):
    o_ref[...] = _mm(x_ref[...], w_ref[...])


def pallas_matmul(x, w):
    # x: (M, K), w: (K, N) -> (M, N); whole problem in one grid step.
    M, K = x.shape
    N = w.shape[1]
    return pl.pallas_call(
        matmul_kernel,
        out_shape=jax.ShapeDtypeStruct((M, N), jnp.float32),
        grid=(1,),
        in_specs=[pl.BlockSpec((M, K), lambda i: (0, 0)),
                  pl.BlockSpec((K, N), lambda i: (0, 0))],
        out_specs=pl.BlockSpec((M, N), lambda i: (0, 0)),
    )(x, w)


# ------------------------------ model definition ------------------------------
def make_params(key):
    keys = iter(jax.random.split(key, 64))

    def nrm(shape):
        return jax.random.normal(next(keys), shape, jnp.float32) * 0.02

    def stacked_layers():
        wq = nrm((LAYERS, D, D))
        wk = nrm((LAYERS, D, D))
        wv = nrm((LAYERS, D, D))
        return dict(
            ln1_g=jnp.ones((LAYERS, 1, D), jnp.float32),
            ln1_b=jnp.zeros((LAYERS, 1, D), jnp.float32),
            wqkv=jnp.concatenate([wq, wk, wv], axis=-1),       # (L, D, 3D) fused
            bqkv=jnp.zeros((LAYERS, 1, 3 * D), jnp.float32),
            wo=nrm((LAYERS, D, D)),
            bo=jnp.zeros((LAYERS, 1, D), jnp.float32),
            ln2_g=jnp.ones((LAYERS, 1, D), jnp.float32),
            ln2_b=jnp.zeros((LAYERS, 1, D), jnp.float32),
            w1=nrm((LAYERS, D, MLP)),
            b1=jnp.zeros((LAYERS, 1, MLP), jnp.float32),
            w2=nrm((LAYERS, MLP, D)),
            b2=jnp.zeros((LAYERS, 1, D), jnp.float32),
        )

    text = dict(
        tok_emb=nrm((VOCAB, D)),
        pos_emb=nrm((S_TEXT, D)),
        layers=stacked_layers(),
        fin_g=jnp.ones((D,), jnp.float32), fin_b=jnp.zeros((D,), jnp.float32),
        proj=nrm((D, PROJ)),  # text_projection, bias=False
    )
    vision = dict(
        patch_w=nrm((C_IN * PATCH * PATCH, D)),  # Conv2d weight, flattened (C,kh,kw)
        cls=nrm((D,)),
        pos_emb=nrm((S_VIS, D)),
        pre_g=jnp.ones((D,), jnp.float32), pre_b=jnp.zeros((D,), jnp.float32),
        layers=stacked_layers(),
        post_g=jnp.ones((D,), jnp.float32), post_b=jnp.zeros((D,), jnp.float32),
        proj=nrm((D, PROJ)),  # visual_projection, bias=False
    )
    return text, vision


def text_model(text_ids, att_mask, tp):
    B, S = text_ids.shape
    # embedding gather + positional add kept in JAX glue
    x = tp["tok_emb"][text_ids] + tp["pos_emb"][None, :S, :]
    # causal + padding additive masks, as in HF CLIPTextTransformer
    causal = jnp.where(jnp.arange(S)[:, None] >= jnp.arange(S)[None, :], 0.0, -1e9)
    pad = (1.0 - att_mask.astype(jnp.float32))[:, None, :] * -1e9
    mask = causal[None, :, :] + pad                                   # (B, S, S)
    dummy = jnp.zeros((D,), jnp.float32)                              # no pre-LN for text
    x = run_encoder_stack(x, mask, tp["layers"], dummy, dummy,
                          tp["fin_g"], tp["fin_b"], use_pre_ln=False)
    # pooled_output: hidden state at EOS position (= argmax of token ids)
    pooled = x[jnp.arange(B), jnp.argmax(text_ids, axis=-1)]          # (B, D)
    return pooled


def vision_model(pixels, vp):
    # pixels: (N, C, H, W) NCHW; patch-embed conv == matmul over flattened patches
    N = pixels.shape[0]
    hn = IMG // PATCH
    patches = pixels.reshape(N, C_IN, hn, PATCH, hn, PATCH)
    patches = patches.transpose(0, 2, 4, 1, 3, 5).reshape(
        N * hn * hn, C_IN * PATCH * PATCH)
    patch_embeds = pallas_matmul(patches, vp["patch_w"]).reshape(N, hn * hn, D)
    cls = jnp.broadcast_to(vp["cls"][None, None, :], (N, 1, D))
    x = jnp.concatenate([cls, patch_embeds], axis=1) + vp["pos_emb"][None]
    mask = jnp.zeros((N, S_VIS, S_VIS), jnp.float32)
    x = run_encoder_stack(x, mask, vp["layers"], vp["pre_g"], vp["pre_b"],
                          vp["post_g"], vp["post_b"], use_pre_ln=True)
    pooled = x[:, 0, :]  # CLS token, already post-LN'd inside the kernel
    return pooled


def clip_encoder_forward(text_ids, img_datas, text_att_mask, text_p, vis_p,
                         method="ReIMvent"):
    assert text_ids is not None
    assert text_att_mask is not None
    pooled_t = text_model(text_ids, text_att_mask, text_p)            # (B, D)
    text_features = pallas_matmul(pooled_t, text_p["proj"])[:, None, :]  # (B, 1, P)
    encoded_text_features = text_features                             # == unsqueeze(1)
    if method == "ReIMvent_t":
        return encoded_text_features

    bs, num = img_datas.shape[0], img_datas.shape[1]
    flat = img_datas.reshape(bs * num, *img_datas.shape[2:])          # flatten dims 0,1
    pooled_i = vision_model(flat, vis_p)                              # (bs*num, D)
    image_features = pallas_matmul(pooled_i, vis_p["proj"])           # (bs*num, P)
    encoded_img_features = image_features.reshape(bs, num, image_features.shape[-1])
    return encoded_text_features, encoded_img_features


# ------------------------------------ main ------------------------------------
if __name__ == "__main__":
    key = jax.random.PRNGKey(0)
    kp, kt, km, ki = jax.random.split(key, 4)

    text_p, vis_p = make_params(kp)

    text_ids = jax.random.randint(kt, (BATCH, S_TEXT), 0, VOCAB, dtype=jnp.int32)
    text_att_mask = jnp.ones((BATCH, S_TEXT), jnp.int32).at[1, -2:].set(0)
    img_datas = jax.random.normal(ki, (BATCH, IMG_NUM, C_IN, IMG, IMG), jnp.float32)

    forward = jax.jit(clip_encoder_forward, static_argnames=("method",))
    txt_feat, img_feat = forward(text_ids, img_datas, text_att_mask,
                                 text_p, vis_p, method="ReIMvent")
    jax.block_until_ready((txt_feat, img_feat))

    assert txt_feat.shape == (BATCH, 1, PROJ), txt_feat.shape
    assert img_feat.shape == (BATCH, IMG_NUM, PROJ), img_feat.shape
    assert jnp.all(jnp.isfinite(txt_feat)) and jnp.all(jnp.isfinite(img_feat))
    print("KERNEL_OK")
</pallas_src>

<mosaic_0001>
module attributes {stable_mosaic.version = 11 : i64} {
  func.func @matmul_kernel(%arg0: i32, %arg1: memref<16x192xf32, #tpu.memory_space<vmem>>, %arg2: memref<192x32xf32, #tpu.memory_space<vmem>>, %arg3: memref<16x32xf32, #tpu.memory_space<vmem>>) attributes {dimension_semantics = [#tpu.dimension_semantics<arbitrary>], iteration_bounds = array<i64: 1>, scalar_prefetch = 0 : i64, scratch_operands = 0 : i64, tpu.core_type = #tpu.core_type<tc>, window_params = [{pipeline_mode = #tpu.pipeline_mode<synchronous>, transform_indices = @transform_0, window_bounds = array<i64: 16, 192>}, {pipeline_mode = #tpu.pipeline_mode<synchronous>, transform_indices = @transform_1, window_bounds = array<i64: 192, 32>}, {pipeline_mode = #tpu.pipeline_mode<synchronous>, transform_indices = @transform_2, window_bounds = array<i64: 16, 32>}]} {
    %c0 = arith.constant 0 : index
    %c0_0 = arith.constant 0 : index
    %0 = vector.load %arg1[%c0, %c0_0] : memref<16x192xf32, #tpu.memory_space<vmem>>, vector<16x192xf32>
    %c0_1 = arith.constant 0 : index
    %c0_2 = arith.constant 0 : index
    %1 = vector.load %arg2[%c0_1, %c0_2] : memref<192x32xf32, #tpu.memory_space<vmem>>, vector<192x32xf32>
    %cst = arith.constant dense<0.000000e+00> : vector<16x32xf32>
    %2 = tpu.matmul %0, %1, %cst {dimension_numbers = #tpu.dot_dimension_numbers<[1], [0], [0], [1], [0, 0, 1, 1], [], []>} : vector<16x192xf32>, vector<192x32xf32>, vector<16x32xf32> -> vector<16x32xf32>
    %c0_3 = arith.constant 0 : index
    %c0_4 = arith.constant 0 : index
    %3 = vector.load %arg3[%c0_3, %c0_4] : memref<16x32xf32, #tpu.memory_space<vmem>>, vector<16x32xf32>
    tpu.vector_store %arg3[%c0_3, %c0_4], %2 {strides = array<i32>} : memref<16x32xf32, #tpu.memory_space<vmem>>, vector<16x32xf32>,
    return
  }
  func.func @transform_0(%arg0: i32) -> (i32, i32) {
    %c0_i32 = arith.constant 0 : i32
    %c0_i32_0 = arith.constant 0 : i32
    %c0_i32_1 = arith.constant 0 : i32
    return %c0_i32, %c0_i32_0 : i32, i32
  }
  func.func @transform_1(%arg0: i32) -> (i32, i32) {
    %c0_i32 = arith.constant 0 : i32
    %c0_i32_0 = arith.constant 0 : i32
    %c0_i32_1 = arith.constant 0 : i32
    return %c0_i32, %c0_i32_0 : i32, i32
  }
  func.func @transform_2(%arg0: i32) -> (i32, i32) {
    %c0_i32 = arith.constant 0 : i32
    %c0_i32_0 = arith.constant 0 : i32
    %c0_i32_1 = arith.constant 0 : i32
    return %c0_i32, %c0_i32_0 : i32, i32
  }
}

module attributes {stable_mosaic.version = 11 : i64} {
  func.func @clip_stack_kernel(%arg0: i32, %arg1: i32, %arg2: memref<1x5x32xf32, #tpu.memory_space<vmem>>, %arg3: memref<1x5x5xf32, #tpu.memory_space<vmem>>, %arg4: memref<1x1x32xf32, #tpu.memory_space<vmem>>, %arg5: memref<1x1x32xf32, #tpu.memory_space<vmem>>, %arg6: memref<1x32x96xf32, #tpu.memory_space<vmem>>, %arg7: memref<1x1x96xf32, #tpu.memory_space<vmem>>, %arg8: memref<1x32x32xf32, #tpu.memory_space<vmem>>, %arg9: memref<1x1x32xf32, #tpu.memory_space<vmem>>, %arg10: memref<1x1x32xf32, #tpu.memory_space<vmem>>, %arg11: memref<1x1x32xf32, #tpu.memory_space<vmem>>, %arg12: memref<1x32x128xf32, #tpu.memory_space<vmem>>, %arg13: memref<1x1x128xf32, #tpu.memory_space<vmem>>, %arg14: memref<1x128x32xf32, #tpu.memory_space<vmem>>, %arg15: memref<1x1x32xf32, #tpu.memory_space<vmem>>, %arg16: memref<1x32xf32, #tpu.memory_space<vmem>>, %arg17: memref<1x32xf32, #tpu.memory_space<vmem>>, %arg18: memref<1x32xf32, #tpu.memory_space<vmem>>, %arg19: memref<1x32xf32, #tpu.memory_space<vmem>>, %arg20: memref<1x5x32xf32, #tpu.memory_space<vmem>>) attributes {dimension_semantics = [#tpu.dimension_semantics<parallel>, #tpu.dimension_semantics<arbitrary>], iteration_bounds = array<i64: 4, 2>, scalar_prefetch = 0 : i64, scratch_operands = 0 : i64, tpu.core_type = #tpu.core_type<tc>, window_params = [{transform_indices = @transform_0, window_bounds = array<i64: 1, 5, 32>}, {transform_indices = @transform_1, window_bounds = array<i64: 1, 5, 5>}, {transform_indices = @transform_2, window_bounds = array<i64: 1, 1, 32>}, {transform_indices = @transform_3, window_bounds = array<i64: 1, 1, 32>}, {transform_indices = @transform_4, window_bounds = array<i64: 1, 32, 96>}, {transform_indices = @transform_5, window_bounds = array<i64: 1, 1, 96>}, {transform_indices = @transform_6, window_bounds = array<i64: 1, 32, 32>}, {transform_indices = @transform_7, window_bounds = array<i64: 1, 1, 32>}, {transform_indices = @transform_8, window_bounds = array<i64: 1, 1, 32>}, {transform_indices = @transform_9, window_bounds = array<i64: 1, 1, 32>}, {transform_indices = @transform_10, window_bounds = array<i64: 1, 32, 128>}, {transform_indices = @transform_11, window_bounds = array<i64: 1, 1, 128>}, {transform_indices = @transform_12, window_bounds = array<i64: 1, 128, 32>}, {transform_indices = @transform_13, window_bounds = array<i64: 1, 1, 32>}, {pipeline_mode = #tpu.pipeline_mode<synchronous>, transform_indices = @transform_14, window_bounds = array<i64: 1, 32>}, {pipeline_mode = #tpu.pipeline_mode<synchronous>, transform_indices = @transform_15, window_bounds = array<i64: 1, 32>}, {pipeline_mode = #tpu.pipeline_mode<synchronous>, transform_indices = @transform_16, window_bounds = array<i64: 1, 32>}, {pipeline_mode = #tpu.pipeline_mode<synchronous>, transform_indices = @transform_17, window_bounds = array<i64: 1, 32>}, {transform_indices = @transform_18, window_bounds = array<i64: 1, 5, 32>}]} {
    %c0_i32 = arith.constant 0 : i32
    %0 = arith.cmpi eq, %arg1, %c0_i32 : i32
    %1 = arith.extui %0 : i1 to i32
    %c0_i32_0 = arith.constant 0 : i32
    %2 = arith.cmpi ne, %1, %c0_i32_0 : i32
    scf.if %2 {
      %c0_81 = arith.constant 0 : index
      %c0_82 = arith.constant 0 : index
      %c0_83 = arith.constant 0 : index
      %179 = vector.load %arg2[%c0_81, %c0_82, %c0_83] : memref<1x5x32xf32, #tpu.memory_space<vmem>>, vector<1x5x32xf32>
      %180 = vector.shape_cast %179 : vector<1x5x32xf32> to vector<5x32xf32>
      %c0_84 = arith.constant 0 : index
      %c0_85 = arith.constant 0 : index
      %181 = vector.load %arg16[%c0_84, %c0_85] : memref<1x32xf32, #tpu.memory_space<vmem>>, vector<1x32xf32>
      %c0_86 = arith.constant 0 : index
      %c0_87 = arith.constant 0 : index
      %182 = vector.load %arg17[%c0_86, %c0_87] : memref<1x32xf32, #tpu.memory_space<vmem>>, vector<1x32xf32>
      %cst_88 = arith.constant dense<0.000000e+00> : vector<5xf32>
      %183 = vector.multi_reduction <add>, %180, %cst_88 [1] : vector<5x32xf32> to vector<5xf32>
      %184 = vector.shape_cast %183 : vector<5xf32> to vector<5x1xf32>
      %cst_89 = arith.constant 3.200000e+01 : f32
      %185 = vector.broadcast %cst_89 : f32 to vector<5x1xf32>
      %186 = arith.divf %184, %185 : vector<5x1xf32>
      %187 = vector.broadcast %186 : vector<5x1xf32> to vector<5x32xf32>
      %188 = arith.subf %180, %187 : vector<5x32xf32>
      %189 = arith.mulf %188, %188 : vector<5x32xf32>
      %cst_90 = arith.constant dense<0.000000e+00> : vector<5xf32>
      %190 = vector.multi_reduction <add>, %189, %cst_90 [1] : vector<5x32xf32> to vector<5xf32>
      %191 = vector.shape_cast %190 : vector<5xf32> to vector<5x1xf32>
      %cst_91 = arith.constant 3.200000e+01 : f32
      %192 = vector.broadcast %cst_91 : f32 to vector<5x1xf32>
      %193 = arith.divf %191, %192 : vector<5x1xf32>
      %194 = vector.broadcast %186 : vector<5x1xf32> to vector<5x32xf32>
      %195 = arith.subf %180, %194 : vector<5x32xf32>
      %cst_92 = arith.constant 9.99999974E-6 : f32
      %196 = vector.broadcast %cst_92 : f32 to vector<5x1xf32>
      %197 = arith.addf %193, %196 : vector<5x1xf32>
      %198 = math.rsqrt %197 : vector<5x1xf32>
      %199 = vector.broadcast %198 : vector<5x1xf32> to vector<5x32xf32>
      %200 = arith.mulf %195, %199 : vector<5x32xf32>
      %201 = vector.broadcast %181 : vector<1x32xf32> to vector<5x32xf32>
      %202 = arith.mulf %200, %201 : vector<5x32xf32>
      %203 = vector.broadcast %182 : vector<1x32xf32> to vector<5x32xf32>
      %204 = arith.addf %202, %203 : vector<5x32xf32>
      %c0_93 = arith.constant 0 : index
      %c0_94 = arith.constant 0 : index
      %c0_95 = arith.constant 0 : index
      %205 = vector.load %arg20[%c0_93, %c0_94, %c0_95] : memref<1x5x32xf32, #tpu.memory_space<vmem>>, vector<1x5x32xf32>
      %206 = vector.shape_cast %205 : vector<1x5x32xf32> to vector<5x32xf32>
      %207 = vector.shape_cast %204 : vector<5x32xf32> to vector<1x5x32xf32>
      tpu.vector_store %arg20[%c0_93, %c0_94, %c0_95], %207 {strides = array<i32>} : memref<1x5x32xf32, #tpu.memory_space<vmem>>, vector<1x5x32xf32>,
    } else {
    }
    %c0 = arith.constant 0 : index
    %c0_1 = arith.constant 0 : index
    %c0_2 = arith.constant 0 : index
    %3 = vector.load %arg20[%c0, %c0_1, %c0_2] : memref<1x5x32xf32, #tpu.memory_space<vmem>>, vector<1x5x32xf32>
    %4 = vector.shape_cast %3 : vector<1x5x32xf32> to vector<5x32xf32>
    %c0_3 = arith.constant 0 : index
    %c0_4 = arith.constant 0 : index
    %c0_5 = arith.constant 0 : index
    %5 = vector.load %arg4[%c0_3, %c0_4, %c0_5] : memref<1x1x32xf32, #tpu.memory_space<vmem>>, vector<1x1x32xf32>
    %6 = vector.shape_cast %5 : vector<1x1x32xf32> to vector<1x32xf32>
    %c0_6 = arith.constant 0 : index
    %c0_7 = arith.constant 0 : index
    %c0_8 = arith.constant 0 : index
    %7 = vector.load %arg5[%c0_6, %c0_7, %c0_8] : memref<1x1x32xf32, #tpu.memory_space<vmem>>, vector<1x1x32xf32>
    %8 = vector.shape_cast %7 : vector<1x1x32xf32> to vector<1x32xf32>
    %cst = arith.constant dense<0.000000e+00> : vector<5xf32>
    %9 = vector.multi_reduction <add>, %4, %cst [1] : vector<5x32xf32> to vector<5xf32>
    %10 = vector.shape_cast %9 : vector<5xf32> to vector<5x1xf32>
    %cst_9 = arith.constant 3.200000e+01 : f32
    %11 = vector.broadcast %cst_9 : f32 to vector<5x1xf32>
    %12 = arith.divf %10, %11 : vector<5x1xf32>
    %13 = vector.broadcast %12 : vector<5x1xf32> to vector<5x32xf32>
    %14 = arith.subf %4, %13 : vector<5x32xf32>
    %15 = arith.mulf %14, %14 : vector<5x32xf32>
    %cst_10 = arith.constant dense<0.000000e+00> : vector<5xf32>
    %16 = vector.multi_reduction <add>, %15, %cst_10 [1] : vector<5x32xf32> to vector<5xf32>
    %17 = vector.shape_cast %16 : vector<5xf32> to vector<5x1xf32>
    %cst_11 = arith.constant 3.200000e+01 : f32
    %18 = vector.broadcast %cst_11 : f32 to vector<5x1xf32>
    %19 = arith.divf %17, %18 : vector<5x1xf32>
    %20 = vector.broadcast %12 : vector<5x1xf32> to vector<5x32xf32>
    %21 = arith.subf %4, %20 : vector<5x32xf32>
    %cst_12 = arith.constant 9.99999974E-6 : f32
    %22 = vector.broadcast %cst_12 : f32 to vector<5x1xf32>
    %23 = arith.addf %19, %22 : vector<5x1xf32>
    %24 = math.rsqrt %23 : vector<5x1xf32>
    %25 = vector.broadcast %24 : vector<5x1xf32> to vector<5x32xf32>
    %26 = arith.mulf %21, %25 : vector<5x32xf32>
    %27 = vector.broadcast %6 : vector<1x32xf32> to vector<5x32xf32>
    %28 = arith.mulf %26, %27 : vector<5x32xf32>
    %29 = vector.broadcast %8 : vector<1x32xf32> to vector<5x32xf32>
    %30 = arith.addf %28, %29 : vector<5x32xf32>
    %c0_13 = arith.constant 0 : index
    %c0_14 = arith.constant 0 : index
    %c0_15 = arith.constant 0 : index
    %31 = vector.load %arg6[%c0_13, %c0_14, %c0_15] : memref<1x32x96xf32, #tpu.memory_space<vmem>>, vector<1x32x96xf32>
    %32 = vector.shape_cast %31 : vector<1x32x96xf32> to vector<32x96xf32>
    %cst_16 = arith.constant dense<0.000000e+00> : vector<5x96xf32>
    %33 = tpu.matmul %30, %32, %cst_16 {dimension_numbers = #tpu.dot_dimension_numbers<[1], [0], [0], [1], [0, 0, 1, 1], [], []>} : vector<5x32xf32>, vector<32x96xf32>, vector<5x96xf32> -> vector<5x96xf32>
    %c0_17 = arith.constant 0 : index
    %c0_18 = arith.constant 0 : index
    %c0_19 = arith.constant 0 : index
    %34 = vector.load %arg7[%c0_17, %c0_18, %c0_19] : memref<1x1x96xf32, #tpu.memory_space<vmem>>, vector<1x1x96xf32>
    %35 = vector.shape_cast %34 : vector<1x1x96xf32> to vector<1x96xf32>
    %36 = vector.broadcast %35 : vector<1x96xf32> to vector<5x96xf32>
    %37 = arith.addf %33, %36 : vector<5x96xf32>
    %38 = vector.extract_strided_slice %37 {offsets = [0, 0], sizes = [5, 32], strides = [1, 1]} : vector<5x96xf32> to vector<5x32xf32>
    %39 = vector.extract_strided_slice %37 {offsets = [0, 32], sizes = [5, 32], strides = [1, 1]} : vector<5x96xf32> to vector<5x32xf32>
    %40 = vector.extract_strided_slice %37 {offsets = [0, 64], sizes = [5, 32], strides = [1, 1]} : vector<5x96xf32> to vector<5x32xf32>
    %c0_20 = arith.constant 0 : index
    %c0_21 = arith.constant 0 : index
    %c0_22 = arith.constant 0 : index
    %41 = vector.load %arg3[%c0_20, %c0_21, %c0_22] : memref<1x5x5xf32, #tpu.memory_space<vmem>>, vector<1x5x5xf32>
    %42 = vector.shape_cast %41 : vector<1x5x5xf32> to vector<5x5xf32>
    %43 = vector.extract_strided_slice %38 {offsets = [0, 0], sizes = [5, 8], strides = [1, 1]} : vector<5x32xf32> to vector<5x8xf32>
    %44 = vector.extract_strided_slice %39 {offsets = [0, 0], sizes = [5, 8], strides = [1, 1]} : vector<5x32xf32> to vector<5x8xf32>
    %45 = vector.extract_strided_slice %40 {offsets = [0, 0], sizes = [5, 8], strides = [1, 1]} : vector<5x32xf32> to vector<5x8xf32>
    %cst_23 = arith.constant dense<0.000000e+00> : vector<5x5xf32>
    %46 = tpu.matmul %43, %44, %cst_23 {dimension_numbers = #tpu.dot_dimension_numbers<[1], [1], [0], [0], [0, 0, 1, 0], [], []>} : vector<5x8xf32>, vector<5x8xf32>, vector<5x5xf32> -> vector<5x5xf32>
    %cst_24 = arith.constant 0.353553385 : f32
    %47 = vector.broadcast %cst_24 : f32 to vector<5x5xf32>
    %48 = arith.mulf %46, %47 : vector<5x5xf32>
    %49 = arith.addf %48, %42 : vector<5x5xf32>
    %cst_25 = arith.constant dense<0xFF800000> : vector<5xf32>
    %50 = vector.multi_reduction <maximumf>, %49, %cst_25 [1] : vector<5x5xf32> to vector<5xf32>
    %51 = vector.shape_cast %50 : vector<5xf32> to vector<5x1xf32>
    %52 = vector.broadcast %51 : vector<5x1xf32> to vector<5x5xf32>
    %53 = arith.subf %49, %52 : vector<5x5xf32>
    %54 = math.exp %53 : vector<5x5xf32>
    %cst_26 = arith.constant dense<0.000000e+00> : vector<5xf32>
    %55 = vector.multi_reduction <add>, %54, %cst_26 [1] : vector<5x5xf32> to vector<5xf32>
    %56 = vector.shape_cast %55 : vector<5xf32> to vector<5x1xf32>
    %57 = tpu.reciprocal %56 {approx = true} : vector<5x1xf32> -> vector<5x1xf32>
    %58 = vector.broadcast %57 : vector<5x1xf32> to vector<5x5xf32>
    %59 = arith.mulf %54, %58 : vector<5x5xf32>
    %cst_27 = arith.constant dense<0.000000e+00> : vector<5x8xf32>
    %60 = tpu.matmul %59, %45, %cst_27 {dimension_numbers = #tpu.dot_dimension_numbers<[1], [0], [0], [1], [0, 0, 1, 1], [], []>} : vector<5x5xf32>, vector<5x8xf32>, vector<5x8xf32> -> vector<5x8xf32>
    %61 = vector.extract_strided_slice %38 {offsets = [0, 8], sizes = [5, 8], strides = [1, 1]} : vector<5x32xf32> to vector<5x8xf32>
    %62 = vector.extract_strided_slice %39 {offsets = [0, 8], sizes = [5, 8], strides = [1, 1]} : vector<5x32xf32> to vector<5x8xf32>
    %63 = vector.extract_strided_slice %40 {offsets = [0, 8], sizes = [5, 8], strides = [1, 1]} : vector<5x32xf32> to vector<5x8xf32>
    %cst_28 = arith.constant dense<0.000000e+00> : vector<5x5xf32>
    %64 = tpu.matmul %61, %62, %cst_28 {dimension_numbers = #tpu.dot_dimension_numbers<[1], [1], [0], [0], [0, 0, 1, 0], [], []>} : vector<5x8xf32>, vector<5x8xf32>, vector<5x5xf32> -> vector<5x5xf32>
    %cst_29 = arith.constant 0.353553385 : f32
    %65 = vector.broadcast %cst_29 : f32 to vector<5x5xf32>
    %66 = arith.mulf %64, %65 : vector<5x5xf32>
    %67 = arith.addf %66, %42 : vector<5x5xf32>
    %cst_30 = arith.constant dense<0xFF800000> : vector<5xf32>
    %68 = vector.multi_reduction <maximumf>, %67, %cst_30 [1] : vector<5x5xf32> to vector<5xf32>
    %69 = vector.shape_cast %68 : vector<5xf32> to vector<5x1xf32>
    %70 = vector.broadcast %69 : vector<5x1xf32> to vector<5x5xf32>
    %71 = arith.subf %67, %70 : vector<5x5xf32>
    %72 = math.exp %71 : vector<5x5xf32>
    %cst_31 = arith.constant dense<0.000000e+00> : vector<5xf32>
    %73 = vector.multi_reduction <add>, %72, %cst_31 [1] : vector<5x5xf32> to vector<5xf32>
    %74 = vector.shape_cast %73 : vector<5xf32> to vector<5x1xf32>
    %75 = tpu.reciprocal %74 {approx = true} : vector<5x1xf32> -> vector<5x1xf32>
    %76 = vector.broadcast %75 : vector<5x1xf32> to vector<5x5xf32>
    %77 = arith.mulf %72, %76 : vector<5x5xf32>
    %cst_32 = arith.constant dense<0.000000e+00> : vector<5x8xf32>
    %78 = tpu.matmul %77, %63, %cst_32 {dimension_numbers = #tpu.dot_dimension_numbers<[1], [0], [0], [1], [0, 0, 1, 1], [], []>} : vector<5x5xf32>, vector<5x8xf32>, vector<5x8xf32> -> vector<5x8xf32>
    %79 = vector.extract_strided_slice %38 {offsets = [0, 16], sizes = [5, 8], strides = [1, 1]} : vector<5x32xf32> to vector<5x8xf32>
    %80 = vector.extract_strided_slice %39 {offsets = [0, 16], sizes = [5, 8], strides = [1, 1]} : vector<5x32xf32> to vector<5x8xf32>
    %81 = vector.extract_strided_slice %40 {offsets = [0, 16], sizes = [5, 8], strides = [1, 1]} : vector<5x32xf32> to vector<5x8xf32>
    %cst_33 = arith.constant dense<0.000000e+00> : vector<5x5xf32>
    %82 = tpu.matmul %79, %80, %cst_33 {dimension_numbers = #tpu.dot_dimension_numbers<[1], [1], [0], [0], [0, 0, 1, 0], [], []>} : vector<5x8xf32>, vector<5x8xf32>, vector<5x5xf32> -> vector<5x5xf32>
    %cst_34 = arith.constant 0.353553385 : f32
    %83 = vector.broadcast %cst_34 : f32 to vector<5x5xf32>
    %84 = arith.mulf %82, %83 : vector<5x5xf32>
    %85 = arith.addf %84, %42 : vector<5x5xf32>
    %cst_35 = arith.constant dense<0xFF800000> : vector<5xf32>
    %86 = vector.multi_reduction <maximumf>, %85, %cst_35 [1] : vector<5x5xf32> to vector<5xf32>
    %87 = vector.shape_cast %86 : vector<5xf32> to vector<5x1xf32>
    %88 = vector.broadcast %87 : vector<5x1xf32> to vector<5x5xf32>
    %89 = arith.subf %85, %88 : vector<5x5xf32>
    %90 = math.exp %89 : vector<5x5xf32>
    %cst_36 = arith.constant dense<0.000000e+00> : vector<5xf32>
    %91 = vector.multi_reduction <add>, %90, %cst_36 [1] : vector<5x5xf32> to vector<5xf32>
    %92 = vector.shape_cast %91 : vector<5xf32> to vector<5x1xf32>
    %93 = tpu.reciprocal %92 {approx = true} : vector<5x1xf32> -> vector<5x1xf32>
    %94 = vector.broadcast %93 : vector<5x1xf32> to vector<5x5xf32>
    %95 = arith.mulf %90, %94 : vector<5x5xf32>
    %cst_37 = arith.constant dense<0.000000e+00> : vector<5x8xf32>
    %96 = tpu.matmul %95, %81, %cst_37 {dimension_numbers = #tpu.dot_dimension_numbers<[1], [0], [0], [1], [0, 0, 1, 1], [], []>} : vector<5x5xf32>, vector<5x8xf32>, vector<5x8xf32> -> vector<5x8xf32>
    %97 = vector.extract_strided_slice %38 {offsets = [0, 24], sizes = [5, 8], strides = [1, 1]} : vector<5x32xf32> to vector<5x8xf32>
    %98 = vector.extract_strided_slice %39 {offsets = [0, 24], sizes = [5, 8], strides = [1, 1]} : vector<5x32xf32> to vector<5x8xf32>
    %99 = vector.extract_strided_slice %40 {offsets = [0, 24], sizes = [5, 8], strides = [1, 1]} : vector<5x32xf32> to vector<5x8xf32>
    %cst_38 = arith.constant dense<0.000000e+00> : vector<5x5xf32>
    %100 = tpu.matmul %97, %98, %cst_38 {dimension_numbers = #tpu.dot_dimension_numbers<[1], [1], [0], [0], [0, 0, 1, 0], [], []>} : vector<5x8xf32>, vector<5x8xf32>, vector<5x5xf32> -> vector<5x5xf32>
    %cst_39 = arith.constant 0.353553385 : f32
    %101 = vector.broadcast %cst_39 : f32 to vector<5x5xf32>
    %102 = arith.mulf %100, %101 : vector<5x5xf32>
    %103 = arith.addf %102, %42 : vector<5x5xf32>
    %cst_40 = arith.constant dense<0xFF800000> : vector<5xf32>
    %104 = vector.multi_reduction <maximumf>, %103, %cst_40 [1] : vector<5x5xf32> to vector<5xf32>
    %105 = vector.shape_cast %104 : vector<5xf32> to vector<5x1xf32>
    %106 = vector.broadcast %105 : vector<5x1xf32> to vector<5x5xf32>
    %107 = arith.subf %103, %106 : vector<5x5xf32>
    %108 = math.exp %107 : vector<5x5xf32>
    %cst_41 = arith.constant dense<0.000000e+00> : vector<5xf32>
    %109 = vector.multi_reduction <add>, %108, %cst_41 [1] : vector<5x5xf32> to vector<5xf32>
    %110 = vector.shape_cast %109 : vector<5xf32> to vector<5x1xf32>
    %111 = tpu.reciprocal %110 {approx = true} : vector<5x1xf32> -> vector<5x1xf32>
    %112 = vector.broadcast %111 : vector<5x1xf32> to vector<5x5xf32>
    %113 = arith.mulf %108, %112 : vector<5x5xf32>
    %cst_42 = arith.constant dense<0.000000e+00> : vector<5x8xf32>
    %114 = tpu.matmul %113, %99, %cst_42 {dimension_numbers = #tpu.dot_dimension_numbers<[1], [0], [0], [1], [0, 0, 1, 1], [], []>} : vector<5x5xf32>, vector<5x8xf32>, vector<5x8xf32> -> vector<5x8xf32>
    %115 = tpu.concatenate %60, %78, %96, %114 in 1 : vector<5x8xf32>, vector<5x8xf32>, vector<5x8xf32>, vector<5x8xf32> -> vector<5x32xf32>
    %c0_43 = arith.constant 0 : index
    %c0_44 = arith.constant 0 : index
    %c0_45 = arith.constant 0 : index
    %116 = vector.load %arg8[%c0_43, %c0_44, %c0_45] : memref<1x32x32xf32, #tpu.memory_space<vmem>>, vector<1x32x32xf32>
    %117 = vector.shape_cast %116 : vector<1x32x32xf32> to vector<32x32xf32>
    %cst_46 = arith.constant dense<0.000000e+00> : vector<5x32xf32>
    %118 = tpu.matmul %115, %117, %cst_46 {dimension_numbers = #tpu.dot_dimension_numbers<[1], [0], [0], [1], [0, 0, 1, 1], [], []>} : vector<5x32xf32>, vector<32x32xf32>, vector<5x32xf32> -> vector<5x32xf32>
    %c0_47 = arith.constant 0 : index
    %c0_48 = arith.constant 0 : index
    %c0_49 = arith.constant 0 : index
    %119 = vector.load %arg9[%c0_47, %c0_48, %c0_49] : memref<1x1x32xf32, #tpu.memory_space<vmem>>, vector<1x1x32xf32>
    %120 = vector.shape_cast %119 : vector<1x1x32xf32> to vector<1x32xf32>
    %121 = vector.broadcast %120 : vector<1x32xf32> to vector<5x32xf32>
    %122 = arith.addf %118, %121 : vector<5x32xf32>
    %123 = arith.addf %4, %122 : vector<5x32xf32>
    %c0_50 = arith.constant 0 : index
    %c0_51 = arith.constant 0 : index
    %c0_52 = arith.constant 0 : index
    %124 = vector.load %arg10[%c0_50, %c0_51, %c0_52] : memref<1x1x32xf32, #tpu.memory_space<vmem>>, vector<1x1x32xf32>
    %125 = vector.shape_cast %124 : vector<1x1x32xf32> to vector<1x32xf32>
    %c0_53 = arith.constant 0 : index
    %c0_54 = arith.constant 0 : index
    %c0_55 = arith.constant 0 : index
    %126 = vector.load %arg11[%c0_53, %c0_54, %c0_55] : memref<1x1x32xf32, #tpu.memory_space<vmem>>, vector<1x1x32xf32>
    %127 = vector.shape_cast %126 : vector<1x1x32xf32> to vector<1x32xf32>
    %cst_56 = arith.constant dense<0.000000e+00> : vector<5xf32>
    %128 = vector.multi_reduction <add>, %123, %cst_56 [1] : vector<5x32xf32> to vector<5xf32>
    %129 = vector.shape_cast %128 : vector<5xf32> to vector<5x1xf32>
    %cst_57 = arith.constant 3.200000e+01 : f32
    %130 = vector.broadcast %cst_57 : f32 to vector<5x1xf32>
    %131 = arith.divf %129, %130 : vector<5x1xf32>
    %132 = vector.broadcast %131 : vector<5x1xf32> to vector<5x32xf32>
    %133 = arith.subf %123, %132 : vector<5x32xf32>
    %134 = arith.mulf %133, %133 : vector<5x32xf32>
    %cst_58 = arith.constant dense<0.000000e+00> : vector<5xf32>
    %135 = vector.multi_reduction <add>, %134, %cst_58 [1] : vector<5x32xf32> to vector<5xf32>
    %136 = vector.shape_cast %135 : vector<5xf32> to vector<5x1xf32>
    %cst_59 = arith.constant 3.200000e+01 : f32
    %137 = vector.broadcast %cst_59 : f32 to vector<5x1xf32>
    %138 = arith.divf %136, %137 : vector<5x1xf32>
    %139 = vector.broadcast %131 : vector<5x1xf32> to vector<5x32xf32>
    %140 = arith.subf %123, %139 : vector<5x32xf32>
    %cst_60 = arith.constant 9.99999974E-6 : f32
    %141 = vector.broadcast %cst_60 : f32 to vector<5x1xf32>
    %142 = arith.addf %138, %141 : vector<5x1xf32>
    %143 = math.rsqrt %142 : vector<5x1xf32>
    %144 = vector.broadcast %143 : vector<5x1xf32> to vector<5x32xf32>
    %145 = arith.mulf %140, %144 : vector<5x32xf32>
    %146 = vector.broadcast %125 : vector<1x32xf32> to vector<5x32xf32>
    %147 = arith.mulf %145, %146 : vector<5x32xf32>
    %148 = vector.broadcast %127 : vector<1x32xf32> to vector<5x32xf32>
    %149 = arith.addf %147, %148 : vector<5x32xf32>
    %c0_61 = arith.constant 0 : index
    %c0_62 = arith.constant 0 : index
    %c0_63 = arith.constant 0 : index
    %150 = vector.load %arg12[%c0_61, %c0_62, %c0_63] : memref<1x32x128xf32, #tpu.memory_space<vmem>>, vector<1x32x128xf32>
    %151 = vector.shape_cast %150 : vector<1x32x128xf32> to vector<32x128xf32>
    %cst_64 = arith.constant dense<0.000000e+00> : vector<5x128xf32>
    %152 = tpu.matmul %149, %151, %cst_64 {dimension_numbers = #tpu.dot_dimension_numbers<[1], [0], [0], [1], [0, 0, 1, 1], [], []>} : vector<5x32xf32>, vector<32x128xf32>, vector<5x128xf32> -> vector<5x128xf32>
    %c0_65 = arith.constant 0 : index
    %c0_66 = arith.constant 0 : index
    %c0_67 = arith.constant 0 : index
    %153 = vector.load %arg13[%c0_65, %c0_66, %c0_67] : memref<1x1x128xf32, #tpu.memory_space<vmem>>, vector<1x1x128xf32>
    %154 = vector.shape_cast %153 : vector<1x1x128xf32> to vector<1x128xf32>
    %155 = vector.broadcast %154 : vector<1x128xf32> to vector<5x128xf32>
    %156 = arith.addf %152, %155 : vector<5x128xf32>
    %cst_68 = arith.constant 1.702000e+00 : f32
    %157 = vector.broadcast %cst_68 : f32 to vector<5x128xf32>
    %158 = arith.mulf %157, %156 : vector<5x128xf32>
    %159 = arith.negf %158 : vector<5x128xf32>
    %160 = math.exp %159 : vector<5x128xf32>
    %cst_69 = arith.constant 1.000000e+00 : f32
    %161 = vector.broadcast %cst_69 : f32 to vector<5x128xf32>
    %162 = arith.addf %161, %160 : vector<5x128xf32>
    %163 = arith.divf %161, %162 : vector<5x128xf32>
    %164 = arith.mulf %156, %163 : vector<5x128xf32>
    %c0_70 = arith.constant 0 : index
    %c0_71 = arith.constant 0 : index
    %c0_72 = arith.constant 0 : index
    %165 = vector.load %arg14[%c0_70, %c0_71, %c0_72] : memref<1x128x32xf32, #tpu.memory_space<vmem>>, vector<1x128x32xf32>
    %166 = vector.shape_cast %165 : vector<1x128x32xf32> to vector<128x32xf32>
    %cst_73 = arith.constant dense<0.000000e+00> : vector<5x32xf32>
    %167 = tpu.matmul %164, %166, %cst_73 {dimension_numbers = #tpu.dot_dimension_numbers<[1], [0], [0], [1], [0, 0, 1, 1], [], []>} : vector<5x128xf32>, vector<128x32xf32>, vector<5x32xf32> -> vector<5x32xf32>
    %168 = arith.addf %123, %167 : vector<5x32xf32>
    %c0_74 = arith.constant 0 : index
    %c0_75 = arith.constant 0 : index
    %c0_76 = arith.constant 0 : index
    %169 = vector.load %arg15[%c0_74, %c0_75, %c0_76] : memref<1x1x32xf32, #tpu.memory_space<vmem>>, vector<1x1x32xf32>
    %170 = vector.shape_cast %169 : vector<1x1x32xf32> to vector<1x32xf32>
    %171 = vector.broadcast %170 : vector<1x32xf32> to vector<5x32xf32>
    %172 = arith.addf %168, %171 : vector<5x32xf32>
    %c0_77 = arith.constant 0 : index
    %c0_78 = arith.constant 0 : index
    %c0_79 = arith.constant 0 : index
    %173 = vector.load %arg20[%c0_77, %c0_78, %c0_79] : memref<1x5x32xf32, #tpu.memory_space<vmem>>, vector<1x5x32xf32>
    %174 = vector.shape_cast %173 : vector<1x5x32xf32> to vector<5x32xf32>
    %175 = vector.shape_cast %172 : vector<5x32xf32> to vector<1x5x32xf32>
    tpu.vector_store %arg20[%c0_77, %c0_78, %c0_79], %175 {strides = array<i32>} : memref<1x5x32xf32, #tpu.memory_space<vmem>>, vector<1x5x32xf32>,
    %c1_i32 = arith.constant 1 : i32
    %176 = arith.cmpi eq, %arg1, %c1_i32 : i32
    %177 = arith.extui %176 : i1 to i32
    %c0_i32_80 = arith.constant 0 : i32
    %178 = arith.cmpi ne, %177, %c0_i32_80 : i32
    scf.if %178 {
      %c0_81 = arith.constant 0 : index
      %c0_82 = arith.constant 0 : index
      %c0_83 = arith.constant 0 : index
      %179 = vector.load %arg20[%c0_81, %c0_82, %c0_83] : memref<1x5x32xf32, #tpu.memory_space<vmem>>, vector<1x5x32xf32>
      %180 = vector.shape_cast %179 : vector<1x5x32xf32> to vector<5x32xf32>
      %c0_84 = arith.constant 0 : index
      %c0_85 = arith.constant 0 : index
      %181 = vector.load %arg18[%c0_84, %c0_85] : memref<1x32xf32, #tpu.memory_space<vmem>>, vector<1x32xf32>
      %c0_86 = arith.constant 0 : index
      %c0_87 = arith.constant 0 : index
      %182 = vector.load %arg19[%c0_86, %c0_87] : memref<1x32xf32, #tpu.memory_space<vmem>>, vector<1x32xf32>
      %cst_88 = arith.constant dense<0.000000e+00> : vector<5xf32>
      %183 = vector.multi_reduction <add>, %180, %cst_88 [1] : vector<5x32xf32> to vector<5xf32>
      %184 = vector.shape_cast %183 : vector<5xf32> to vector<5x1xf32>
      %cst_89 = arith.constant 3.200000e+01 : f32
      %185 = vector.broadcast %cst_89 : f32 to vector<5x1xf32>
      %186 = arith.divf %184, %185 : vector<5x1xf32>
      %187 = vector.broadcast %186 : vector<5x1xf32> to vector<5x32xf32>
      %188 = arith.subf %180, %187 : vector<5x32xf32>
      %189 = arith.mulf %188, %188 : vector<5x32xf32>
      %cst_90 = arith.constant dense<0.000000e+00> : vector<5xf32>
      %190 = vector.multi_reduction <add>, %189, %cst_90 [1] : vector<5x32xf32> to vector<5xf32>
      %191 = vector.shape_cast %190 : vector<5xf32> to vector<5x1xf32>
      %cst_91 = arith.constant 3.200000e+01 : f32
      %192 = vector.broadcast %cst_91 : f32 to vector<5x1xf32>
      %193 = arith.divf %191, %192 : vector<5x1xf32>
      %194 = vector.broadcast %186 : vector<5x1xf32> to vector<5x32xf32>
      %195 = arith.subf %180, %194 : vector<5x32xf32>
      %cst_92 = arith.constant 9.99999974E-6 : f32
      %196 = vector.broadcast %cst_92 : f32 to vector<5x1xf32>
      %197 = arith.addf %193, %196 : vector<5x1xf32>
      %198 = math.rsqrt %197 : vector<5x1xf32>
      %199 = vector.broadcast %198 : vector<5x1xf32> to vector<5x32xf32>
      %200 = arith.mulf %195, %199 : vector<5x32xf32>
      %201 = vector.broadcast %181 : vector<1x32xf32> to vector<5x32xf32>
      %202 = arith.mulf %200, %201 : vector<5x32xf32>
      %203 = vector.broadcast %182 : vector<1x32xf32> to vector<5x32xf32>
      %204 = arith.addf %202, %203 : vector<5x32xf32>
      %c0_93 = arith.constant 0 : index
      %c0_94 = arith.constant 0 : index
      %c0_95 = arith.constant 0 : index
      %205 = vector.load %arg20[%c0_93, %c0_94, %c0_95] : memref<1x5x32xf32, #tpu.memory_space<vmem>>, vector<1x5x32xf32>
      %206 = vector.shape_cast %205 : vector<1x5x32xf32> to vector<5x32xf32>
      %207 = vector.shape_cast %204 : vector<5x32xf32> to vector<1x5x32xf32>
      tpu.vector_store %arg20[%c0_93, %c0_94, %c0_95], %207 {strides = array<i32>} : memref<1x5x32xf32, #tpu.memory_space<vmem>>, vector<1x5x32xf32>,
    } else {
    }
    return
  }
  func.func @transform_0(%arg0: i32, %arg1: i32) -> (i32, i32, i32) {
    %c0_i32 = arith.constant 0 : i32
    %c0_i32_0 = arith.constant 0 : i32
    %c0_i32_1 = arith.constant 0 : i32
    return %arg0, %c0_i32, %c0_i32_0 : i32, i32, i32
  }
  func.func @transform_1(%arg0: i32, %arg1: i32) -> (i32, i32, i32) {
    %c0_i32 = arith.constant 0 : i32
    %c0_i32_0 = arith.constant 0 : i32
    %c0_i32_1 = arith.constant 0 : i32
    return %arg0, %c0_i32, %c0_i32_0 : i32, i32, i32
  }
  func.func @transform_2(%arg0: i32, %arg1: i32) -> (i32, i32, i32) {
    %c0_i32 = arith.constant 0 : i32
    %c0_i32_0 = arith.constant 0 : i32
    %c0_i32_1 = arith.constant 0 : i32
    return %arg1, %c0_i32, %c0_i32_0 : i32, i32, i32
  }
  func.func @transform_3(%arg0: i32, %arg1: i32) -> (i32, i32, i32) {
    %c0_i32 = arith.constant 0 : i32
    %c0_i32_0 = arith.constant 0 : i32
    %c0_i32_1 = arith.constant 0 : i32
    return %arg1, %c0_i32, %c0_i32_0 : i32, i32, i32
  }
  func.func @transform_4(%arg0: i32, %arg1: i32) -> (i32, i32, i32) {
    %c0_i32 = arith.constant 0 : i32
    %c0_i32_0 = arith.constant 0 : i32
    %c0_i32_1 = arith.constant 0 : i32
    return %arg1, %c0_i32, %c0_i32_0 : i32, i32, i32
  }
  func.func @transform_5(%arg0: i32, %arg1: i32) -> (i32, i32, i32) {
    %c0_i32 = arith.constant 0 : i32
    %c0_i32_0 = arith.constant 0 : i32
    %c0_i32_1 = arith.constant 0 : i32
    return %arg1, %c0_i32, %c0_i32_0 : i32, i32, i32
  }
  func.func @transform_6(%arg0: i32, %arg1: i32) -> (i32, i32, i32) {
    %c0_i32 = arith.constant 0 : i32
    %c0_i32_0 = arith.constant 0 : i32
    %c0_i32_1 = arith.constant 0 : i32
    return %arg1, %c0_i32, %c0_i32_0 : i32, i32, i32
  }
  func.func @transform_7(%arg0: i32, %arg1: i32) -> (i32, i32, i32) {
    %c0_i32 = arith.constant 0 : i32
    %c0_i32_0 = arith.constant 0 : i32
    %c0_i32_1 = arith.constant 0 : i32
    return %arg1, %c0_i32, %c0_i32_0 : i32, i32, i32
  }
  func.func @transform_8(%arg0: i32, %arg1: i32) -> (i32, i32, i32) {
    %c0_i32 = arith.constant 0 : i32
    %c0_i32_0 = arith.constant 0 : i32
    %c0_i32_1 = arith.constant 0 : i32
    return %arg1, %c0_i32, %c0_i32_0 : i32, i32, i32
  }
  func.func @transform_9(%arg0: i32, %arg1: i32) -> (i32, i32, i32) {
    %c0_i32 = arith.constant 0 : i32
    %c0_i32_0 = arith.constant 0 : i32
    %c0_i32_1 = arith.constant 0 : i32
    return %arg1, %c0_i32, %c0_i32_0 : i32, i32, i32
  }
  func.func @transform_10(%arg0: i32, %arg1: i32) -> (i32, i32, i32) {
    %c0_i32 = arith.constant 0 : i32
    %c0_i32_0 = arith.constant 0 : i32
    %c0_i32_1 = arith.constant 0 : i32
    return %arg1, %c0_i32, %c0_i32_0 : i32, i32, i32
  }
  func.func @transform_11(%arg0: i32, %arg1: i32) -> (i32, i32, i32) {
    %c0_i32 = arith.constant 0 : i32
    %c0_i32_0 = arith.constant 0 : i32
    %c0_i32_1 = arith.constant 0 : i32
    return %arg1, %c0_i32, %c0_i32_0 : i32, i32, i32
  }
  func.func @transform_12(%arg0: i32, %arg1: i32) -> (i32, i32, i32) {
    %c0_i32 = arith.constant 0 : i32
    %c0_i32_0 = arith.constant 0 : i32
    %c0_i32_1 = arith.constant 0 : i32
    return %arg1, %c0_i32, %c0_i32_0 : i32, i32, i32
  }
  func.func @transform_13(%arg0: i32, %arg1: i32) -> (i32, i32, i32) {
    %c0_i32 = arith.constant 0 : i32
    %c0_i32_0 = arith.constant 0 : i32
    %c0_i32_1 = arith.constant 0 : i32
    return %arg1, %c0_i32, %c0_i32_0 : i32, i32, i32
  }
  func.func @transform_14(%arg0: i32, %arg1: i32) -> (i32, i32) {
    %c0_i32 = arith.constant 0 : i32
    %c0_i32_0 = arith.constant 0 : i32
    %c0_i32_1 = arith.constant 0 : i32
    return %c0_i32, %c0_i32_0 : i32, i32
  }
  func.func @transform_15(%arg0: i32, %arg1: i32) -> (i32, i32) {
    %c0_i32 = arith.constant 0 : i32
    %c0_i32_0 = arith.constant 0 : i32
    %c0_i32_1 = arith.constant 0 : i32
    return %c0_i32, %c0_i32_0 : i32, i32
  }
  func.func @transform_16(%arg0: i32, %arg1: i32) -> (i32, i32) {
    %c0_i32 = arith.constant 0 : i32
    %c0_i32_0 = arith.constant 0 : i32
    %c0_i32_1 = arith.constant 0 : i32
    return %c0_i32, %c0_i32_0 : i32, i32
  }
  func.func @transform_17(%arg0: i32, %arg1: i32) -> (i32, i32) {
    %c0_i32 = arith.constant 0 : i32
    %c0_i32_0 = arith.constant 0 : i32
    %c0_i32_1 = arith.constant 0 : i32
    return %c0_i32, %c0_i32_0 : i32, i32
  }
  func.func @transform_18(%arg0: i32, %arg1: i32) -> (i32, i32, i32) {
    %c0_i32 = arith.constant 0 : i32
    %c0_i32_0 = arith.constant 0 : i32
    %c0_i32_1 = arith.constant 0 : i32
    return %arg0, %c0_i32, %c0_i32_0 : i32, i32, i32
  }
}

module attributes {stable_mosaic.version = 11 : i64} {
  func.func @matmul_kernel(%arg0: i32, %arg1: memref<4x32xf32, #tpu.memory_space<vmem>>, %arg2: memref<32x16xf32, #tpu.memory_space<vmem>>, %arg3: memref<4x16xf32, #tpu.memory_space<vmem>>) attributes {dimension_semantics = [#tpu.dimension_semantics<arbitrary>], iteration_bounds = array<i64: 1>, scalar_prefetch = 0 : i64, scratch_operands = 0 : i64, tpu.core_type = #tpu.core_type<tc>, window_params = [{pipeline_mode = #tpu.pipeline_mode<synchronous>, transform_indices = @transform_0, window_bounds = array<i64: 4, 32>}, {pipeline_mode = #tpu.pipeline_mode<synchronous>, transform_indices = @transform_1, window_bounds = array<i64: 32, 16>}, {pipeline_mode = #tpu.pipeline_mode<synchronous>, transform_indices = @transform_2, window_bounds = array<i64: 4, 16>}]} {
    %c0 = arith.constant 0 : index
    %c0_0 = arith.constant 0 : index
    %0 = vector.load %arg1[%c0, %c0_0] : memref<4x32xf32, #tpu.memory_space<vmem>>, vector<4x32xf32>
    %c0_1 = arith.constant 0 : index
    %c0_2 = arith.constant 0 : index
    %1 = vector.load %arg2[%c0_1, %c0_2] : memref<32x16xf32, #tpu.memory_space<vmem>>, vector<32x16xf32>
    %cst = arith.constant dense<0.000000e+00> : vector<4x16xf32>
    %2 = tpu.matmul %0, %1, %cst {dimension_numbers = #tpu.dot_dimension_numbers<[1], [0], [0], [1], [0, 0, 1, 1], [], []>} : vector<4x32xf32>, vector<32x16xf32>, vector<4x16xf32> -> vector<4x16xf32>
    %c0_3 = arith.constant 0 : index
    %c0_4 = arith.constant 0 : index
    %3 = vector.load %arg3[%c0_3, %c0_4] : memref<4x16xf32, #tpu.memory_space<vmem>>, vector<4x16xf32>
    tpu.vector_store %arg3[%c0_3, %c0_4], %2 {strides = array<i32>} : memref<4x16xf32, #tpu.memory_space<vmem>>, vector<4x16xf32>,
    return
  }
  func.func @transform_0(%arg0: i32) -> (i32, i32) {
    %c0_i32 = arith.constant 0 : i32
    %c0_i32_0 = arith.constant 0 : i32
    %c0_i32_1 = arith.constant 0 : i32
    return %c0_i32, %c0_i32_0 : i32, i32
  }
  func.func @transform_1(%arg0: i32) -> (i32, i32) {
    %c0_i32 = arith.constant 0 : i32
    %c0_i32_0 = arith.constant 0 : i32
    %c0_i32_1 = arith.constant 0 : i32
    return %c0_i32, %c0_i32_0 : i32, i32
  }
  func.func @transform_2(%arg0: i32) -> (i32, i32) {
    %c0_i32 = arith.constant 0 : i32
    %c0_i32_0 = arith.constant 0 : i32
    %c0_i32_1 = arith.constant 0 : i32
    return %c0_i32, %c0_i32_0 : i32, i32
  }
}

module attributes {stable_mosaic.version = 11 : i64} {
  func.func @matmul_kernel(%arg0: i32, %arg1: memref<2x32xf32, #tpu.memory_space<vmem>>, %arg2: memref<32x16xf32, #tpu.memory_space<vmem>>, %arg3: memref<2x16xf32, #tpu.memory_space<vmem>>) attributes {dimension_semantics = [#tpu.dimension_semantics<arbitrary>], iteration_bounds = array<i64: 1>, scalar_prefetch = 0 : i64, scratch_operands = 0 : i64, tpu.core_type = #tpu.core_type<tc>, window_params = [{pipeline_mode = #tpu.pipeline_mode<synchronous>, transform_indices = @transform_0, window_bounds = array<i64: 2, 32>}, {pipeline_mode = #tpu.pipeline_mode<synchronous>, transform_indices = @transform_1, window_bounds = array<i64: 32, 16>}, {pipeline_mode = #tpu.pipeline_mode<synchronous>, transform_indices = @transform_2, window_bounds = array<i64: 2, 16>}]} {
    %c0 = arith.constant 0 : index
    %c0_0 = arith.constant 0 : index
    %0 = vector.load %arg1[%c0, %c0_0] : memref<2x32xf32, #tpu.memory_space<vmem>>, vector<2x32xf32>
    %c0_1 = arith.constant 0 : index
    %c0_2 = arith.constant 0 : index
    %1 = vector.load %arg2[%c0_1, %c0_2] : memref<32x16xf32, #tpu.memory_space<vmem>>, vector<32x16xf32>
    %cst = arith.constant dense<0.000000e+00> : vector<2x16xf32>
    %2 = tpu.matmul %0, %1, %cst {dimension_numbers = #tpu.dot_dimension_numbers<[1], [0], [0], [1], [0, 0, 1, 1], [], []>} : vector<2x32xf32>, vector<32x16xf32>, vector<2x16xf32> -> vector<2x16xf32>
    %c0_3 = arith.constant 0 : index
    %c0_4 = arith.constant 0 : index
    %3 = vector.load %arg3[%c0_3, %c0_4] : memref<2x16xf32, #tpu.memory_space<vmem>>, vector<2x16xf32>
    tpu.vector_store %arg3[%c0_3, %c0_4], %2 {strides = array<i32>} : memref<2x16xf32, #tpu.memory_space<vmem>>, vector<2x16xf32>,
    return
  }
  func.func @transform_0(%arg0: i32) -> (i32, i32) {
    %c0_i32 = arith.constant 0 : i32
    %c0_i32_0 = arith.constant 0 : i32
    %c0_i32_1 = arith.constant 0 : i32
    return %c0_i32, %c0_i32_0 : i32, i32
  }
  func.func @transform_1(%arg0: i32) -> (i32, i32) {
    %c0_i32 = arith.constant 0 : i32
    %c0_i32_0 = arith.constant 0 : i32
    %c0_i32_1 = arith.constant 0 : i32
    return %c0_i32, %c0_i32_0 : i32, i32
  }
  func.func @transform_2(%arg0: i32) -> (i32, i32) {
    %c0_i32 = arith.constant 0 : i32
    %c0_i32_0 = arith.constant 0 : i32
    %c0_i32_1 = arith.constant 0 : i32
    return %c0_i32, %c0_i32_0 : i32, i32
  }
}

module attributes {stable_mosaic.version = 11 : i64} {
  func.func @clip_stack_kernel(%arg0: i32, %arg1: i32, %arg2: memref<1x8x32xf32, #tpu.memory_space<vmem>>, %arg3: memref<1x8x8xf32, #tpu.memory_space<vmem>>, %arg4: memref<1x1x32xf32, #tpu.memory_space<vmem>>, %arg5: memref<1x1x32xf32, #tpu.memory_space<vmem>>, %arg6: memref<1x32x96xf32, #tpu.memory_space<vmem>>, %arg7: memref<1x1x96xf32, #tpu.memory_space<vmem>>, %arg8: memref<1x32x32xf32, #tpu.memory_space<vmem>>, %arg9: memref<1x1x32xf32, #tpu.memory_space<vmem>>, %arg10: memref<1x1x32xf32, #tpu.memory_space<vmem>>, %arg11: memref<1x1x32xf32, #tpu.memory_space<vmem>>, %arg12: memref<1x32x128xf32, #tpu.memory_space<vmem>>, %arg13: memref<1x1x128xf32, #tpu.memory_space<vmem>>, %arg14: memref<1x128x32xf32, #tpu.memory_space<vmem>>, %arg15: memref<1x1x32xf32, #tpu.memory_space<vmem>>, %arg16: memref<1x32xf32, #tpu.memory_space<vmem>>, %arg17: memref<1x32xf32, #tpu.memory_space<vmem>>, %arg18: memref<1x32xf32, #tpu.memory_space<vmem>>, %arg19: memref<1x32xf32, #tpu.memory_space<vmem>>, %arg20: memref<1x8x32xf32, #tpu.memory_space<vmem>>) attributes {dimension_semantics = [#tpu.dimension_semantics<parallel>, #tpu.dimension_semantics<arbitrary>], iteration_bounds = array<i64: 2, 2>, scalar_prefetch = 0 : i64, scratch_operands = 0 : i64, tpu.core_type = #tpu.core_type<tc>, window_params = [{transform_indices = @transform_0, window_bounds = array<i64: 1, 8, 32>}, {transform_indices = @transform_1, window_bounds = array<i64: 1, 8, 8>}, {transform_indices = @transform_2, window_bounds = array<i64: 1, 1, 32>}, {transform_indices = @transform_3, window_bounds = array<i64: 1, 1, 32>}, {transform_indices = @transform_4, window_bounds = array<i64: 1, 32, 96>}, {transform_indices = @transform_5, window_bounds = array<i64: 1, 1, 96>}, {transform_indices = @transform_6, window_bounds = array<i64: 1, 32, 32>}, {transform_indices = @transform_7, window_bounds = array<i64: 1, 1, 32>}, {transform_indices = @transform_8, window_bounds = array<i64: 1, 1, 32>}, {transform_indices = @transform_9, window_bounds = array<i64: 1, 1, 32>}, {transform_indices = @transform_10, window_bounds = array<i64: 1, 32, 128>}, {transform_indices = @transform_11, window_bounds = array<i64: 1, 1, 128>}, {transform_indices = @transform_12, window_bounds = array<i64: 1, 128, 32>}, {transform_indices = @transform_13, window_bounds = array<i64: 1, 1, 32>}, {pipeline_mode = #tpu.pipeline_mode<synchronous>, transform_indices = @transform_14, window_bounds = array<i64: 1, 32>}, {pipeline_mode = #tpu.pipeline_mode<synchronous>, transform_indices = @transform_15, window_bounds = array<i64: 1, 32>}, {pipeline_mode = #tpu.pipeline_mode<synchronous>, transform_indices = @transform_16, window_bounds = array<i64: 1, 32>}, {pipeline_mode = #tpu.pipeline_mode<synchronous>, transform_indices = @transform_17, window_bounds = array<i64: 1, 32>}, {transform_indices = @transform_18, window_bounds = array<i64: 1, 8, 32>}]} {
    %c0_i32 = arith.constant 0 : i32
    %0 = arith.cmpi eq, %arg1, %c0_i32 : i32
    %1 = arith.extui %0 : i1 to i32
    %c0_i32_0 = arith.constant 0 : i32
    %2 = arith.cmpi ne, %1, %c0_i32_0 : i32
    scf.if %2 {
      %c0_81 = arith.constant 0 : index
      %c0_82 = arith.constant 0 : index
      %c0_83 = arith.constant 0 : index
      %179 = vector.load %arg2[%c0_81, %c0_82, %c0_83] : memref<1x8x32xf32, #tpu.memory_space<vmem>>, vector<1x8x32xf32>
      %180 = vector.shape_cast %179 : vector<1x8x32xf32> to vector<8x32xf32>
      %c0_84 = arith.constant 0 : index
      %c0_85 = arith.constant 0 : index
      %c0_86 = arith.constant 0 : index
      %181 = vector.load %arg20[%c0_84, %c0_85, %c0_86] : memref<1x8x32xf32, #tpu.memory_space<vmem>>, vector<1x8x32xf32>
      %182 = vector.shape_cast %181 : vector<1x8x32xf32> to vector<8x32xf32>
      %183 = vector.shape_cast %180 : vector<8x32xf32> to vector<1x8x32xf32>
      tpu.vector_store %arg20[%c0_84, %c0_85, %c0_86], %183 {strides = array<i32>} : memref<1x8x32xf32, #tpu.memory_space<vmem>>, vector<1x8x32xf32>,
    } else {
    }
    %c0 = arith.constant 0 : index
    %c0_1 = arith.constant 0 : index
    %c0_2 = arith.constant 0 : index
    %3 = vector.load %arg20[%c0, %c0_1, %c0_2] : memref<1x8x32xf32, #tpu.memory_space<vmem>>, vector<1x8x32xf32>
    %4 = vector.shape_cast %3 : vector<1x8x32xf32> to vector<8x32xf32>
    %c0_3 = arith.constant 0 : index
    %c0_4 = arith.constant 0 : index
    %c0_5 = arith.constant 0 : index
    %5 = vector.load %arg4[%c0_3, %c0_4, %c0_5] : memref<1x1x32xf32, #tpu.memory_space<vmem>>, vector<1x1x32xf32>
    %6 = vector.shape_cast %5 : vector<1x1x32xf32> to vector<1x32xf32>
    %c0_6 = arith.constant 0 : index
    %c0_7 = arith.constant 0 : index
    %c0_8 = arith.constant 0 : index
    %7 = vector.load %arg5[%c0_6, %c0_7, %c0_8] : memref<1x1x32xf32, #tpu.memory_space<vmem>>, vector<1x1x32xf32>
    %8 = vector.shape_cast %7 : vector<1x1x32xf32> to vector<1x32xf32>
    %cst = arith.constant dense<0.000000e+00> : vector<8xf32>
    %9 = vector.multi_reduction <add>, %4, %cst [1] : vector<8x32xf32> to vector<8xf32>
    %10 = vector.shape_cast %9 : vector<8xf32> to vector<8x1xf32>
    %cst_9 = arith.constant 3.200000e+01 : f32
    %11 = vector.broadcast %cst_9 : f32 to vector<8x1xf32>
    %12 = arith.divf %10, %11 : vector<8x1xf32>
    %13 = vector.broadcast %12 : vector<8x1xf32> to vector<8x32xf32>
    %14 = arith.subf %4, %13 : vector<8x32xf32>
    %15 = arith.mulf %14, %14 : vector<8x32xf32>
    %cst_10 = arith.constant dense<0.000000e+00> : vector<8xf32>
    %16 = vector.multi_reduction <add>, %15, %cst_10 [1] : vector<8x32xf32> to vector<8xf32>
    %17 = vector.shape_cast %16 : vector<8xf32> to vector<8x1xf32>
    %cst_11 = arith.constant 3.200000e+01 : f32
    %18 = vector.broadcast %cst_11 : f32 to vector<8x1xf32>
    %19 = arith.divf %17, %18 : vector<8x1xf32>
    %20 = vector.broadcast %12 : vector<8x1xf32> to vector<8x32xf32>
    %21 = arith.subf %4, %20 : vector<8x32xf32>
    %cst_12 = arith.constant 9.99999974E-6 : f32
    %22 = vector.broadcast %cst_12 : f32 to vector<8x1xf32>
    %23 = arith.addf %19, %22 : vector<8x1xf32>
    %24 = math.rsqrt %23 : vector<8x1xf32>
    %25 = vector.broadcast %24 : vector<8x1xf32> to vector<8x32xf32>
    %26 = arith.mulf %21, %25 : vector<8x32xf32>
    %27 = vector.broadcast %6 : vector<1x32xf32> to vector<8x32xf32>
    %28 = arith.mulf %26, %27 : vector<8x32xf32>
    %29 = vector.broadcast %8 : vector<1x32xf32> to vector<8x32xf32>
    %30 = arith.addf %28, %29 : vector<8x32xf32>
    %c0_13 = arith.constant 0 : index
    %c0_14 = arith.constant 0 : index
    %c0_15 = arith.constant 0 : index
    %31 = vector.load %arg6[%c0_13, %c0_14, %c0_15] : memref<1x32x96xf32, #tpu.memory_space<vmem>>, vector<1x32x96xf32>
    %32 = vector.shape_cast %31 : vector<1x32x96xf32> to vector<32x96xf32>
    %cst_16 = arith.constant dense<0.000000e+00> : vector<8x96xf32>
    %33 = tpu.matmul %30, %32, %cst_16 {dimension_numbers = #tpu.dot_dimension_numbers<[1], [0], [0], [1], [0, 0, 1, 1], [], []>} : vector<8x32xf32>, vector<32x96xf32>, vector<8x96xf32> -> vector<8x96xf32>
    %c0_17 = arith.constant 0 : index
    %c0_18 = arith.constant 0 : index
    %c0_19 = arith.constant 0 : index
    %34 = vector.load %arg7[%c0_17, %c0_18, %c0_19] : memref<1x1x96xf32, #tpu.memory_space<vmem>>, vector<1x1x96xf32>
    %35 = vector.shape_cast %34 : vector<1x1x96xf32> to vector<1x96xf32>
    %36 = vector.broadcast %35 : vector<1x96xf32> to vector<8x96xf32>
    %37 = arith.addf %33, %36 : vector<8x96xf32>
    %38 = vector.extract_strided_slice %37 {offsets = [0, 0], sizes = [8, 32], strides = [1, 1]} : vector<8x96xf32> to vector<8x32xf32>
    %39 = vector.extract_strided_slice %37 {offsets = [0, 32], sizes = [8, 32], strides = [1, 1]} : vector<8x96xf32> to vector<8x32xf32>
    %40 = vector.extract_strided_slice %37 {offsets = [0, 64], sizes = [8, 32], strides = [1, 1]} : vector<8x96xf32> to vector<8x32xf32>
    %c0_20 = arith.constant 0 : index
    %c0_21 = arith.constant 0 : index
    %c0_22 = arith.constant 0 : index
    %41 = vector.load %arg3[%c0_20, %c0_21, %c0_22] : memref<1x8x8xf32, #tpu.memory_space<vmem>>, vector<1x8x8xf32>
    %42 = vector.shape_cast %41 : vector<1x8x8xf32> to vector<8x8xf32>
    %43 = vector.extract_strided_slice %38 {offsets = [0, 0], sizes = [8, 8], strides = [1, 1]} : vector<8x32xf32> to vector<8x8xf32>
    %44 = vector.extract_strided_slice %39 {offsets = [0, 0], sizes = [8, 8], strides = [1, 1]} : vector<8x32xf32> to vector<8x8xf32>
    %45 = vector.extract_strided_slice %40 {offsets = [0, 0], sizes = [8, 8], strides = [1, 1]} : vector<8x32xf32> to vector<8x8xf32>
    %cst_23 = arith.constant dense<0.000000e+00> : vector<8x8xf32>
    %46 = tpu.matmul %43, %44, %cst_23 {dimension_numbers = #tpu.dot_dimension_numbers<[1], [1], [0], [0], [0, 0, 1, 0], [], []>} : vector<8x8xf32>, vector<8x8xf32>, vector<8x8xf32> -> vector<8x8xf32>
    %cst_24 = arith.constant 0.353553385 : f32
    %47 = vector.broadcast %cst_24 : f32 to vector<8x8xf32>
    %48 = arith.mulf %46, %47 : vector<8x8xf32>
    %49 = arith.addf %48, %42 : vector<8x8xf32>
    %cst_25 = arith.constant dense<0xFF800000> : vector<8xf32>
    %50 = vector.multi_reduction <maximumf>, %49, %cst_25 [1] : vector<8x8xf32> to vector<8xf32>
    %51 = vector.shape_cast %50 : vector<8xf32> to vector<8x1xf32>
    %52 = vector.broadcast %51 : vector<8x1xf32> to vector<8x8xf32>
    %53 = arith.subf %49, %52 : vector<8x8xf32>
    %54 = math.exp %53 : vector<8x8xf32>
    %cst_26 = arith.constant dense<0.000000e+00> : vector<8xf32>
    %55 = vector.multi_reduction <add>, %54, %cst_26 [1] : vector<8x8xf32> to vector<8xf32>
    %56 = vector.shape_cast %55 : vector<8xf32> to vector<8x1xf32>
    %57 = tpu.reciprocal %56 {approx = true} : vector<8x1xf32> -> vector<8x1xf32>
    %58 = vector.broadcast %57 : vector<8x1xf32> to vector<8x8xf32>
    %59 = arith.mulf %54, %58 : vector<8x8xf32>
    %cst_27 = arith.constant dense<0.000000e+00> : vector<8x8xf32>
    %60 = tpu.matmul %59, %45, %cst_27 {dimension_numbers = #tpu.dot_dimension_numbers<[1], [0], [0], [1], [0, 0, 1, 1], [], []>} : vector<8x8xf32>, vector<8x8xf32>, vector<8x8xf32> -> vector<8x8xf32>
    %61 = vector.extract_strided_slice %38 {offsets = [0, 8], sizes = [8, 8], strides = [1, 1]} : vector<8x32xf32> to vector<8x8xf32>
    %62 = vector.extract_strided_slice %39 {offsets = [0, 8], sizes = [8, 8], strides = [1, 1]} : vector<8x32xf32> to vector<8x8xf32>
    %63 = vector.extract_strided_slice %40 {offsets = [0, 8], sizes = [8, 8], strides = [1, 1]} : vector<8x32xf32> to vector<8x8xf32>
    %cst_28 = arith.constant dense<0.000000e+00> : vector<8x8xf32>
    %64 = tpu.matmul %61, %62, %cst_28 {dimension_numbers = #tpu.dot_dimension_numbers<[1], [1], [0], [0], [0, 0, 1, 0], [], []>} : vector<8x8xf32>, vector<8x8xf32>, vector<8x8xf32> -> vector<8x8xf32>
    %cst_29 = arith.constant 0.353553385 : f32
    %65 = vector.broadcast %cst_29 : f32 to vector<8x8xf32>
    %66 = arith.mulf %64, %65 : vector<8x8xf32>
    %67 = arith.addf %66, %42 : vector<8x8xf32>
    %cst_30 = arith.constant dense<0xFF800000> : vector<8xf32>
    %68 = vector.multi_reduction <maximumf>, %67, %cst_30 [1] : vector<8x8xf32> to vector<8xf32>
    %69 = vector.shape_cast %68 : vector<8xf32> to vector<8x1xf32>
    %70 = vector.broadcast %69 : vector<8x1xf32> to vector<8x8xf32>
    %71 = arith.subf %67, %70 : vector<8x8xf32>
    %72 = math.exp %71 : vector<8x8xf32>
    %cst_31 = arith.constant dense<0.000000e+00> : vector<8xf32>
    %73 = vector.multi_reduction <add>, %72, %cst_31 [1] : vector<8x8xf32> to vector<8xf32>
    %74 = vector.shape_cast %73 : vector<8xf32> to vector<8x1xf32>
    %75 = tpu.reciprocal %74 {approx = true} : vector<8x1xf32> -> vector<8x1xf32>
    %76 = vector.broadcast %75 : vector<8x1xf32> to vector<8x8xf32>
    %77 = arith.mulf %72, %76 : vector<8x8xf32>
    %cst_32 = arith.constant dense<0.000000e+00> : vector<8x8xf32>
    %78 = tpu.matmul %77, %63, %cst_32 {dimension_numbers = #tpu.dot_dimension_numbers<[1], [0], [0], [1], [0, 0, 1, 1], [], []>} : vector<8x8xf32>, vector<8x8xf32>, vector<8x8xf32> -> vector<8x8xf32>
    %79 = vector.extract_strided_slice %38 {offsets = [0, 16], sizes = [8, 8], strides = [1, 1]} : vector<8x32xf32> to vector<8x8xf32>
    %80 = vector.extract_strided_slice %39 {offsets = [0, 16], sizes = [8, 8], strides = [1, 1]} : vector<8x32xf32> to vector<8x8xf32>
    %81 = vector.extract_strided_slice %40 {offsets = [0, 16], sizes = [8, 8], strides = [1, 1]} : vector<8x32xf32> to vector<8x8xf32>
    %cst_33 = arith.constant dense<0.000000e+00> : vector<8x8xf32>
    %82 = tpu.matmul %79, %80, %cst_33 {dimension_numbers = #tpu.dot_dimension_numbers<[1], [1], [0], [0], [0, 0, 1, 0], [], []>} : vector<8x8xf32>, vector<8x8xf32>, vector<8x8xf32> -> vector<8x8xf32>
    %cst_34 = arith.constant 0.353553385 : f32
    %83 = vector.broadcast %cst_34 : f32 to vector<8x8xf32>
    %84 = arith.mulf %82, %83 : vector<8x8xf32>
    %85 = arith.addf %84, %42 : vector<8x8xf32>
    %cst_35 = arith.constant dense<0xFF800000> : vector<8xf32>
    %86 = vector.multi_reduction <maximumf>, %85, %cst_35 [1] : vector<8x8xf32> to vector<8xf32>
    %87 = vector.shape_cast %86 : vector<8xf32> to vector<8x1xf32>
    %88 = vector.broadcast %87 : vector<8x1xf32> to vector<8x8xf32>
    %89 = arith.subf %85, %88 : vector<8x8xf32>
    %90 = math.exp %89 : vector<8x8xf32>
    %cst_36 = arith.constant dense<0.000000e+00> : vector<8xf32>
    %91 = vector.multi_reduction <add>, %90, %cst_36 [1] : vector<8x8xf32> to vector<8xf32>
    %92 = vector.shape_cast %91 : vector<8xf32> to vector<8x1xf32>
    %93 = tpu.reciprocal %92 {approx = true} : vector<8x1xf32> -> vector<8x1xf32>
    %94 = vector.broadcast %93 : vector<8x1xf32> to vector<8x8xf32>
    %95 = arith.mulf %90, %94 : vector<8x8xf32>
    %cst_37 = arith.constant dense<0.000000e+00> : vector<8x8xf32>
    %96 = tpu.matmul %95, %81, %cst_37 {dimension_numbers = #tpu.dot_dimension_numbers<[1], [0], [0], [1], [0, 0, 1, 1], [], []>} : vector<8x8xf32>, vector<8x8xf32>, vector<8x8xf32> -> vector<8x8xf32>
    %97 = vector.extract_strided_slice %38 {offsets = [0, 24], sizes = [8, 8], strides = [1, 1]} : vector<8x32xf32> to vector<8x8xf32>
    %98 = vector.extract_strided_slice %39 {offsets = [0, 24], sizes = [8, 8], strides = [1, 1]} : vector<8x32xf32> to vector<8x8xf32>
    %99 = vector.extract_strided_slice %40 {offsets = [0, 24], sizes = [8, 8], strides = [1, 1]} : vector<8x32xf32> to vector<8x8xf32>
    %cst_38 = arith.constant dense<0.000000e+00> : vector<8x8xf32>
    %100 = tpu.matmul %97, %98, %cst_38 {dimension_numbers = #tpu.dot_dimension_numbers<[1], [1], [0], [0], [0, 0, 1, 0], [], []>} : vector<8x8xf32>, vector<8x8xf32>, vector<8x8xf32> -> vector<8x8xf32>
    %cst_39 = arith.constant 0.353553385 : f32
    %101 = vector.broadcast %cst_39 : f32 to vector<8x8xf32>
    %102 = arith.mulf %100, %101 : vector<8x8xf32>
    %103 = arith.addf %102, %42 : vector<8x8xf32>
    %cst_40 = arith.constant dense<0xFF800000> : vector<8xf32>
    %104 = vector.multi_reduction <maximumf>, %103, %cst_40 [1] : vector<8x8xf32> to vector<8xf32>
    %105 = vector.shape_cast %104 : vector<8xf32> to vector<8x1xf32>
    %106 = vector.broadcast %105 : vector<8x1xf32> to vector<8x8xf32>
    %107 = arith.subf %103, %106 : vector<8x8xf32>
    %108 = math.exp %107 : vector<8x8xf32>
    %cst_41 = arith.constant dense<0.000000e+00> : vector<8xf32>
    %109 = vector.multi_reduction <add>, %108, %cst_41 [1] : vector<8x8xf32> to vector<8xf32>
    %110 = vector.shape_cast %109 : vector<8xf32> to vector<8x1xf32>
    %111 = tpu.reciprocal %110 {approx = true} : vector<8x1xf32> -> vector<8x1xf32>
    %112 = vector.broadcast %111 : vector<8x1xf32> to vector<8x8xf32>
    %113 = arith.mulf %108, %112 : vector<8x8xf32>
    %cst_42 = arith.constant dense<0.000000e+00> : vector<8x8xf32>
    %114 = tpu.matmul %113, %99, %cst_42 {dimension_numbers = #tpu.dot_dimension_numbers<[1], [0], [0], [1], [0, 0, 1, 1], [], []>} : vector<8x8xf32>, vector<8x8xf32>, vector<8x8xf32> -> vector<8x8xf32>
    %115 = tpu.concatenate %60, %78, %96, %114 in 1 : vector<8x8xf32>, vector<8x8xf32>, vector<8x8xf32>, vector<8x8xf32> -> vector<8x32xf32>
    %c0_43 = arith.constant 0 : index
    %c0_44 = arith.constant 0 : index
    %c0_45 = arith.constant 0 : index
    %116 = vector.load %arg8[%c0_43, %c0_44, %c0_45] : memref<1x32x32xf32, #tpu.memory_space<vmem>>, vector<1x32x32xf32>
    %117 = vector.shape_cast %116 : vector<1x32x32xf32> to vector<32x32xf32>
    %cst_46 = arith.constant dense<0.000000e+00> : vector<8x32xf32>
    %118 = tpu.matmul %115, %117, %cst_46 {dimension_numbers = #tpu.dot_dimension_numbers<[1], [0], [0], [1], [0, 0, 1, 1], [], []>} : vector<8x32xf32>, vector<32x32xf32>, vector<8x32xf32> -> vector<8x32xf32>
    %c0_47 = arith.constant 0 : index
    %c0_48 = arith.constant 0 : index
    %c0_49 = arith.constant 0 : index
    %119 = vector.load %arg9[%c0_47, %c0_48, %c0_49] : memref<1x1x32xf32, #tpu.memory_space<vmem>>, vector<1x1x32xf32>
    %120 = vector.shape_cast %119 : vector<1x1x32xf32> to vector<1x32xf32>
    %121 = vector.broadcast %120 : vector<1x32xf32> to vector<8x32xf32>
    %122 = arith.addf %118, %121 : vector<8x32xf32>
    %123 = arith.addf %4, %122 : vector<8x32xf32>
    %c0_50 = arith.constant 0 : index
    %c0_51 = arith.constant 0 : index
    %c0_52 = arith.constant 0 : index
    %124 = vector.load %arg10[%c0_50, %c0_51, %c0_52] : memref<1x1x32xf32, #tpu.memory_space<vmem>>, vector<1x1x32xf32>
    %125 = vector.shape_cast %124 : vector<1x1x32xf32> to vector<1x32xf32>
    %c0_53 = arith.constant 0 : index
    %c0_54 = arith.constant 0 : index
    %c0_55 = arith.constant 0 : index
    %126 = vector.load %arg11[%c0_53, %c0_54, %c0_55] : memref<1x1x32xf32, #tpu.memory_space<vmem>>, vector<1x1x32xf32>
    %127 = vector.shape_cast %126 : vector<1x1x32xf32> to vector<1x32xf32>
    %cst_56 = arith.constant dense<0.000000e+00> : vector<8xf32>
    %128 = vector.multi_reduction <add>, %123, %cst_56 [1] : vector<8x32xf32> to vector<8xf32>
    %129 = vector.shape_cast %128 : vector<8xf32> to vector<8x1xf32>
    %cst_57 = arith.constant 3.200000e+01 : f32
    %130 = vector.broadcast %cst_57 : f32 to vector<8x1xf32>
    %131 = arith.divf %129, %130 : vector<8x1xf32>
    %132 = vector.broadcast %131 : vector<8x1xf32> to vector<8x32xf32>
    %133 = arith.subf %123, %132 : vector<8x32xf32>
    %134 = arith.mulf %133, %133 : vector<8x32xf32>
    %cst_58 = arith.constant dense<0.000000e+00> : vector<8xf32>
    %135 = vector.multi_reduction <add>, %134, %cst_58 [1] : vector<8x32xf32> to vector<8xf32>
    %136 = vector.shape_cast %135 : vector<8xf32> to vector<8x1xf32>
    %cst_59 = arith.constant 3.200000e+01 : f32
    %137 = vector.broadcast %cst_59 : f32 to vector<8x1xf32>
    %138 = arith.divf %136, %137 : vector<8x1xf32>
    %139 = vector.broadcast %131 : vector<8x1xf32> to vector<8x32xf32>
    %140 = arith.subf %123, %139 : vector<8x32xf32>
    %cst_60 = arith.constant 9.99999974E-6 : f32
    %141 = vector.broadcast %cst_60 : f32 to vector<8x1xf32>
    %142 = arith.addf %138, %141 : vector<8x1xf32>
    %143 = math.rsqrt %142 : vector<8x1xf32>
    %144 = vector.broadcast %143 : vector<8x1xf32> to vector<8x32xf32>
    %145 = arith.mulf %140, %144 : vector<8x32xf32>
    %146 = vector.broadcast %125 : vector<1x32xf32> to vector<8x32xf32>
    %147 = arith.mulf %145, %146 : vector<8x32xf32>
    %148 = vector.broadcast %127 : vector<1x32xf32> to vector<8x32xf32>
    %149 = arith.addf %147, %148 : vector<8x32xf32>
    %c0_61 = arith.constant 0 : index
    %c0_62 = arith.constant 0 : index
    %c0_63 = arith.constant 0 : index
    %150 = vector.load %arg12[%c0_61, %c0_62, %c0_63] : memref<1x32x128xf32, #tpu.memory_space<vmem>>, vector<1x32x128xf32>
    %151 = vector.shape_cast %150 : vector<1x32x128xf32> to vector<32x128xf32>
    %cst_64 = arith.constant dense<0.000000e+00> : vector<8x128xf32>
    %152 = tpu.matmul %149, %151, %cst_64 {dimension_numbers = #tpu.dot_dimension_numbers<[1], [0], [0], [1], [0, 0, 1, 1], [], []>} : vector<8x32xf32>, vector<32x128xf32>, vector<8x128xf32> -> vector<8x128xf32>
    %c0_65 = arith.constant 0 : index
    %c0_66 = arith.constant 0 : index
    %c0_67 = arith.constant 0 : index
    %153 = vector.load %arg13[%c0_65, %c0_66, %c0_67] : memref<1x1x128xf32, #tpu.memory_space<vmem>>, vector<1x1x128xf32>
    %154 = vector.shape_cast %153 : vector<1x1x128xf32> to vector<1x128xf32>
    %155 = vector.broadcast %154 : vector<1x128xf32> to vector<8x128xf32>
    %156 = arith.addf %152, %155 : vector<8x128xf32>
    %cst_68 = arith.constant 1.702000e+00 : f32
    %157 = vector.broadcast %cst_68 : f32 to vector<8x128xf32>
    %158 = arith.mulf %157, %156 : vector<8x128xf32>
    %159 = arith.negf %158 : vector<8x128xf32>
    %160 = math.exp %159 : vector<8x128xf32>
    %cst_69 = arith.constant 1.000000e+00 : f32
    %161 = vector.broadcast %cst_69 : f32 to vector<8x128xf32>
    %162 = arith.addf %161, %160 : vector<8x128xf32>
    %163 = arith.divf %161, %162 : vector<8x128xf32>
    %164 = arith.mulf %156, %163 : vector<8x128xf32>
    %c0_70 = arith.constant 0 : index
    %c0_71 = arith.constant 0 : index
    %c0_72 = arith.constant 0 : index
    %165 = vector.load %arg14[%c0_70, %c0_71, %c0_72] : memref<1x128x32xf32, #tpu.memory_space<vmem>>, vector<1x128x32xf32>
    %166 = vector.shape_cast %165 : vector<1x128x32xf32> to vector<128x32xf32>
    %cst_73 = arith.constant dense<0.000000e+00> : vector<8x32xf32>
    %167 = tpu.matmul %164, %166, %cst_73 {dimension_numbers = #tpu.dot_dimension_numbers<[1], [0], [0], [1], [0, 0, 1, 1], [], []>} : vector<8x128xf32>, vector<128x32xf32>, vector<8x32xf32> -> vector<8x32xf32>
    %168 = arith.addf %123, %167 : vector<8x32xf32>
    %c0_74 = arith.constant 0 : index
    %c0_75 = arith.constant 0 : index
    %c0_76 = arith.constant 0 : index
    %169 = vector.load %arg15[%c0_74, %c0_75, %c0_76] : memref<1x1x32xf32, #tpu.memory_space<vmem>>, vector<1x1x32xf32>
    %170 = vector.shape_cast %169 : vector<1x1x32xf32> to vector<1x32xf32>
    %171 = vector.broadcast %170 : vector<1x32xf32> to vector<8x32xf32>
    %172 = arith.addf %168, %171 : vector<8x32xf32>
    %c0_77 = arith.constant 0 : index
    %c0_78 = arith.constant 0 : index
    %c0_79 = arith.constant 0 : index
    %173 = vector.load %arg20[%c0_77, %c0_78, %c0_79] : memref<1x8x32xf32, #tpu.memory_space<vmem>>, vector<1x8x32xf32>
    %174 = vector.shape_cast %173 : vector<1x8x32xf32> to vector<8x32xf32>
    %175 = vector.shape_cast %172 : vector<8x32xf32> to vector<1x8x32xf32>
    tpu.vector_store %arg20[%c0_77, %c0_78, %c0_79], %175 {strides = array<i32>} : memref<1x8x32xf32, #tpu.memory_space<vmem>>, vector<1x8x32xf32>,
    %c1_i32 = arith.constant 1 : i32
    %176 = arith.cmpi eq, %arg1, %c1_i32 : i32
    %177 = arith.extui %176 : i1 to i32
    %c0_i32_80 = arith.constant 0 : i32
    %178 = arith.cmpi ne, %177, %c0_i32_80 : i32
    scf.if %178 {
      %c0_81 = arith.constant 0 : index
      %c0_82 = arith.constant 0 : index
      %c0_83 = arith.constant 0 : index
      %179 = vector.load %arg20[%c0_81, %c0_82, %c0_83] : memref<1x8x32xf32, #tpu.memory_space<vmem>>, vector<1x8x32xf32>
      %180 = vector.shape_cast %179 : vector<1x8x32xf32> to vector<8x32xf32>
      %c0_84 = arith.constant 0 : index
      %c0_85 = arith.constant 0 : index
      %181 = vector.load %arg18[%c0_84, %c0_85] : memref<1x32xf32, #tpu.memory_space<vmem>>, vector<1x32xf32>
      %c0_86 = arith.constant 0 : index
      %c0_87 = arith.constant 0 : index
      %182 = vector.load %arg19[%c0_86, %c0_87] : memref<1x32xf32, #tpu.memory_space<vmem>>, vector<1x32xf32>
      %cst_88 = arith.constant dense<0.000000e+00> : vector<8xf32>
      %183 = vector.multi_reduction <add>, %180, %cst_88 [1] : vector<8x32xf32> to vector<8xf32>
      %184 = vector.shape_cast %183 : vector<8xf32> to vector<8x1xf32>
      %cst_89 = arith.constant 3.200000e+01 : f32
      %185 = vector.broadcast %cst_89 : f32 to vector<8x1xf32>
      %186 = arith.divf %184, %185 : vector<8x1xf32>
      %187 = vector.broadcast %186 : vector<8x1xf32> to vector<8x32xf32>
      %188 = arith.subf %180, %187 : vector<8x32xf32>
      %189 = arith.mulf %188, %188 : vector<8x32xf32>
      %cst_90 = arith.constant dense<0.000000e+00> : vector<8xf32>
      %190 = vector.multi_reduction <add>, %189, %cst_90 [1] : vector<8x32xf32> to vector<8xf32>
      %191 = vector.shape_cast %190 : vector<8xf32> to vector<8x1xf32>
      %cst_91 = arith.constant 3.200000e+01 : f32
      %192 = vector.broadcast %cst_91 : f32 to vector<8x1xf32>
      %193 = arith.divf %191, %192 : vector<8x1xf32>
      %194 = vector.broadcast %186 : vector<8x1xf32> to vector<8x32xf32>
      %195 = arith.subf %180, %194 : vector<8x32xf32>
      %cst_92 = arith.constant 9.99999974E-6 : f32
      %196 = vector.broadcast %cst_92 : f32 to vector<8x1xf32>
      %197 = arith.addf %193, %196 : vector<8x1xf32>
      %198 = math.rsqrt %197 : vector<8x1xf32>
      %199 = vector.broadcast %198 : vector<8x1xf32> to vector<8x32xf32>
      %200 = arith.mulf %195, %199 : vector<8x32xf32>
      %201 = vector.broadcast %181 : vector<1x32xf32> to vector<8x32xf32>
      %202 = arith.mulf %200, %201 : vector<8x32xf32>
      %203 = vector.broadcast %182 : vector<1x32xf32> to vector<8x32xf32>
      %204 = arith.addf %202, %203 : vector<8x32xf32>
      %c0_93 = arith.constant 0 : index
      %c0_94 = arith.constant 0 : index
      %c0_95 = arith.constant 0 : index
      %205 = vector.load %arg20[%c0_93, %c0_94, %c0_95] : memref<1x8x32xf32, #tpu.memory_space<vmem>>, vector<1x8x32xf32>
      %206 = vector.shape_cast %205 : vector<1x8x32xf32> to vector<8x32xf32>
      %207 = vector.shape_cast %204 : vector<8x32xf32> to vector<1x8x32xf32>
      tpu.vector_store %arg20[%c0_93, %c0_94, %c0_95], %207 {strides = array<i32>} : memref<1x8x32xf32, #tpu.memory_space<vmem>>, vector<1x8x32xf32>,
    } else {
    }
    return
  }
  func.func @transform_0(%arg0: i32, %arg1: i32) -> (i32, i32, i32) {
    %c0_i32 = arith.constant 0 : i32
    %c0_i32_0 = arith.constant 0 : i32
    %c0_i32_1 = arith.constant 0 : i32
    return %arg0, %c0_i32, %c0_i32_0 : i32, i32, i32
  }
  func.func @transform_1(%arg0: i32, %arg1: i32) -> (i32, i32, i32) {
    %c0_i32 = arith.constant 0 : i32
    %c0_i32_0 = arith.constant 0 : i32
    %c0_i32_1 = arith.constant 0 : i32
    return %arg0, %c0_i32, %c0_i32_0 : i32, i32, i32
  }
  func.func @transform_2(%arg0: i32, %arg1: i32) -> (i32, i32, i32) {
    %c0_i32 = arith.constant 0 : i32
    %c0_i32_0 = arith.constant 0 : i32
    %c0_i32_1 = arith.constant 0 : i32
    return %arg1, %c0_i32, %c0_i32_0 : i32, i32, i32
  }
  func.func @transform_3(%arg0: i32, %arg1: i32) -> (i32, i32, i32) {
    %c0_i32 = arith.constant 0 : i32
    %c0_i32_0 = arith.constant 0 : i32
    %c0_i32_1 = arith.constant 0 : i32
    return %arg1, %c0_i32, %c0_i32_0 : i32, i32, i32
  }
  func.func @transform_4(%arg0: i32, %arg1: i32) -> (i32, i32, i32) {
    %c0_i32 = arith.constant 0 : i32
    %c0_i32_0 = arith.constant 0 : i32
    %c0_i32_1 = arith.constant 0 : i32
    return %arg1, %c0_i32, %c0_i32_0 : i32, i32, i32
  }
  func.func @transform_5(%arg0: i32, %arg1: i32) -> (i32, i32, i32) {
    %c0_i32 = arith.constant 0 : i32
    %c0_i32_0 = arith.constant 0 : i32
    %c0_i32_1 = arith.constant 0 : i32
    return %arg1, %c0_i32, %c0_i32_0 : i32, i32, i32
  }
  func.func @transform_6(%arg0: i32, %arg1: i32) -> (i32, i32, i32) {
    %c0_i32 = arith.constant 0 : i32
    %c0_i32_0 = arith.constant 0 : i32
    %c0_i32_1 = arith.constant 0 : i32
    return %arg1, %c0_i32, %c0_i32_0 : i32, i32, i32
  }
  func.func @transform_7(%arg0: i32, %arg1: i32) -> (i32, i32, i32) {
    %c0_i32 = arith.constant 0 : i32
    %c0_i32_0 = arith.constant 0 : i32
    %c0_i32_1 = arith.constant 0 : i32
    return %arg1, %c0_i32, %c0_i32_0 : i32, i32, i32
  }
  func.func @transform_8(%arg0: i32, %arg1: i32) -> (i32, i32, i32) {
    %c0_i32 = arith.constant 0 : i32
    %c0_i32_0 = arith.constant 0 : i32
    %c0_i32_1 = arith.constant 0 : i32
    return %arg1, %c0_i32, %c0_i32_0 : i32, i32, i32
  }
  func.func @transform_9(%arg0: i32, %arg1: i32) -> (i32, i32, i32) {
    %c0_i32 = arith.constant 0 : i32
    %c0_i32_0 = arith.constant 0 : i32
    %c0_i32_1 = arith.constant 0 : i32
    return %arg1, %c0_i32, %c0_i32_0 : i32, i32, i32
  }
  func.func @transform_10(%arg0: i32, %arg1: i32) -> (i32, i32, i32) {
    %c0_i32 = arith.constant 0 : i32
    %c0_i32_0 = arith.constant 0 : i32
    %c0_i32_1 = arith.constant 0 : i32
    return %arg1, %c0_i32, %c0_i32_0 : i32, i32, i32
  }
  func.func @transform_11(%arg0: i32, %arg1: i32) -> (i32, i32, i32) {
    %c0_i32 = arith.constant 0 : i32
    %c0_i32_0 = arith.constant 0 : i32
    %c0_i32_1 = arith.constant 0 : i32
    return %arg1, %c0_i32, %c0_i32_0 : i32, i32, i32
  }
  func.func @transform_12(%arg0: i32, %arg1: i32) -> (i32, i32, i32) {
    %c0_i32 = arith.constant 0 : i32
    %c0_i32_0 = arith.constant 0 : i32
    %c0_i32_1 = arith.constant 0 : i32
    return %arg1, %c0_i32, %c0_i32_0 : i32, i32, i32
  }
  func.func @transform_13(%arg0: i32, %arg1: i32) -> (i32, i32, i32) {
    %c0_i32 = arith.constant 0 : i32
    %c0_i32_0 = arith.constant 0 : i32
    %c0_i32_1 = arith.constant 0 : i32
    return %arg1, %c0_i32, %c0_i32_0 : i32, i32, i32
  }
  func.func @transform_14(%arg0: i32, %arg1: i32) -> (i32, i32) {
    %c0_i32 = arith.constant 0 : i32
    %c0_i32_0 = arith.constant 0 : i32
    %c0_i32_1 = arith.constant 0 : i32
    return %c0_i32, %c0_i32_0 : i32, i32
  }
  func.func @transform_15(%arg0: i32, %arg1: i32) -> (i32, i32) {
    %c0_i32 = arith.constant 0 : i32
    %c0_i32_0 = arith.constant 0 : i32
    %c0_i32_1 = arith.constant 0 : i32
    return %c0_i32, %c0_i32_0 : i32, i32
  }
  func.func @transform_16(%arg0: i32, %arg1: i32) -> (i32, i32) {
    %c0_i32 = arith.constant 0 : i32
    %c0_i32_0 = arith.constant 0 : i32
    %c0_i32_1 = arith.constant 0 : i32
    return %c0_i32, %c0_i32_0 : i32, i32
  }
  func.func @transform_17(%arg0: i32, %arg1: i32) -> (i32, i32) {
    %c0_i32 = arith.constant 0 : i32
    %c0_i32_0 = arith.constant 0 : i32
    %c0_i32_1 = arith.constant 0 : i32
    return %c0_i32, %c0_i32_0 : i32, i32
  }
  func.func @transform_18(%arg0: i32, %arg1: i32) -> (i32, i32, i32) {
    %c0_i32 = arith.constant 0 : i32
    %c0_i32_0 = arith.constant 0 : i32
    %c0_i32_1 = arith.constant 0 : i32
    return %arg0, %c0_i32, %c0_i32_0 : i32, i32, i32
  }
}

</mosaic_0001>

<bundles_post_ra>
// kernel: clip_encoder_forward.7
= control target key start
LH: loop header
LB: loop body
LE: loop exit
PB: predicated region body
PF: predicated region fallthrough
CT: control target
= control target key end

     0   :  { %vm39_vm0 = vcmask 523264   ;;  %vm92_vm1 = vcmask 261120   ;;  %s224_s1 = inlined_call_operand.vmem [shape: f32[192,32], index: 1, kind: input, shape index: {}]   ;;  %s225_s0 = inlined_call_operand.vmem [shape: f32[16,192], index: 0, kind: input, shape index: {}]   ;;  %s226_s2 = inlined_call_operand.vmem [shape: f32[16,32], index: 2, kind: output, shape index: {}]  }
   0x1   :  { %v30_v0 = vld [vmem:[%s224_s1 + $0x78] sm:$0xff]  ;;  %v29_v1 = vld [vmem:[%s224_s1 + $0x70] sm:$0xff]  ;;  %v28_v2 = vld [vmem:[%s224_s1 + $0x68] sm:$0xff] }
   0x2   :  { %46 = vmatpush.msra.mxu0 %v30_v0  ;;  %101 = vmatpush.msra.mxu2 %v30_v0  ;;  %v38_v3 = vld [vmem:[%s224_s1 + $0xb8] sm:$0xff]  ;;  %v37_v4 = vld [vmem:[%s224_s1 + $0xb0] sm:$0xff]  ;;  %v27_v5 = vld [vmem:[%s224_s1 + $0x60] sm:$0xff] }
   0x3   :  { %77 = vmatpush.msra.mxu1 %v38_v3  ;;  %v36_v6 = vld [vmem:[%s224_s1 + $0xa8] sm:$0xff]  ;;  %v26_v7 = vld [vmem:[%s224_s1 + $0x58] sm:$0xff]  ;;  %v35_v8 = vld [vmem:[%s224_s1 + $0xa0] sm:$0xff] }
   0x4   :  { %47 = vmatpush.msra.mxu0 %v29_v1  ;;  %102 = vmatpush.msra.mxu2 %v29_v1  ;;  %v25_v9 = vld [vmem:[%s224_s1 + $0x50] sm:$0xff]  ;;  %v34_v10 = vld [vmem:[%s224_s1 + $0x98] sm:$0xff]  ;;  %v24_v11 = vld [vmem:[%s224_s1 + $0x48] sm:$0xff] }
   0x5   :  { %78 = vmatpush.msra.mxu1 %v37_v4  ;;  %v33_v12 = vld [vmem:[%s224_s1 + $0x90] sm:$0xff]  ;;  %v23_v13 = vld [vmem:[%s224_s1 + $0x40] sm:$0xff]  ;;  %v32_v14 = vld [vmem:[%s224_s1 + $0x88] sm:$0xff] }
   0x6   :  { %48 = vmatpush.msra.mxu0 %v28_v2  ;;  %103 = vmatpush.msra.mxu2 %v28_v2  ;;  %v22_v15 = vld [vmem:[%s224_s1 + $0x38] sm:$0xff]  ;;  %v31_v16 = vld [vmem:[%s224_s1 + $0x80] sm:$0xff]  ;;  %v21_v17 = vld [vmem:[%s224_s1 + $0x30] sm:$0xff] }
   0x7   :  { %79 = vmatpush.msra.mxu1 %v36_v6  ;;  %v12_v18 = vld [vmem:[%s225_s0 + $0x8] sm:$0xff]  ;;  %v19_v20 = vld [vmem:[%s224_s1 + $0x20] sm:$0xff]  ;;  %v18_v21 = vld [vmem:[%s224_s1 + $0x18] sm:$0xff] }
   0x8   :  { %49 = vmatpush.msra.mxu0 %v27_v5  ;;  %104 = vmatpush.msra.mxu2 %v27_v5  ;;  %v20_v19 = vld [vmem:[%s224_s1 + $0x28] sm:$0xff]  ;;  %v17_v22 = vld [vmem:[%s224_s1 + $0x10] sm:$0xff]  ;;  %v14_v23 = vld [vmem:[%s225_s0 + $0x18] sm:$0xff] }
   0x9   :  { %80 = vmatpush.msra.mxu1 %v35_v8  ;;  %v16_v24 = vld [vmem:[%s224_s1 + $0x8] sm:$0xff]  ;;  %v15_v25 = vld [vmem:[%s224_s1] sm:$0xff]  ;;  %v13_v27 = vld [vmem:[%s225_s0 + $0x10] sm:$0xff] }
   0xa   :  { %50 = vmatpush.msra.mxu0 %v26_v7  ;;  %105 = vmatpush.msra.mxu2 %v26_v7  ;;  %v11_v26 = vld [vmem:[%s225_s0] sm:$0xff] }
   0xb   :  { %81 = vmatpush.msra.mxu1 %v34_v10 }
   0xc   :  { %51 = vmatpush.msra.mxu0 %v25_v9  ;;  %106 = vmatpush.msra.mxu2 %v25_v9 }
   0xd   :  { %82 = vmatpush.msra.mxu1 %v33_v12 }
   0xe   :  { %52 = vmatpush.msra.mxu0 %v24_v11  ;;  %107 = vmatpush.msra.mxu2 %v24_v11 }
   0xf   :  { %83 = vmatpush.msra.mxu1 %v32_v14 }
  0x10   :  { %53 = vmatpush.msra.mxu0 %v23_v13  ;;  %108 = vmatpush.msra.mxu2 %v23_v13 }
  0x11   :  { %84 = vmatpush.msra.mxu1 %v31_v16 }
  0x12   :  { %54 = vmatpush.msra.mxu0 %v22_v15  ;;  %109 = vmatpush.msra.mxu2 %v22_v15 }
  0x13   :  { %99 = vmatmul.msk.f32.vlgmr.msra.gmra.mxu1 %vm39_vm0, %v12_v18 }
  0x14   :  { %55 = vmatpush.msra.mxu0 %v21_v17  ;;  %110 = vmatpush.msra.mxu2 %v21_v17 }
  0x16   :  { %56 = vmatpush.msra.mxu0 %v20_v19  ;;  %111 = vmatpush.msra.mxu2 %v20_v19 }
  0x18   :  { %57 = vmatpush.msra.mxu0 %v19_v20  ;;  %112 = vmatpush.msra.mxu2 %v19_v20 }
  0x1a   :  { %58 = vmatpush.msra.mxu0 %v18_v21  ;;  %113 = vmatpush.msra.mxu2 %v18_v21 }
  0x1b   :  { %100 = vmatmul.msk.f32.gmra.mxu1 %vm39_vm0, %v14_v23 }
  0x1c   :  { %59 = vmatpush.msra.mxu0 %v17_v22  ;;  %114 = vmatpush.msra.mxu2 %v17_v22 }
  0x1e   :  { %60 = vmatpush.msra.mxu0 %v16_v24  ;;  %115 = vmatpush.msra.mxu2 %v16_v24 }
  0x20   :  { %61 = vmatpush.msra.mxu0 %v15_v25  ;;  %116 = vmatpush.msra.mxu2 %v15_v25 }
  0x21   :  { %62 = vmatmul.f32.vlgmr.msra.gmra.mxu0 %v11_v26  ;;  %65 = vmatmul.f32.vlgmr.msra.gmra.mxu2 %v13_v27 }
  0x90   :  { %v86_v28 = vpop.f32.mrf.mxu1 }
  0x98   :  { %v89_v31 = vpop.f32.mrf.mxu1 }
  0x9e   :  { %v63_v29 = vpop.f32.mrf.mxu0 }
  0x9f   :  { %v87_v30 = vadd.f32 %v86_v28, %v63_v29 }
  0xa1   :  { %93 = vst.msk [vmem:[%s226_s2] sm:$0xff] %vm92_vm1, %v87_v30 }
  0xa4   :  { %v66_v32 = vpop.f32.mrf.mxu2 }
  0xa5   :  { %v90_v33 = vadd.f32 %v89_v31, %v66_v32 }
  0xa7   :  { %94 = vst.msk [vmem:[%s226_s2 + $0x8] sm:$0xff] %vm92_vm1, %v90_v33 }

// kernel: clip_encoder_forward.9
= control target key start
LH: loop header
LB: loop body
LE: loop exit
PB: predicated region body
PF: predicated region fallthrough
CT: control target
= control target key end

     0   :  { %s121_s0 = inlined_call_operand.vmem [shape: f32[4,32], index: 0, kind: input, shape index: {}]   ;;  %s122_s1 = inlined_call_operand.vmem [shape: f32[32,16], index: 1, kind: input, shape index: {}]   ;;  %s123_s2 = inlined_call_operand.hbm [shape: f32[4,16], index: 2, kind: output, shape index: {}]  }
   0x1   :  { %v16_v0 = vld [vmem:[%s122_s1 + $0x18] sm:$0xff]  ;;  %v15_v1 = vld [vmem:[%s122_s1 + $0x10] sm:$0xff] }
   0x2   :  { %33 = vmatpush.msra.mxu0 %v16_v0 }
   0x3   :  { %7 = vsyncpa [#allocation3], 0  ;;  %v14_v2 = vld [vmem:[%s122_s1 + $0x8] sm:$0xff]  ;;  %v13_v3 = vld [vmem:[%s122_s1] sm:$0xff]  ;;  %vm17_vm0 = vcmask 261120   ;;  %s87_s19 = smov [#allocation2]  }
   0x4   :  { %34 = vmatpush.msra.mxu0 %v15_v1  ;;  %v12_v4 = vld [vmem:[%s121_s0] sm:$0xf]  ;;  %s48_s20 = sshll.u32 %s87_s19, 4  ;;  %s50_s23 = sshll.u32 %s123_s2, 4  ;;  %vm41_vm1 = vcmask 125952   ;;  %s49_s20 = int_to_ptr.vmem [resolvable:$true] %s48_s20  ;;  %s51_s23 = int_to_ptr.hbm [resolvable:$true] %s50_s23 }
   0x6   :  { %35 = vmatpush.msra.mxu0 %v14_v2 }
   0x8   :  { %36 = vmatpush.msra.mxu0 %v13_v3 }
   0x9   :  { %59 = vmatmul.msk.f32.vlgmr.msra.gmra.mxu0 %vm17_vm0, %v12_v4 }
  0x86   :  { %v38_v5 = vpop.f32.mrf.mxu0 }
  0x87   :  { %42 = vst.msk [vmem:[#allocation2] sm:$0xf] %vm41_vm1, %v38_v5 }
  0x88   :  { %53 = dma.vmem_to_hbm [thread:$0]  %s49_s20, 64, %s51_s23, [#allocation3]  }
  0x89   :  { %85 = dma.done.wait [#allocation3], 64  }
  0x8a   :  { %86 = vsyncadd [#allocation3], 4294967232 }
  0x8b   :  { %58 = vsyncpa [#allocation3], 1 }

// kernel: clip_encoder_forward.8
= control target key start
LH: loop header
LB: loop body
LE: loop exit
PB: predicated region body
PF: predicated region fallthrough
CT: control target
= control target key end

     0   :  { %s1892_s27 = smov 0   ;;  %s1894_s28 = smov 0   ;;  %s2176_s0 = inlined_call_operand.vmem [shape: f32[4,5,32], index: 0, kind: input, shape index: {}]   ;;  %s2177_s1 = inlined_call_operand.vmem [shape: f32[4,5,5], index: 1, kind: input, shape index: {}]   ;;  %s2178_s2 = inlined_call_operand.vmem [shape: f32[2,1,32], index: 2, kind: input, shape index: {}]   ;;  %s2179_s3 = inlined_call_operand.vmem [shape: f32[2,1,32], index: 3, kind: input, shape index: {}]   ;;  %s2180_s4 = inlined_call_operand.vmem [shape: f32[2,32,96], index: 4, kind: input, shape index: {}]   ;;  %s2181_s5 = inlined_call_operand.vmem [shape: f32[2,1,96], index: 5, kind: input, shape index: {}]   ;;  %s2182_s6 = inlined_call_operand.vmem [shape: f32[2,32,32], index: 6, kind: input, shape index: {}]   ;;  %s2183_s7 = inlined_call_operand.vmem [shape: f32[2,1,32], index: 7, kind: input, shape index: {}]   ;;  %s2184_s8 = inlined_call_operand.vmem [shape: f32[2,1,32], index: 8, kind: input, shape index: {}]   ;;  %s2185_s9 = inlined_call_operand.vmem [shape: f32[2,1,32], index: 9, kind: input, shape index: {}]   ;;  %s2186_s10 = inlined_call_operand.vmem [shape: f32[2,32,128], index: 10, kind: input, shape index: {}]   ;;  %s2187_s11 = inlined_call_operand.vmem [shape: f32[2,1,128], index: 11, kind: input, shape index: {}]   ;;  %s2188_s12 = inlined_call_operand.vmem [shape: f32[2,128,32], index: 12, kind: input, shape index: {}]   ;;  %s2189_s13 = inlined_call_operand.vmem [shape: f32[2,1,32], index: 13, kind: input, shape index: {}]   ;;  %s2190_s14 = inlined_call_operand.vmem [shape: f32[1,32], index: 14, kind: input, shape index: {}]   ;;  %s2191_s15 = inlined_call_operand.vmem [shape: f32[1,32], index: 15, kind: input, shape index: {}]   ;;  %s2192_s16 = inlined_call_operand.vmem [shape: f32[1,32], index: 16, kind: input, shape index: {}]   ;;  %s2193_s17 = inlined_call_operand.vmem [shape: f32[1,32], index: 17, kind: input, shape index: {}]   ;;  %s2194_s18 = inlined_call_operand.vmem [shape: f32[4,5,32], index: 18, kind: output, shape index: {}]  }
   0x1   :  { %2199 = sst [smem:[#allocation8_spill]] %s2176_s0  ;;  %s1896_s29 = smov 0  }
   0x2   :  { %2200 = sst [smem:[#allocation9_spill]] %s2177_s1  ;;  %s1898_s30 = smov 0  }
   0x3   :  { %2201 = sst [smem:[#allocation10_spill]] %s2178_s2  ;;  %s1900_s0 = smov 0  }
   0x4   :  { %2202 = sst [smem:[#allocation11_spill]] %s2180_s4 }
   0x5   :  { %2203 = sst [smem:[#allocation12_spill]] %s2182_s6 }
   0x6   :  { %2204 = sst [smem:[#allocation13_spill]] %s2189_s13 }
   0x7   :  { %2205 = sst [smem:[#allocation14_spill]] %s2190_s14 }
   0x8   :  { %2206 = sst [smem:[#allocation15_spill]] %s2191_s15 }
   0x9   :  { %2207 = sst [smem:[#allocation16_spill]] %s2192_s16 }
   0xa   :  { %2208 = sst [smem:[#allocation17_spill]] %s2193_s17 }
   0xb   :  { %2209 = sst [smem:[#allocation18_spill]] %s2194_s18 }
   0xc LB: > { %2210 = sst [smem:[#allocation2_spill]] %s1763_s27  ;;  %s37_s19 = sadd.s32 1, %s1771_s29  ;;  %s1779_s0 = sphi %s1900_s0, %s28_s0   ;;  %s1775_s30 = sphi %s1898_s30, %s2243_s30   ;;  %s1771_s29 = sphi %s1896_s29, %s2242_s29   ;;  %s1767_s28 = sphi %s1894_s28, %s2241_s28   ;;  %s1763_s27 = sphi %s1892_s27, %s2240_s27  }
   0xd   : > { %2211 = sst [smem:[#allocation3_spill]] %s1771_s29  ;;  %s40_s1 = sadd.s32 1, %s1775_s30 }
   0xe   : > { %2212 = sst [smem:[#allocation4_spill]] %s1775_s30  ;;  %p38_p0 = scmp.ge.s32.totalorder %s37_s19, 2 }
   0xf   : > { %2213 = sst [smem:[#allocation5_spill]] %s1779_s0  ;;  %p1601_p1 = scmp.ge.s32.totalorder %s1779_s0, 1 }
  0x10   : > { %p636_p2 = scmp.lt.s32.totalorder %s1779_s0, 9  ;;  %s2245_s19 = smov (%p38_p0, %s37_s19), 0 }
  0x11   : > { %2214 = sst [smem:[#allocation6_spill]] %s2245_s19  ;;  %s2247_s1 = smov (!%p38_p0, %s40_s1), %s1775_s30 }
  0x12   : > { %p637_p3 = pnand %p1601_p1, %p636_p2  ;;  %p42_p4 = scmp.ge.s32.totalorder %s2247_s1, 4 }
  0x13   : > { %p736_p5 = scmp.lt.s32.totalorder (!%p637_p3), %s1767_s28, 3  ;;  %p744_p6 = scmp.lt.s32.totalorder (!%p637_p3), %s1763_s27, 1 }
  0x14   : > { %s2249_s1 = smov (%p42_p4, %s2247_s1), 0  ;;  %640 = sbr.rel (%p637_p3) target bundleno = 2470 (0x9a6), region = 92 }
  0x15   : > { %2215 = sst [smem:[#allocation7_spill]] %s2249_s1 }
  0x16   : > { %s2216_s23 = sld [smem:[#allocation8_spill]] (!%p637_p3) }
  0x17   : > { %s2219_s4 = sld [smem:[#allocation11_spill]] (!%p637_p3) }
  0x18   : > { %s2220_s6 = sld [smem:[#allocation12_spill]] (!%p637_p3) }
  0x19   : > { %s2251_s28 = smov (!%p736_p5, %s1767_s28), 3  ;;  %s2221_s19 = sld [smem:[#allocation13_spill]] }
  0x1a   : > { %s1926_s20 = scalar_select %p744_p6, %s1763_s27, 1 }
  0x1b   : > { %s1928_s21 = sshll.u32 %s2251_s28, 3 }
  0x1c   : > { %s739_s24 = scalar_lea.vmem %s2216_s23, %s1928_s21  ;;  %s1637_s14 = sshll.u32 %s1926_s20, 5 }
  0x1d   : > { %s1954_s13 = scalar_lea.vmem %s2219_s4, %s1637_s14  ;;  %s1976_s28 = scalar_lea.vmem %s2186_s10, %s1637_s14 }
  0x1e   : > { %s1959_s26 = scalar_lea.vmem %s2220_s6, %s1637_s14  ;;  %s779_s17 = scalar_lea.vmem %s2187_s11, %s1926_s20 }
  0x1f   : > { %s1640_s4 = sshll.u32 %s1926_s20, 7  ;;  %s787_s18 = scalar_lea.vmem %s2221_s19, %s1926_s20 }
  0x20   : > { %s1986_s15 = scalar_lea.vmem %s2188_s12, %s1640_s4  ;;  %s2222_s6 = sld [smem:[#allocation18_spill]] }
  0x21   : > { %s2223_s14 = sld [smem:[#allocation2_spill]] }
  0x26   : > { %s1996_s2 = scalar_lea.vmem %s2222_s6, %s1928_s21 }
  0x27   : > { %p1613_p7 = scmp.ne.s32.totalorder %s2223_s14, 0 }
  0x28   : > { %s2224_s19 = sld [smem:[#allocation14_spill]] (!%p1613_p7) }
  0x29   : > { %795 = sbr.rel (%p1613_p7) target bundleno = 316 (0x13c), region = 96  ;;  %s2225_s23 = sld [smem:[#allocation15_spill]] (!%p1613_p7) }
  0x2e   : > { %v796_v0 = vld [vmem:[%s739_s24] sm:$0x1f]  ;;  %vm799_vm0 = vcmask 258048   ;;  %v1781_v2 = vmov 32.0  }
  0x2f   : > { %v800_v1 = vsel %vm799_vm0, %v796_v0, 0.0  ;;  %1699 = vrcp.f32 %v1781_v2  ;;  %v1697_v23 = vld [vmem:[%s2224_s19] ss:$0 sm:$0xff] }
  0x30   : > { %801 = vadd.xlane.f32.xlu0 %v800_v1  ;;  %v1698_v25 = vld [vmem:[%s2225_s23] ss:$0 sm:$0xff] }
  0x35   : > { %v1700_v3 = vpop.eup %1699 }
  0x36   : > { %v804_v4 = vmul.f32 32.0, %v1700_v3  ;;  %vm808_vm1 = vweird.f32 %v1700_v3 }
  0x38   : > { %v805_v5 = vsub.f32 1.0, %v804_v4 }
  0x3a   : > { %v806_v6 = vmul.f32 %v1700_v3, %v805_v5 }
  0x3c   : > { %v807_v7 = vadd.f32 %v1700_v3, %v806_v6 }
  0x3e   : > { %v809_v8 = vsel %vm808_vm1, %v1700_v3, %v807_v7 }
  0xa3   : > { %v802_v9 = vpop.xlane.xlu0 %801 }
  0xa4   : > { %v810_v10 = vmul.f32 %v809_v8, %v802_v9 }
  0xa6   : > { %v811_v11 = vsub.f32 %v796_v0, %v810_v10 }
  0xa8   : > { %v812_v12 = vmul.f32 %v811_v11, %v811_v11 }
  0xaa   : > { %v813_v13 = vsel %vm799_vm0, %v812_v12, 0.0 }
  0xab   : > { %814 = vadd.xlane.f32.xlu0 %v813_v13 }
 0x11e   : > { %v815_v14 = vpop.xlane.xlu0 %814 }
 0x11f   : > { %v816_v15 = vmul.f32 %v815_v14, %v809_v8 }
 0x121   : > { %v817_v16 = vadd.f32 1e-05, %v816_v15 }
 0x123   : > { %1701 = vrsqrt.f32 %v817_v16  ;;  %vm824_vm3 = vweird.f32 %v817_v16 }
 0x129   : > { %v1702_v17 = vpop.eup %1701 }
 0x12a   : > { %v819_v18 = vmul.f32 %v1702_v17, %v817_v16  ;;  %vm825_vm2 = vweird.f32 %v1702_v17 }
 0x12b   : > { %vm826_vm4 = vmor %vm824_vm3, %vm825_vm2 }
 0x12c   : > { %v820_v19 = vmul.f32 %v1702_v17, %v819_v18 }
 0x12e   : > { %v821_v20 = vmul.f32 0.5, %v820_v19 }
 0x130   : > { %v822_v21 = vsub.f32 1.5, %v821_v20 }
 0x132   : > { %v823_v22 = vmul.f32 %v1702_v17, %v822_v21 }
 0x134   : > { %v827_v24 = vsel %vm826_vm4, %v1702_v17, %v823_v22 }
 0x135   : > { %v828_v26 = vmul.f32 %v827_v24, %v811_v11 }
 0x137   : > { %v832_v27 = vmul.f32 %v1697_v23, %v828_v26 }
 0x139   : > { %v836_v28 = vadd.f32 %v1698_v25, %v832_v27 }
 0x13b   : > { %837 = vst.msk [vmem:[%s1996_s2] sm:$0x1f] %vm799_vm0, %v836_v28 }
 0x13c PF: > { %vm841_vm5 = vcmask 258048   ;;  %v1782_v31 = vmov 32.0   ;;  %v882_v43 = vld [vmem:[%s1954_s13 + $0x18] sm:$0xff]  ;;  %v881_v44 = vld [vmem:[%s1954_s13 + $0x10] sm:$0xff]  ;;  %v880_v45 = vld [vmem:[%s1954_s13 + $0x8] sm:$0xff]  ;;  %s2226_s1 = sld [smem:[#allocation10_spill]]  ;;  %s2228_s0 = scalar_lea.vmem %s2179_s3, %s1926_s20 }
 0x13d   : > { %1711 = vrcp.f32 %v1782_v31  ;;  %903 = vmatpush.msra.mxu2 %v882_v43  ;;  %v879_v46 = vld [vmem:[%s1954_s13] sm:$0xff]  ;;  %vm887_vm10 = vcmask 261120   ;;  %s2229_s4 = scalar_lea.vmem %s2181_s5, %s1926_s20  ;;  %s1783_s6 = smov 112   ;;  %vm915_vm11 = vcmask 64512   ;;  %vm942_vm12 = vcmask 36864  }
 0x13e   : > { %v1704_v59 = vld [vmem:[%s2228_s0] ss:$0 sm:$0xff]  ;;  %s1784_s19 = smov 120   ;;  %s1785_s24 = smov 96   ;;  %vm960_vm13 = vcmask 1044480   ;;  %vm956_vm14 = vcmask 39936  }
 0x13f   : > { %904 = vmatpush.msra.mxu2 %v881_v44  ;;  %v1705_v62 = vld [vmem:[%s2229_s4] ss:$0 sm:$0xff]  ;;  %s1786_s22 = smov 80   ;;  %s1787_s23 = smov 88   ;;  %vm1200_vm15 = vcmask 130048   ;;  %vm1202_vm0 = vcmask 195584  }
 0x140   : > { %s1788_s13 = smov 104   ;;  %s1789_s25 = smov 72  }
 0x141   : > { %905 = vmatpush.msra.mxu2 %v880_v45  ;;  %s2230_s30 = sld [smem:[#allocation9_spill]]  ;;  %s1791_s0 = smov 40  }
 0x142   : > { %v2010_v29 = vld [vmem:[%s1996_s2] sm:$0x1f]  ;;  %s2227_s29 = scalar_lea.vmem %s2226_s1, %s1926_s20  ;;  %s1792_s27 = smov 56  }
 0x143   : > { %v842_v30 = vsel %vm841_vm5, %v2010_v29, 0.0  ;;  %v1712_v32 = vpop.eup %1711  ;;  %906 = vmatpush.msra.mxu2 %v879_v46  ;;  %v1703_v56 = vld [vmem:[%s2227_s29] ss:$0 sm:$0xff]  ;;  %s1793_s14 = smov 48   ;;  %s1794_s4 = smov 8  }
 0x144   : > { %843 = vadd.xlane.f32.xlu0 %v842_v30  ;;  %v846_v33 = vmul.f32 32.0, %v1712_v32  ;;  %vm850_vm6 = vweird.f32 %v1712_v32  ;;  %s2234_s29 = scalar_lea.vmem %s2185_s9, %s1926_s20 }
 0x146   : > { %v847_v34 = vsub.f32 1.0, %v846_v33 }
 0x147   : > { %s2231_s16 = scalar_lea.vmem %s2230_s30, %s1928_s21  ;;  %s1790_s21 = smov 64  }
 0x148   : > { %v848_v35 = vmul.f32 %v1712_v32, %v847_v34  ;;  %v911_v9 = vld [vmem:[%s2231_s16] sm:$0x1f] }
 0x14a   : > { %v849_v36 = vadd.f32 %v1712_v32, %v848_v35 }
 0x14c   : > { %v2014_v37 = vsel %vm850_vm6, %v1712_v32, %v849_v36 }
 0x1b7   : > { %v844_v38 = vpop.xlane.xlu0 %843 }
 0x1b8   : > { %v852_v39 = vmul.f32 %v2014_v37, %v844_v38 }
 0x1ba   : > { %v853_v40 = vsub.f32 %v2010_v29, %v852_v39 }
 0x1bc   : > { %v854_v41 = vmul.f32 %v853_v40, %v853_v40 }
 0x1be   : > { %v855_v42 = vsel %vm841_vm5, %v854_v41, 0.0 }
 0x1bf   : > { %856 = vadd.xlane.f32.xlu0 %v855_v42 }
 0x232   : > { %v857_v47 = vpop.xlane.xlu0 %856 }
 0x233   : > { %v858_v48 = vmul.f32 %v857_v47, %v2014_v37 }
 0x235   : > { %v859_v49 = vadd.f32 1e-05, %v858_v48 }
 0x237   : > { %1713 = vrsqrt.f32 %v859_v49  ;;  %vm866_vm8 = vweird.f32 %v859_v49 }
 0x23d   : > { %v1714_v50 = vpop.eup %1713 }
 0x23e   : > { %v861_v51 = vmul.f32 %v1714_v50, %v859_v49  ;;  %vm867_vm7 = vweird.f32 %v1714_v50 }
 0x23f   : > { %vm868_vm9 = vmor %vm866_vm8, %vm867_vm7 }
 0x240   : > { %v862_v52 = vmul.f32 %v1714_v50, %v861_v51 }
 0x242   : > { %v863_v53 = vmul.f32 0.5, %v862_v52 }
 0x244   : > { %v864_v54 = vsub.f32 1.5, %v863_v53 }
 0x246   : > { %v865_v55 = vmul.f32 %v1714_v50, %v864_v54 }
 0x248   : > { %v869_v57 = vsel %vm868_vm9, %v1714_v50, %v865_v55 }
 0x249   : > { %v870_v58 = vmul.f32 %v869_v57, %v853_v40 }
 0x24b   : > { %v874_v60 = vmul.f32 %v1703_v56, %v870_v58 }
 0x24d   : > { %v878_v61 = vadd.f32 %v1704_v59, %v874_v60 }
 0x24f   : > { %1614 = vmatmul.msk.f32.vlgmr.msra.gmra.mxu2 %vm887_vm10, %v878_v61 }
 0x2d2   : > { %v908_v63 = vpop.f32.mrf.mxu2 }
 0x2d3   : > { %v2040_v0 = vadd.f32 %v1705_v62, %v908_v63 }
 0x2d5   : > { %1051 = vrot.lane.b32.xlu0 %v2040_v0, %s1783_s6  ;;  %983 = vrot.lane.b32.xlu2 %v2040_v0, %s1784_s19  ;;  %s1795_s6 = smov 16   ;;  %s1796_s19 = smov 24  }
 0x2d6   : > { %913 = vrot.lane.b32.xlu1 %v2040_v0, %s1785_s24 }
 0x2dd   : > { %1053 = vrot.lane.b32.xlu2 %v2040_v0, %s1786_s22 }
 0x2de   : > { %985 = vrot.lane.b32.xlu1 %v2040_v0, %s1787_s23  ;;  %s2232_s23 = scalar_lea.vmem %s2183_s7, %s1926_s20 }
 0x2e5   : > { %1119 = vrot.lane.b32.xlu2 %v2040_v0, %s1788_s13  ;;  %s2233_s13 = scalar_lea.vmem %s2184_s8, %s1926_s20 }
 0x2e6   : > { %1121 = vrot.lane.b32.xlu1 %v2040_v0, %s1789_s25 }
 0x32f   : > { %v984_v1 = vpop.permute.xlu2 %983 }
 0x337   : > { %v1054_v3 = vpop.permute.xlu2 %1053 }
 0x33f   : > { %v1120_v7 = vpop.permute.xlu2 %1119 }
 0x347   : > { %v1052_v5 = vpop.permute.xlu0 %1051 }
 0x348   : > { %v914_v2 = vpop.permute.xlu1 %913 }
 0x349   : > { %1615 = vmatpush.xpose.msk.msra.mxu1 %vm915_vm11, %v914_v2 }
 0x34c   : > { %1616 = vmatmul.msk.f32.vlgmr.msra.gmra.mxu1 %vm915_vm11, %v2040_v0 }
 0x34d   : > { %1623 = vmatpush.xpose.msk.msrb.mxu1 %vm915_vm11, %v1054_v3  ;;  %v1207_v3 = vld [vmem:[%s1959_s26 + $0x18] sm:$0xff] }
 0x350   : > { %v986_v4 = vpop.permute.xlu1 %985 }
 0x351   : > { %1619 = vmatpush.xpose.msk.msra.mxu3 %vm915_vm11, %v986_v4  ;;  %v1206_v4 = vld [vmem:[%s1959_s26 + $0x10] sm:$0xff] }
 0x354   : > { %1620 = vmatmul.msk.f32.vlgmr.msra.gmra.mxu3 %vm915_vm11, %v984_v1  ;;  %1624 = vmatmul.msk.f32.vlgmr.msrb.gmra.mxu1 %vm915_vm11, %v1052_v5  ;;  %v1205_v5 = vld [vmem:[%s1959_s26 + $0x8] sm:$0xff] }
 0x358   : > { %v1122_v6 = vpop.permute.xlu1 %1121 }
 0x359   : > { %1627 = vmatpush.xpose.msk.msra.mxu1 %vm915_vm11, %v1122_v6  ;;  %v1204_v6 = vld [vmem:[%s1959_s26] sm:$0xff] }
 0x35c   : > { %1628 = vmatmul.msk.f32.vlgmr.msra.gmra.mxu1 %vm915_vm11, %v1120_v7 }
 0x35d   : > { %1227 = vmatpush.msrb.mxu1 %v1207_v3 }
 0x35f   : > { %1228 = vmatpush.msrb.mxu1 %v1206_v4 }
 0x361   : > { %1229 = vmatpush.msrb.mxu1 %v1205_v5 }
 0x363   : > { %1230 = vmatpush.msrb.mxu1 %v1204_v6 }
 0x3c9   : > { %v937_v8 = vpop.f32.mrf.mxu1 }
 0x3ca   : > { %v940_v10 = vmul.f32 0.35355338, %v937_v8 }
 0x3cc   : > { %v941_v11 = vadd.f32 %v940_v10, %v911_v9 }
 0x3ce   : > { %v943_v12 = vsel %vm942_vm12, %v941_v11, -inf }
 0x3cf   : > { %944 = vmax.xlane.f32.xlu1 %v943_v12 }
 0x3d1   : > { %v1076_v13 = vpop.f32.mrf.mxu1 }
 0x3d2   : > { %v1079_v14 = vmul.f32 0.35355338, %v1076_v13  ;;  %v1706_v13 = vld [vmem:[%s2232_s23] ss:$0 sm:$0xff] }
 0x3d4   : > { %v1080_v15 = vadd.f32 %v1079_v14, %v911_v9 }
 0x3d6   : > { %v1081_v16 = vsel %vm942_vm12, %v1080_v15, -inf }
 0x3d7   : > { %1082 = vmax.xlane.f32.xlu0 %v1081_v16  ;;  %v1008_v17 = vpop.f32.mrf.mxu3 }
 0x3d8   : > { %v1011_v18 = vmul.f32 0.35355338, %v1008_v17 }
 0x3d9   : > { %v1144_v19 = vpop.f32.mrf.mxu1 }
 0x3da   : > { %v1012_v20 = vadd.f32 %v1011_v18, %v911_v9  ;;  %v1147_v21 = vmul.f32 0.35355338, %v1144_v19 }
 0x3dc   : > { %v1013_v22 = vsel %vm942_vm12, %v1012_v20, -inf  ;;  %v1148_v23 = vadd.f32 %v1147_v21, %v911_v9 }
 0x3dd   : > { %1014 = vmax.xlane.f32.xlu2 %v1013_v22 }
 0x3de   : > { %v1149_v24 = vsel %vm942_vm12, %v1148_v23, -inf }
 0x3e5   : > { %1150 = vmax.xlane.f32.xlu2 %v1149_v24  ;;  %v1270_v24 = vld [vmem:[%s1976_s28 + $0x10] sm:$0xff] }
 0x3e8   : > { %954 = vrot.lane.b32.xlu1 %v2040_v0, %s1790_s21 }
 0x442   : > { %v945_v25 = vpop.xlane.xlu1 %944 }
 0x443   : > { %v946_v26 = vsub.f32 %v941_v11, %v945_v25  ;;  %v1269_v25 = vld [vmem:[%s1976_s28 + $0x8] sm:$0xff] }
 0x445   : > { %v947_v27 = vmul.f32 1.442695, %v946_v26 }
 0x447   : > { %1715 = vpow2.f32 %v947_v27 }
 0x44a   : > { %v1083_v28 = vpop.xlane.xlu0 %1082 }
 0x44b   : > { %v1084_v30 = vsub.f32 %v1080_v15, %v1083_v28 }
 0x44d   : > { %v1716_v31 = vpop.eup %1715  ;;  %v1085_v32 = vmul.f32 1.442695, %v1084_v30 }
 0x44e   : > { %v949_v33 = vsel %vm942_vm12, %v1716_v31, 0.0 }
 0x44f   : > { %1717 = vpow2.f32 %v1085_v32  ;;  %950 = vadd.xlane.f32.xlu1 %v949_v33 }
 0x450   : > { %v1015_v34 = vpop.xlane.xlu2 %1014 }
 0x451   : > { %v1016_v35 = vsub.f32 %v1012_v20, %v1015_v34 }
 0x453   : > { %v1017_v36 = vmul.f32 1.442695, %v1016_v35 }
 0x455   : > { %v1718_v38 = vpop.eup %1717  ;;  %1719 = vpow2.f32 %v1017_v36  ;;  %v1707_v36 = vld [vmem:[%s2233_s13] ss:$0 sm:$0xff] }
 0x456   : > { %v1087_v39 = vsel %vm942_vm12, %v1718_v38, 0.0 }
 0x457   : > { %1088 = vadd.xlane.f32.xlu0 %v1087_v39 }
 0x458   : > { %v1151_v40 = vpop.xlane.xlu2 %1150 }
 0x459   : > { %v1152_v41 = vsub.f32 %v1148_v23, %v1151_v40  ;;  %v1271_v23 = vld [vmem:[%s1976_s28 + $0x18] sm:$0xff]  ;;  %v1708_v40 = vld [vmem:[%s2234_s29] ss:$0 sm:$0xff] }
 0x45a   : > { %v955_v42 = vpop.permute.xlu1 %954 }
 0x45b   : > { %v1720_v43 = vpop.eup %1719  ;;  %v1153_v44 = vmul.f32 1.442695, %v1152_v41  ;;  %1617 = vmatpush.msk.msrb.mxu2 %vm960_vm13, %v955_v42 }
 0x45c   : > { %v1019_v45 = vsel %vm942_vm12, %v1720_v43, 0.0 }
 0x45d   : > { %1721 = vpow2.f32 %v1153_v44  ;;  %1020 = vadd.xlane.f32.xlu2 %v1019_v45  ;;  %v1334_v44 = vld [vmem:[%s1986_s15 + $0x70] sm:$0xff]  ;;  %v1333_v45 = vld [vmem:[%s1986_s15 + $0x68] sm:$0xff] }
 0x463   : > { %v1722_v46 = vpop.eup %1721 }
 0x464   : > { %v1155_v47 = vsel %vm942_vm12, %v1722_v46, 0.0 }
 0x465   : > { %1156 = vadd.xlane.f32.xlu2 %v1155_v47  ;;  %v1331_v47 = vld [vmem:[%s1986_s15 + $0x58] sm:$0xff] }
 0x468   : > { %1160 = vrot.lane.b32.xlu1 %v2040_v0, %s1791_s0  ;;  %s2236_s0 = sld [smem:[#allocation2_spill]] }
 0x46b   : > { %1024 = vrot.lane.b32.xlu0 %v2040_v0, %s1792_s27 }
 0x46e   : > { %p1634_p8 = scmp.ne.s32.totalorder %s2236_s0, 1 }
 0x46f   : > { %s2237_s27 = sld [smem:[#allocation16_spill]] (!%p1634_p8) }
 0x47d   : > { %1092 = vrot.lane.b32.xlu2 %v2040_v0, %s1793_s14 }
 0x4c2   : > { %v951_v48 = vpop.xlane.xlu1 %950 }
 0x4c3   : > { %1723 = vrcp.f32 %v951_v48  ;;  %v1330_v48 = vld [vmem:[%s1986_s15 + $0x50] sm:$0xff] }
 0x4c9   : > { %v1724_v49 = vpop.eup %1723 }
 0x4ca   : > { %v953_v50 = vmul.f32 %v1724_v49, %v1716_v31  ;;  %v1089_v52 = vpop.xlane.xlu0 %1088  ;;  %v1329_v49 = vld [vmem:[%s1986_s15 + $0x48] sm:$0xff] }
 0x4cc   : > { %1618 = vmatmul.msk.f32.vlgmr.msrb.gmra.mxu2 %vm956_vm14, %v953_v50  ;;  %v1328_v50 = vld [vmem:[%s1986_s15 + $0x40] sm:$0xff] }
 0x4d0   : > { %v1021_v51 = vpop.xlane.xlu2 %1020 }
 0x4d1   : > { %1725 = vrcp.f32 %v1021_v51  ;;  %v1327_v51 = vld [vmem:[%s1986_s15 + $0x38] sm:$0xff] }
 0x4d2   : > { %1727 = vrcp.f32 %v1089_v52  ;;  %v1326_v52 = vld [vmem:[%s1986_s15 + $0x30] sm:$0xff] }
 0x4d7   : > { %v1726_v54 = vpop.eup %1725 }
 0x4d8   : > { %v1157_v53 = vpop.xlane.xlu2 %1156  ;;  %v1728_v55 = vpop.eup %1727  ;;  %v1023_v56 = vmul.f32 %v1726_v54, %v1720_v43  ;;  %v1335_v43 = vld [vmem:[%s1986_s15 + $0x78] sm:$0xff]  ;;  %v1324_v54 = vld [vmem:[%s1986_s15 + $0x20] sm:$0xff] }
 0x4d9   : > { %1729 = vrcp.f32 %v1157_v53  ;;  %v1091_v60 = vmul.f32 %v1728_v55, %v1718_v38  ;;  %1336 = vmatpush.msra.mxu0 %v1335_v43  ;;  %v1325_v53 = vld [vmem:[%s1986_s15 + $0x28] sm:$0xff]  ;;  %v1323_v55 = vld [vmem:[%s1986_s15 + $0x18] sm:$0xff] }
 0x4da   : > { %v1161_v58 = vpop.permute.xlu1 %1160 }
 0x4db   : > { %1337 = vmatpush.msra.mxu0 %v1334_v44 }
 0x4dd   : > { %v1025_v57 = vpop.permute.xlu0 %1024  ;;  %1338 = vmatpush.msra.mxu0 %v1333_v45 }
 0x4de   : > { %1621 = vmatpush.msk.msra.mxu2 %vm960_vm13, %v1025_v57  ;;  %v1709_v57 = vld [vmem:[%s779_s17] ss:$0 sm:$0xff] }
 0x4df   : > { %1622 = vmatmul.msk.f32.vlgmr.msra.gmra.mxu2 %vm956_vm14, %v1023_v56  ;;  %v1730_v61 = vpop.eup %1729  ;;  %v1322_v56 = vld [vmem:[%s1986_s15 + $0x10] sm:$0xff] }
 0x4e0   : > { %1629 = vmatpush.msk.msrb.mxu2 %vm960_vm13, %v1161_v58  ;;  %v1093_v59 = vpop.permute.xlu2 %1092  ;;  %v1159_v62 = vmul.f32 %v1730_v61, %v1722_v46  ;;  %v1332_v46 = vld [vmem:[%s1986_s15 + $0x60] sm:$0xff]  ;;  %v1321_v58 = vld [vmem:[%s1986_s15 + $0x8] sm:$0xff] }
 0x4e1   : > { %1625 = vmatpush.msk.msrb.mxu3 %vm960_vm13, %v1093_v59  ;;  %1339 = vmatpush.msra.mxu0 %v1332_v46 }
 0x4e2   : > { %1626 = vmatmul.msk.f32.vlgmr.msrb.gmra.mxu3 %vm956_vm14, %v1091_v60  ;;  %v1320_v60 = vld [vmem:[%s1986_s15] sm:$0xff] }
 0x4e3   : > { %1291 = vmatpush.msra.mxu3 %v1271_v23  ;;  %1340 = vmatpush.msra.mxu0 %v1331_v47 }
 0x4e5   : > { %1292 = vmatpush.msra.mxu3 %v1270_v24  ;;  %1341 = vmatpush.msra.mxu0 %v1330_v48 }
 0x4e7   : > { %1630 = vmatmul.msk.f32.vlgmr.msrb.gmra.mxu2 %vm956_vm14, %v1159_v62  ;;  %1293 = vmatpush.msra.mxu3 %v1269_v25 }
 0x4e8   : > { %1342 = vmatpush.msra.mxu0 %v1329_v49 }
 0x4ea   : > { %1343 = vmatpush.msra.mxu0 %v1328_v50 }
 0x4ec   : > { %1344 = vmatpush.msra.mxu0 %v1327_v51 }
 0x4ee   : > { %1345 = vmatpush.msra.mxu0 %v1326_v52 }
 0x4f0   : > { %1346 = vmatpush.msra.mxu0 %v1325_v53 }
 0x4f2   : > { %1347 = vmatpush.msra.mxu0 %v1324_v54 }
 0x4f4   : > { %1348 = vmatpush.msra.mxu0 %v1323_v55 }
 0x4f6   : > { %1349 = vmatpush.msra.mxu0 %v1322_v56 }
 0x4f8   : > { %1350 = vmatpush.msra.mxu0 %v1321_v58 }
 0x4fa   : > { %1351 = vmatpush.msra.mxu0 %v1320_v60 }
 0x54f   : > { %v980_v63 = vpop.f32.mrf.mxu2 }
 0x562   : > { %v1048_v0 = vpop.f32.mrf.mxu2 }
 0x563   : > { %1188 = vrot.lane.b32.xlu0 %v1048_v0, %s1794_s4 }
 0x565   : > { %v1116_v1 = vpop.f32.mrf.mxu3 }
 0x566   : > { %1192 = vrot.lane.b32.xlu1 %v1116_v1, %s1795_s6  ;;  %s2238_s6 = sld [smem:[#allocation17_spill]] (!%p1634_p8) }
 0x56a   : > { %v1184_v2 = vpop.f32.mrf.mxu2 }
 0x56b   : > { %1196 = vrot.lane.b32.xlu2 %v1184_v2, %s1796_s19 }
 0x5c5   : > { %v1197_v10 = vpop.permute.xlu2 %1196 }
 0x5d5   : > { %v1189_v7 = vpop.permute.xlu0 %1188 }
 0x5d6   : > { %v1199_v8 = vsel %vm915_vm11, %v980_v63, %v1189_v7 }
 0x5d8   : > { %v1193_v9 = vpop.permute.xlu1 %1192 }
 0x5d9   : > { %v1201_v11 = vsel %vm1200_vm15, %v1199_v8, %v1193_v9 }
 0x5da   : > { %v1203_v12 = vsel %vm1202_vm0, %v1201_v11, %v1197_v10 }
 0x5db   : > { %1631 = vmatmul.msk.f32.vlgmr.msrb.gmra.mxu1 %vm887_vm10, %v1203_v12 }
 0x658   : > { %v1232_v14 = vpop.f32.mrf.mxu1 }
 0x659   : > { %v1233_v15 = vadd.f32 %v1706_v13, %v1232_v14  ;;  %v1710_v13 = vld [vmem:[%s787_s18] ss:$0 sm:$0xff] }
 0x65b   : > { %v2095_v16 = vadd.f32 %v1233_v15, %v2010_v29  ;;  %v1268_v29 = vld [vmem:[%s1976_s28] sm:$0xff] }
 0x65c   : > { %1294 = vmatpush.msra.mxu3 %v1268_v29 }
 0x65d   : > { %v1238_v17 = vsel %vm841_vm5, %v2095_v16, 0.0 }
 0x65e   : > { %1239 = vadd.xlane.f32.xlu0 %v1238_v17 }
 0x6d1   : > { %v1240_v18 = vpop.xlane.xlu0 %1239 }
 0x6d2   : > { %v1241_v19 = vmul.f32 %v1240_v18, %v2014_v37 }
 0x6d4   : > { %v1242_v20 = vsub.f32 %v2095_v16, %v1241_v19 }
 0x6d6   : > { %v1243_v21 = vmul.f32 %v1242_v20, %v1242_v20 }
 0x6d8   : > { %v1244_v22 = vsel %vm841_vm5, %v1243_v21, 0.0 }
 0x6d9   : > { %1245 = vadd.xlane.f32.xlu1 %v1244_v22 }
 0x74c   : > { %v1246_v26 = vpop.xlane.xlu1 %1245 }
 0x74d   : > { %v1247_v27 = vmul.f32 %v1246_v26, %v2014_v37 }
 0x74f   : > { %v1248_v28 = vadd.f32 1e-05, %v1247_v27 }
 0x751   : > { %1731 = vrsqrt.f32 %v1248_v28  ;;  %vm1255_vm2 = vweird.f32 %v1248_v28 }
 0x757   : > { %v1732_v30 = vpop.eup %1731 }
 0x758   : > { %v1250_v31 = vmul.f32 %v1732_v30, %v1248_v28  ;;  %vm1256_vm1 = vweird.f32 %v1732_v30 }
 0x759   : > { %vm1257_vm3 = vmor %vm1255_vm2, %vm1256_vm1 }
 0x75a   : > { %v1251_v32 = vmul.f32 %v1732_v30, %v1250_v31 }
 0x75c   : > { %v1252_v33 = vmul.f32 0.5, %v1251_v32 }
 0x75e   : > { %v1253_v34 = vsub.f32 1.5, %v1252_v33 }
 0x760   : > { %v1254_v35 = vmul.f32 %v1732_v30, %v1253_v34 }
 0x762   : > { %v1258_v38 = vsel %vm1257_vm3, %v1732_v30, %v1254_v35 }
 0x763   : > { %v1259_v39 = vmul.f32 %v1258_v38, %v1242_v20 }
 0x765   : > { %v1263_v41 = vmul.f32 %v1707_v36, %v1259_v39 }
 0x767   : > { %v1267_v42 = vadd.f32 %v1708_v40, %v1263_v41 }
 0x769   : > { %1632 = vmatmul.msk.f32.vlgmr.msra.gmra.mxu3 %vm887_vm10, %v1267_v42 }
 0x7ec   : > { %v1296_v59 = vpop.f32.mrf.mxu3 }
 0x7ed   : > { %v1297_v61 = vadd.f32 %v1709_v57, %v1296_v59 }
 0x7ef   : > { %v1633_v62 = vmul.f32 -1.702, %v1297_v61 }
 0x7f1   : > { %v1301_v63 = vmul.f32 1.442695, %v1633_v62 }
 0x7f3   : > { %1733 = vpow2.f32 %v1301_v63 }
 0x7f9   : > { %v1734_v0 = vpop.eup %1733 }
 0x7fa   : > { %v1303_v1 = vadd.f32 1.0, %v1734_v0 }
 0x7fc   : > { %1735 = vrcp.f32 %v1303_v1  ;;  %v1315_v5 = vand.u32 2147483648, %v1303_v1  ;;  %v1313_v7 = vand.u32 2147483647, %v1303_v1  ;;  %vm1309_vm6 = vweird.f32 %v1303_v1 }
 0x7fe   : > { %v1316_v9 = vor.u32 1.1754944e-38, %v1315_v5  ;;  %vm1314_vm8 = vcmp.eq.f32.partialorder %v1313_v7, 8.507059e+37 }
 0x802   : > { %v1736_v2 = vpop.eup %1735 }
 0x803   : > { %v1305_v3 = vmul.f32 %v1736_v2, %v1303_v1  ;;  %vm1310_vm4 = vweird.f32 %v1736_v2 }
 0x804   : > { %vm1311_vm7 = vmor %vm1309_vm6, %vm1310_vm4 }
 0x805   : > { %v1306_v4 = vsub.f32 1.0, %v1305_v3 }
 0x807   : > { %v1307_v6 = vmul.f32 %v1736_v2, %v1306_v4 }
 0x809   : > { %v1308_v8 = vadd.f32 %v1736_v2, %v1307_v6 }
 0x80b   : > { %v1312_v10 = vsel %vm1311_vm7, %v1736_v2, %v1308_v8 }
 0x80c   : > { %v1317_v11 = vsel %vm1314_vm8, %v1316_v9, %v1312_v10 }
 0x80d   : > { %v1319_v12 = vmul.f32 %v1317_v11, %v1297_v61 }
 0x80f   : > { %1352 = vmatmul.f32.vlgmr.msra.gmra.mxu0 %v1319_v12 }
 0x88c   : > { %v1353_v14 = vpop.f32.mrf.mxu0 }
 0x88d   : > { %v1356_v15 = vadd.f32 %v1353_v14, %v2095_v16  ;;  %1366 = sbr.rel (%p1634_p8) target bundleno = 2470 (0x9a6), region = 100 }
 0x88f   : > { %v1361_v17 = vadd.f32 %v1710_v13, %v1356_v15 }
 0x891   : > { %1362 = vst.msk [vmem:[%s1996_s2] sm:$0x1f] %vm841_vm5, %v1361_v17 }
 0x892   : > { %v1737_v33 = vld [vmem:[%s2237_s27] ss:$0 sm:$0xff] }
 0x898   : > { %v1367_v18 = vld [vmem:[%s1996_s2] sm:$0x1f] }
 0x899   : > { %v1370_v19 = vsel %vm841_vm5, %v1367_v18, 0.0 }
 0x89a   : > { %1371 = vadd.xlane.f32.xlu0 %v1370_v19 }
 0x90d   : > { %v1372_v20 = vpop.xlane.xlu0 %1371 }
 0x90e   : > { %v1373_v21 = vmul.f32 %v1372_v20, %v2014_v37 }
 0x910   : > { %v1374_v22 = vsub.f32 %v1367_v18, %v1373_v21 }
 0x912   : > { %v1375_v23 = vmul.f32 %v1374_v22, %v1374_v22 }
 0x914   : > { %v1376_v24 = vsel %vm841_vm5, %v1375_v23, 0.0 }
 0x915   : > { %1377 = vadd.xlane.f32.xlu0 %v1376_v24 }
 0x988   : > { %v1378_v16 = vpop.xlane.xlu0 %1377 }
 0x989   : > { %v1379_v25 = vmul.f32 %v1378_v16, %v2014_v37  ;;  %v1738_v37 = vld [vmem:[%s2238_s6] ss:$0 sm:$0xff] }
 0x98b   : > { %v1380_v29 = vadd.f32 1e-05, %v1379_v25 }
 0x98d   : > { %1739 = vrsqrt.f32 %v1380_v29  ;;  %vm1387_vm10 = vweird.f32 %v1380_v29 }
 0x993   : > { %v1740_v26 = vpop.eup %1739 }
 0x994   : > { %v1382_v27 = vmul.f32 %v1740_v26, %v1380_v29  ;;  %vm1388_vm9 = vweird.f32 %v1740_v26 }
 0x995   : > { %vm1389_vm11 = vmor %vm1387_vm10, %vm1388_vm9 }
 0x996   : > { %v1383_v28 = vmul.f32 %v1740_v26, %v1382_v27 }
 0x998   : > { %v1384_v30 = vmul.f32 0.5, %v1383_v28 }
 0x99a   : > { %v1385_v31 = vsub.f32 1.5, %v1384_v30 }
 0x99c   : > { %v1386_v32 = vmul.f32 %v1740_v26, %v1385_v31 }
 0x99e   : > { %v1390_v34 = vsel %vm1389_vm11, %v1740_v26, %v1386_v32 }
 0x99f   : > { %v1391_v35 = vmul.f32 %v1390_v34, %v1374_v22 }
 0x9a1   : > { %v1395_v36 = vmul.f32 %v1737_v33, %v1391_v35 }
 0x9a3   : > { %v1399_v38 = vadd.f32 %v1738_v37, %v1395_v36 }
 0x9a5   : > { %1400 = vst.msk [vmem:[%s1996_s2] sm:$0x1f] %vm841_vm5, %v1399_v38 }
 0x9a6 PF: > { %s2239_s19 = sld [smem:[#allocation5_spill]] }
 0x9a7   : > { %s2240_s27 = sld [smem:[#allocation3_spill]] }
 0x9a8   : > { %s2241_s28 = sld [smem:[#allocation4_spill]] }
 0x9a9   : > { %s2242_s29 = sld [smem:[#allocation6_spill]] }
 0x9aa   : > { %s2243_s30 = sld [smem:[#allocation7_spill]] }
 0x9ac   : > { %s28_s0 = sadd.s32 1, %s2239_s19  }
 0x9ad   : > { %p25_p9 = scmp.ge.s32.totalorder %s28_s0, 10  }
 0x9af   :  { %27 = sbr.rel (!%p25_p9) target bundleno = 12 (0xc), region = 169 }

// kernel: clip_encoder_forward.6
= control target key start
LH: loop header
LB: loop body
LE: loop exit
PB: predicated region body
PF: predicated region fallthrough
CT: control target
= control target key end

     0   :  { %s121_s0 = inlined_call_operand.vmem [shape: f32[2,32], index: 0, kind: input, shape index: {}]   ;;  %s122_s1 = inlined_call_operand.vmem [shape: f32[32,16], index: 1, kind: input, shape index: {}]   ;;  %s123_s2 = inlined_call_operand.hbm [shape: f32[2,16], index: 2, kind: output, shape index: {}]  }
   0x1   :  { %v16_v0 = vld [vmem:[%s122_s1 + $0x18] sm:$0xff]  ;;  %v15_v1 = vld [vmem:[%s122_s1 + $0x10] sm:$0xff] }
   0x2   :  { %33 = vmatpush.msra.mxu0 %v16_v0 }
   0x3   :  { %7 = vsyncpa [#allocation3], 0  ;;  %v14_v2 = vld [vmem:[%s122_s1 + $0x8] sm:$0xff]  ;;  %v13_v3 = vld [vmem:[%s122_s1] sm:$0xff]  ;;  %vm17_vm0 = vcmask 261120   ;;  %s87_s19 = smov [#allocation2]  }
   0x4   :  { %34 = vmatpush.msra.mxu0 %v15_v1  ;;  %v12_v4 = vld [vmem:[%s121_s0] sm:$0x3]  ;;  %s48_s20 = sshll.u32 %s87_s19, 4  ;;  %s50_s23 = sshll.u32 %s123_s2, 4  ;;  %vm41_vm1 = vcmask 123904   ;;  %s49_s20 = int_to_ptr.vmem [resolvable:$true] %s48_s20  ;;  %s51_s23 = int_to_ptr.hbm [resolvable:$true] %s50_s23 }
   0x6   :  { %35 = vmatpush.msra.mxu0 %v14_v2 }
   0x8   :  { %36 = vmatpush.msra.mxu0 %v13_v3 }
   0x9   :  { %59 = vmatmul.msk.f32.vlgmr.msra.gmra.mxu0 %vm17_vm0, %v12_v4 }
  0x86   :  { %v38_v5 = vpop.f32.mrf.mxu0 }
  0x87   :  { %42 = vst.msk [vmem:[#allocation2] sm:$0x3] %vm41_vm1, %v38_v5 }
  0x88   :  { %53 = dma.vmem_to_hbm [thread:$0]  %s49_s20, 32, %s51_s23, [#allocation3]  }
  0x89   :  { %85 = dma.done.wait [#allocation3], 32  }
  0x8a   :  { %86 = vsyncadd [#allocation3], 4294967264 }
  0x8b   :  { %58 = vsyncpa [#allocation3], 1 }

// kernel: clip_encoder_forward.5
= control target key start
LH: loop header
LB: loop body
LE: loop exit
PB: predicated region body
PF: predicated region fallthrough
CT: control target
= control target key end

     0   :  { %s1833_s27 = smov 0   ;;  %s1835_s28 = smov 0   ;;  %s2104_s0 = inlined_call_operand.vmem [shape: f32[2,8,32], index: 0, kind: input, shape index: {}]   ;;  %s2105_s1 = inlined_call_operand.vmem [shape: f32[2,8,8], index: 1, kind: input, shape index: {}]   ;;  %s2106_s2 = inlined_call_operand.vmem [shape: f32[2,1,32], index: 2, kind: input, shape index: {}]   ;;  %s2107_s3 = inlined_call_operand.vmem [shape: f32[2,1,32], index: 3, kind: input, shape index: {}]   ;;  %s2108_s4 = inlined_call_operand.vmem [shape: f32[2,32,96], index: 4, kind: input, shape index: {}]   ;;  %s2109_s5 = inlined_call_operand.vmem [shape: f32[2,1,96], index: 5, kind: input, shape index: {}]   ;;  %s2110_s6 = inlined_call_operand.vmem [shape: f32[2,32,32], index: 6, kind: input, shape index: {}]   ;;  %s2111_s7 = inlined_call_operand.vmem [shape: f32[2,1,32], index: 7, kind: input, shape index: {}]   ;;  %s2112_s8 = inlined_call_operand.vmem [shape: f32[2,1,32], index: 8, kind: input, shape index: {}]   ;;  %s2113_s9 = inlined_call_operand.vmem [shape: f32[2,1,32], index: 9, kind: input, shape index: {}]   ;;  %s2114_s10 = inlined_call_operand.vmem [shape: f32[2,32,128], index: 10, kind: input, shape index: {}]   ;;  %s2115_s11 = inlined_call_operand.vmem [shape: f32[2,1,128], index: 11, kind: input, shape index: {}]   ;;  %s2116_s12 = inlined_call_operand.vmem [shape: f32[2,128,32], index: 12, kind: input, shape index: {}]   ;;  %s2117_s13 = inlined_call_operand.vmem [shape: f32[2,1,32], index: 13, kind: input, shape index: {}]   ;;  %s2118_s14 = inlined_call_operand.vmem [shape: f32[1,32], index: 14, kind: input, shape index: {}, may-alias: {14,15}]   ;;  %s2119_s15 = inlined_call_operand.vmem [shape: f32[1,32], index: 15, kind: input, shape index: {}, may-alias: {14,15}]   ;;  %s2120_s16 = inlined_call_operand.vmem [shape: f32[1,32], index: 16, kind: input, shape index: {}]   ;;  %s2121_s17 = inlined_call_operand.vmem [shape: f32[1,32], index: 17, kind: input, shape index: {}]   ;;  %s2122_s18 = inlined_call_operand.vmem [shape: f32[2,8,32], index: 18, kind: output, shape index: {}]  }
   0x1   :  { %2127 = sst [smem:[#allocation8_spill]] %s2104_s0  ;;  %s1837_s29 = smov 0  }
   0x2   :  { %2128 = sst [smem:[#allocation9_spill]] %s2105_s1  ;;  %s1839_s30 = smov 0  }
   0x3   :  { %2129 = sst [smem:[#allocation10_spill]] %s2106_s2  ;;  %s1841_s14 = smov 0  }
   0x4   :  { %2130 = sst [smem:[#allocation11_spill]] %s2108_s4 }
   0x5   :  { %2131 = sst [smem:[#allocation12_spill]] %s2110_s6 }
   0x6   :  { %2132 = sst [smem:[#allocation13_spill]] %s2117_s13 }
   0x7   :  { %2133 = sst [smem:[#allocation14_spill]] %s2120_s16 }
   0x8   :  { %2134 = sst [smem:[#allocation15_spill]] %s2121_s17 }
   0x9   :  { %2135 = sst [smem:[#allocation16_spill]] %s2122_s18 }
   0xa LB: > { %2136 = sst [smem:[#allocation2_spill]] %s1705_s27  ;;  %s37_s15 = sadd.s32 1, %s1713_s29  ;;  %s1721_s14 = sphi %s1841_s14, %s28_s14   ;;  %s1717_s30 = sphi %s1839_s30, %s2167_s30   ;;  %s1713_s29 = sphi %s1837_s29, %s2166_s29   ;;  %s1709_s28 = sphi %s1835_s28, %s2165_s28   ;;  %s1705_s27 = sphi %s1833_s27, %s2164_s27  }
   0xb   : > { %2137 = sst [smem:[#allocation3_spill]] %s1713_s29  ;;  %s40_s0 = sadd.s32 1, %s1717_s30 }
   0xc   : > { %2138 = sst [smem:[#allocation4_spill]] %s1717_s30  ;;  %p38_p0 = scmp.ge.s32.totalorder %s37_s15, 2 }
   0xd   : > { %2139 = sst [smem:[#allocation5_spill]] %s1721_s14  ;;  %p1554_p1 = scmp.ge.s32.totalorder %s1721_s14, 1 }
   0xe   : > { %p636_p2 = scmp.lt.s32.totalorder %s1721_s14, 5  ;;  %s2169_s15 = smov (%p38_p0, %s37_s15), 0 }
   0xf   : > { %2140 = sst [smem:[#allocation6_spill]] %s2169_s15  ;;  %s2171_s0 = smov (!%p38_p0, %s40_s0), %s1717_s30 }
  0x10   : > { %p637_p3 = pnand %p1554_p1, %p636_p2  ;;  %p42_p4 = scmp.ge.s32.totalorder %s2171_s0, 2 }
  0x11   : > { %p736_p5 = scmp.lt.s32.totalorder (!%p637_p3), %s1709_s28, 1  ;;  %p744_p6 = scmp.lt.s32.totalorder (!%p637_p3), %s1705_s27, 1 }
  0x12   : > { %s2173_s0 = smov (%p42_p4, %s2171_s0), 0  ;;  %640 = sbr.rel (%p637_p3) target bundleno = 2200 (0x898), region = 92 }
  0x13   : > { %2141 = sst [smem:[#allocation7_spill]] %s2173_s0 }
  0x14   : > { %s2142_s22 = sld [smem:[#allocation8_spill]] (!%p637_p3) }
  0x15   : > { %s2145_s4 = sld [smem:[#allocation11_spill]] (!%p637_p3) }
  0x16   : > { %s2146_s6 = sld [smem:[#allocation12_spill]] (!%p637_p3) }
  0x17   : > { %s2175_s28 = smov (!%p736_p5, %s1709_s28), 1  ;;  %s2147_s26 = sld [smem:[#allocation13_spill]] }
  0x18   : > { %s1867_s19 = scalar_select %p744_p6, %s1705_s27, 1 }
  0x19   : > { %s1869_s1 = sshll.u32 %s2175_s28, 3 }
  0x1a   : > { %s739_s2 = scalar_lea.vmem %s2142_s22, %s1869_s1  ;;  %s1586_s16 = sshll.u32 %s1867_s19, 5 }
  0x1b   : > { %s1895_s13 = scalar_lea.vmem %s2145_s4, %s1586_s16  ;;  %s1917_s28 = scalar_lea.vmem %s2114_s10, %s1586_s16 }
  0x1c   : > { %s1900_s25 = scalar_lea.vmem %s2146_s6, %s1586_s16  ;;  %s779_s29 = scalar_lea.vmem %s2115_s11, %s1867_s19 }
  0x1d   : > { %s1589_s4 = sshll.u32 %s1867_s19, 7  ;;  %s787_s18 = scalar_lea.vmem %s2147_s26, %s1867_s19 }
  0x1e   : > { %s1927_s17 = scalar_lea.vmem %s2116_s12, %s1589_s4  ;;  %s2148_s6 = sld [smem:[#allocation16_spill]] }
  0x1f   : > { %s2149_s16 = sld [smem:[#allocation2_spill]] }
  0x24   : > { %s1937_s21 = scalar_lea.vmem %s2148_s6, %s1869_s1 }
  0x25   : > { %p1566_p7 = scmp.ne.s32.totalorder %s2149_s16, 0 }
  0x27   : > { %795 = sbr.rel (%p1566_p7) target bundleno = 46 (0x2e), region = 96 }
  0x2c   : > { %v796_v0 = vld [vmem:[%s739_s2] sm:$0xff]  ;;  %vm797_vm0 = vcmask 261120  }
  0x2d   : > { %798 = vst.msk [vmem:[%s1937_s21] sm:$0xff] %vm797_vm0, %v796_v0 }
  0x2e PF: > { %vm802_vm1 = vcmask 261120   ;;  %v1723_v3 = vmov 32.0   ;;  %v843_v15 = vld [vmem:[%s1895_s13 + $0x18] sm:$0xff]  ;;  %v842_v16 = vld [vmem:[%s1895_s13 + $0x10] sm:$0xff]  ;;  %v841_v17 = vld [vmem:[%s1895_s13 + $0x8] sm:$0xff]  ;;  %s2152_s22 = scalar_lea.vmem %s2107_s3, %s1867_s19  ;;  %s2153_s30 = scalar_lea.vmem %s2109_s5, %s1867_s19  ;;  %vm875_vm6 = vcmask 64512  }
  0x2f   : > { %1653 = vrcp.f32 %v1723_v3  ;;  %863 = vmatpush.msra.mxu2 %v843_v15  ;;  %v840_v18 = vld [vmem:[%s1895_s13] sm:$0xff]  ;;  %s2150_s13 = sld [smem:[#allocation10_spill]]  ;;  %s1724_s15 = smov 112   ;;  %vm1153_vm7 = vcmask 130048   ;;  %vm1155_vm8 = vcmask 195584  }
  0x30   : > { %v1646_v31 = vld [vmem:[%s2152_s22] ss:$0 sm:$0xff]  ;;  %s1725_s14 = smov 120   ;;  %s1726_s0 = smov 96  }
  0x31   : > { %864 = vmatpush.msra.mxu2 %v842_v16  ;;  %v1647_v34 = vld [vmem:[%s2153_s30] ss:$0 sm:$0xff]  ;;  %s1727_s27 = smov 80   ;;  %s1728_s16 = smov 88  }
  0x32   : > { %s1729_s4 = smov 104   ;;  %s1730_s6 = smov 72  }
  0x33   : > { %865 = vmatpush.msra.mxu2 %v841_v17  ;;  %s2154_s26 = sld [smem:[#allocation9_spill]]  ;;  %s1732_s22 = smov 40  }
  0x34   : > { %v1942_v1 = vld [vmem:[%s1937_s21] sm:$0xff]  ;;  %s1733_s23 = smov 56   ;;  %s1734_s24 = smov 48  }
  0x35   : > { %v803_v2 = vsel %vm802_vm1, %v1942_v1, 0.0  ;;  %v1654_v4 = vpop.eup %1653  ;;  %866 = vmatpush.msra.mxu2 %v840_v18  ;;  %s2151_s2 = scalar_lea.vmem %s2150_s13, %s1867_s19  ;;  %s1735_s30 = smov 8  }
  0x36   : > { %804 = vadd.xlane.f32.xlu0 %v803_v2  ;;  %v807_v5 = vmul.f32 32.0, %v1654_v4  ;;  %vm811_vm2 = vweird.f32 %v1654_v4  ;;  %v1645_v28 = vld [vmem:[%s2151_s2] ss:$0 sm:$0xff]  ;;  %s2158_s2 = scalar_lea.vmem %s2113_s9, %s1867_s19 }
  0x38   : > { %v808_v6 = vsub.f32 1.0, %v807_v5 }
  0x39   : > { %s2155_s20 = scalar_lea.vmem %s2154_s26, %s1869_s1  ;;  %s1731_s1 = smov 64  }
  0x3a   : > { %v809_v7 = vmul.f32 %v1654_v4, %v808_v6  ;;  %v871_v45 = vld [vmem:[%s2155_s20] sm:$0xff] }
  0x3c   : > { %v810_v8 = vadd.f32 %v1654_v4, %v809_v7 }
  0x3e   : > { %v1946_v9 = vsel %vm811_vm2, %v1654_v4, %v810_v8 }
  0xa9   : > { %v805_v10 = vpop.xlane.xlu0 %804 }
  0xaa   : > { %v813_v11 = vmul.f32 %v1946_v9, %v805_v10 }
  0xac   : > { %v814_v12 = vsub.f32 %v1942_v1, %v813_v11 }
  0xae   : > { %v815_v13 = vmul.f32 %v814_v12, %v814_v12 }
  0xb0   : > { %v816_v14 = vsel %vm802_vm1, %v815_v13, 0.0 }
  0xb1   : > { %817 = vadd.xlane.f32.xlu0 %v816_v14 }
 0x124   : > { %v818_v19 = vpop.xlane.xlu0 %817 }
 0x125   : > { %v819_v20 = vmul.f32 %v818_v19, %v1946_v9 }
 0x127   : > { %v820_v21 = vadd.f32 1e-05, %v819_v20 }
 0x129   : > { %1655 = vrsqrt.f32 %v820_v21  ;;  %vm827_vm4 = vweird.f32 %v820_v21 }
 0x12f   : > { %v1656_v22 = vpop.eup %1655 }
 0x130   : > { %v822_v23 = vmul.f32 %v1656_v22, %v820_v21  ;;  %vm828_vm3 = vweird.f32 %v1656_v22 }
 0x131   : > { %vm829_vm5 = vmor %vm827_vm4, %vm828_vm3 }
 0x132   : > { %v823_v24 = vmul.f32 %v1656_v22, %v822_v23 }
 0x134   : > { %v824_v25 = vmul.f32 0.5, %v823_v24 }
 0x136   : > { %v825_v26 = vsub.f32 1.5, %v824_v25 }
 0x138   : > { %v826_v27 = vmul.f32 %v1656_v22, %v825_v26 }
 0x13a   : > { %v830_v29 = vsel %vm829_vm5, %v1656_v22, %v826_v27 }
 0x13b   : > { %v831_v30 = vmul.f32 %v830_v29, %v814_v12 }
 0x13d   : > { %v835_v32 = vmul.f32 %v1645_v28, %v831_v30 }
 0x13f   : > { %v839_v33 = vadd.f32 %v1646_v31, %v835_v32 }
 0x141   : > { %1567 = vmatmul.msk.f32.vlgmr.msra.gmra.mxu2 %vm802_vm1, %v839_v33 }
 0x1c4   : > { %v868_v35 = vpop.f32.mrf.mxu2 }
 0x1c5   : > { %v1972_v36 = vadd.f32 %v1647_v34, %v868_v35 }
 0x1c7   : > { %1006 = vrot.lane.b32.xlu0 %v1972_v36, %s1724_s15  ;;  %939 = vrot.lane.b32.xlu2 %v1972_v36, %s1725_s14  ;;  %s1736_s15 = smov 16   ;;  %s1737_s14 = smov 24  }
 0x1c8   : > { %873 = vrot.lane.b32.xlu1 %v1972_v36, %s1726_s0 }
 0x1cf   : > { %1008 = vrot.lane.b32.xlu2 %v1972_v36, %s1727_s27 }
 0x1d0   : > { %941 = vrot.lane.b32.xlu1 %v1972_v36, %s1728_s16  ;;  %s2156_s16 = scalar_lea.vmem %s2111_s7, %s1867_s19 }
 0x1d7   : > { %1073 = vrot.lane.b32.xlu2 %v1972_v36, %s1729_s4  ;;  %s2157_s4 = scalar_lea.vmem %s2112_s8, %s1867_s19 }
 0x1d8   : > { %1075 = vrot.lane.b32.xlu1 %v1972_v36, %s1730_s6 }
 0x221   : > { %v940_v37 = vpop.permute.xlu2 %939 }
 0x229   : > { %v1009_v39 = vpop.permute.xlu2 %1008 }
 0x231   : > { %v1074_v43 = vpop.permute.xlu2 %1073 }
 0x239   : > { %v1007_v41 = vpop.permute.xlu0 %1006 }
 0x23a   : > { %v874_v38 = vpop.permute.xlu1 %873 }
 0x23b   : > { %1568 = vmatpush.xpose.msk.msra.mxu1 %vm875_vm6, %v874_v38 }
 0x23e   : > { %1569 = vmatmul.msk.f32.vlgmr.msra.gmra.mxu1 %vm875_vm6, %v1972_v36 }
 0x23f   : > { %1574 = vmatpush.xpose.msk.msrb.mxu1 %vm875_vm6, %v1009_v39  ;;  %v1160_v39 = vld [vmem:[%s1900_s25 + $0x18] sm:$0xff] }
 0x242   : > { %v942_v40 = vpop.permute.xlu1 %941 }
 0x243   : > { %1571 = vmatpush.xpose.msk.msra.mxu3 %vm875_vm6, %v942_v40  ;;  %v1159_v40 = vld [vmem:[%s1900_s25 + $0x10] sm:$0xff] }
 0x246   : > { %1572 = vmatmul.msk.f32.vlgmr.msra.gmra.mxu3 %vm875_vm6, %v940_v37  ;;  %1575 = vmatmul.msk.f32.vlgmr.msrb.gmra.mxu1 %vm875_vm6, %v1007_v41  ;;  %v1158_v41 = vld [vmem:[%s1900_s25 + $0x8] sm:$0xff] }
 0x24a   : > { %v1076_v42 = vpop.permute.xlu1 %1075 }
 0x24b   : > { %1577 = vmatpush.xpose.msk.msra.mxu1 %vm875_vm6, %v1076_v42  ;;  %v1157_v42 = vld [vmem:[%s1900_s25] sm:$0xff] }
 0x24e   : > { %1578 = vmatmul.msk.f32.vlgmr.msra.gmra.mxu1 %vm875_vm6, %v1074_v43 }
 0x24f   : > { %1180 = vmatpush.msrb.mxu1 %v1160_v39 }
 0x251   : > { %1181 = vmatpush.msrb.mxu1 %v1159_v40 }
 0x253   : > { %1182 = vmatpush.msrb.mxu1 %v1158_v41 }
 0x255   : > { %1183 = vmatpush.msrb.mxu1 %v1157_v42 }
 0x2bb   : > { %v897_v44 = vpop.f32.mrf.mxu1 }
 0x2bc   : > { %v900_v46 = vmul.f32 0.35355338, %v897_v44 }
 0x2be   : > { %v901_v47 = vadd.f32 %v900_v46, %v871_v45 }
 0x2c0   : > { %v902_v48 = vsel %vm875_vm6, %v901_v47, -inf }
 0x2c1   : > { %903 = vmax.xlane.f32.xlu1 %v902_v48 }
 0x2c3   : > { %v1031_v49 = vpop.f32.mrf.mxu1 }
 0x2c4   : > { %v1034_v50 = vmul.f32 0.35355338, %v1031_v49  ;;  %v1648_v49 = vld [vmem:[%s2156_s16] ss:$0 sm:$0xff] }
 0x2c6   : > { %v1035_v51 = vadd.f32 %v1034_v50, %v871_v45 }
 0x2c8   : > { %v1036_v52 = vsel %vm875_vm6, %v1035_v51, -inf }
 0x2c9   : > { %1037 = vmax.xlane.f32.xlu0 %v1036_v52  ;;  %v964_v53 = vpop.f32.mrf.mxu3 }
 0x2ca   : > { %v967_v54 = vmul.f32 0.35355338, %v964_v53 }
 0x2cb   : > { %v1098_v55 = vpop.f32.mrf.mxu1 }
 0x2cc   : > { %v968_v56 = vadd.f32 %v967_v54, %v871_v45  ;;  %v1101_v57 = vmul.f32 0.35355338, %v1098_v55 }
 0x2ce   : > { %v969_v58 = vsel %vm875_vm6, %v968_v56, -inf  ;;  %v1102_v59 = vadd.f32 %v1101_v57, %v871_v45 }
 0x2cf   : > { %970 = vmax.xlane.f32.xlu2 %v969_v58 }
 0x2d0   : > { %v1103_v60 = vsel %vm875_vm6, %v1102_v59, -inf }
 0x2d7   : > { %1104 = vmax.xlane.f32.xlu2 %v1103_v60  ;;  %v1223_v60 = vld [vmem:[%s1917_s28 + $0x10] sm:$0xff] }
 0x2da   : > { %913 = vrot.lane.b32.xlu1 %v1972_v36, %s1731_s1 }
 0x334   : > { %v904_v61 = vpop.xlane.xlu1 %903 }
 0x335   : > { %v905_v62 = vsub.f32 %v901_v47, %v904_v61  ;;  %v1222_v61 = vld [vmem:[%s1917_s28 + $0x8] sm:$0xff] }
 0x337   : > { %v906_v63 = vmul.f32 1.442695, %v905_v62 }
 0x339   : > { %1657 = vpow2.f32 %v906_v63 }
 0x33c   : > { %v1038_v0 = vpop.xlane.xlu0 %1037 }
 0x33d   : > { %v1039_v2 = vsub.f32 %v1035_v51, %v1038_v0 }
 0x33f   : > { %v1658_v3 = vpop.eup %1657  ;;  %v1040_v4 = vmul.f32 1.442695, %v1039_v2 }
 0x340   : > { %v908_v5 = vsel %vm875_vm6, %v1658_v3, 0.0 }
 0x341   : > { %1659 = vpow2.f32 %v1040_v4  ;;  %909 = vadd.xlane.f32.xlu1 %v908_v5 }
 0x342   : > { %v971_v6 = vpop.xlane.xlu2 %970 }
 0x343   : > { %v972_v7 = vsub.f32 %v968_v56, %v971_v6 }
 0x345   : > { %v973_v8 = vmul.f32 1.442695, %v972_v7 }
 0x347   : > { %v1660_v10 = vpop.eup %1659  ;;  %1661 = vpow2.f32 %v973_v8  ;;  %v1649_v8 = vld [vmem:[%s2157_s4] ss:$0 sm:$0xff] }
 0x348   : > { %v1042_v11 = vsel %vm875_vm6, %v1660_v10, 0.0 }
 0x349   : > { %1043 = vadd.xlane.f32.xlu0 %v1042_v11 }
 0x34a   : > { %v1105_v12 = vpop.xlane.xlu2 %1104 }
 0x34b   : > { %v1106_v13 = vsub.f32 %v1102_v59, %v1105_v12  ;;  %v1224_v59 = vld [vmem:[%s1917_s28 + $0x18] sm:$0xff]  ;;  %v1650_v12 = vld [vmem:[%s2158_s2] ss:$0 sm:$0xff] }
 0x34c   : > { %v914_v14 = vpop.permute.xlu1 %913 }
 0x34d   : > { %v1662_v15 = vpop.eup %1661  ;;  %v1107_v16 = vmul.f32 1.442695, %v1106_v13  ;;  %934 = vmatpush.msrb.mxu2 %v914_v14 }
 0x34e   : > { %v975_v17 = vsel %vm875_vm6, %v1662_v15, 0.0 }
 0x34f   : > { %1663 = vpow2.f32 %v1107_v16  ;;  %976 = vadd.xlane.f32.xlu2 %v975_v17  ;;  %v1287_v16 = vld [vmem:[%s1927_s17 + $0x70] sm:$0xff]  ;;  %v1286_v17 = vld [vmem:[%s1927_s17 + $0x68] sm:$0xff] }
 0x355   : > { %v1664_v18 = vpop.eup %1663 }
 0x356   : > { %v1109_v19 = vsel %vm875_vm6, %v1664_v18, 0.0 }
 0x357   : > { %1110 = vadd.xlane.f32.xlu2 %v1109_v19  ;;  %v1284_v19 = vld [vmem:[%s1927_s17 + $0x58] sm:$0xff] }
 0x35a   : > { %1114 = vrot.lane.b32.xlu1 %v1972_v36, %s1732_s22  ;;  %s2160_s22 = sld [smem:[#allocation2_spill]] }
 0x35d   : > { %980 = vrot.lane.b32.xlu0 %v1972_v36, %s1733_s23 }
 0x360   : > { %p1583_p8 = scmp.ne.s32.totalorder %s2160_s22, 1 }
 0x361   : > { %s2161_s23 = sld [smem:[#allocation14_spill]] (!%p1583_p8) }
 0x36f   : > { %1047 = vrot.lane.b32.xlu2 %v1972_v36, %s1734_s24 }
 0x3b4   : > { %v910_v20 = vpop.xlane.xlu1 %909 }
 0x3b5   : > { %1665 = vrcp.f32 %v910_v20  ;;  %v1283_v20 = vld [vmem:[%s1927_s17 + $0x50] sm:$0xff] }
 0x3bb   : > { %v1666_v21 = vpop.eup %1665 }
 0x3bc   : > { %v912_v22 = vmul.f32 %v1666_v21, %v1658_v3  ;;  %v1044_v24 = vpop.xlane.xlu0 %1043  ;;  %v1282_v21 = vld [vmem:[%s1927_s17 + $0x48] sm:$0xff] }
 0x3be   : > { %1570 = vmatmul.msk.f32.vlgmr.msrb.gmra.mxu2 %vm875_vm6, %v912_v22  ;;  %v1281_v22 = vld [vmem:[%s1927_s17 + $0x40] sm:$0xff] }
 0x3c2   : > { %v977_v23 = vpop.xlane.xlu2 %976 }
 0x3c3   : > { %1667 = vrcp.f32 %v977_v23  ;;  %v1280_v23 = vld [vmem:[%s1927_s17 + $0x38] sm:$0xff] }
 0x3c4   : > { %1669 = vrcp.f32 %v1044_v24  ;;  %v1279_v24 = vld [vmem:[%s1927_s17 + $0x30] sm:$0xff] }
 0x3c9   : > { %v1668_v26 = vpop.eup %1667 }
 0x3ca   : > { %v1111_v25 = vpop.xlane.xlu2 %1110  ;;  %v1670_v27 = vpop.eup %1669  ;;  %v979_v28 = vmul.f32 %v1668_v26, %v1662_v15  ;;  %v1288_v15 = vld [vmem:[%s1927_s17 + $0x78] sm:$0xff]  ;;  %v1277_v26 = vld [vmem:[%s1927_s17 + $0x20] sm:$0xff] }
 0x3cb   : > { %1671 = vrcp.f32 %v1111_v25  ;;  %v1046_v32 = vmul.f32 %v1670_v27, %v1660_v10  ;;  %1289 = vmatpush.msra.mxu0 %v1288_v15  ;;  %v1278_v25 = vld [vmem:[%s1927_s17 + $0x28] sm:$0xff]  ;;  %v1276_v27 = vld [vmem:[%s1927_s17 + $0x18] sm:$0xff] }
 0x3cc   : > { %v1115_v30 = vpop.permute.xlu1 %1114 }
 0x3cd   : > { %1290 = vmatpush.msra.mxu0 %v1287_v16 }
 0x3cf   : > { %v981_v29 = vpop.permute.xlu0 %980  ;;  %1291 = vmatpush.msra.mxu0 %v1286_v17 }
 0x3d0   : > { %1001 = vmatpush.msra.mxu2 %v981_v29  ;;  %v1651_v29 = vld [vmem:[%s779_s29] ss:$0 sm:$0xff] }
 0x3d1   : > { %1573 = vmatmul.msk.f32.vlgmr.msra.gmra.mxu2 %vm875_vm6, %v979_v28  ;;  %v1672_v33 = vpop.eup %1671  ;;  %v1275_v28 = vld [vmem:[%s1927_s17 + $0x10] sm:$0xff] }
 0x3d2   : > { %1135 = vmatpush.msrb.mxu2 %v1115_v30  ;;  %v1048_v31 = vpop.permute.xlu2 %1047  ;;  %v1113_v34 = vmul.f32 %v1672_v33, %v1664_v18  ;;  %v1285_v18 = vld [vmem:[%s1927_s17 + $0x60] sm:$0xff]  ;;  %v1274_v30 = vld [vmem:[%s1927_s17 + $0x8] sm:$0xff] }
 0x3d3   : > { %1068 = vmatpush.msrb.mxu3 %v1048_v31  ;;  %1292 = vmatpush.msra.mxu0 %v1285_v18 }
 0x3d4   : > { %1576 = vmatmul.msk.f32.vlgmr.msrb.gmra.mxu3 %vm875_vm6, %v1046_v32  ;;  %v1273_v32 = vld [vmem:[%s1927_s17] sm:$0xff] }
 0x3d5   : > { %1244 = vmatpush.msra.mxu3 %v1224_v59  ;;  %1293 = vmatpush.msra.mxu0 %v1284_v19 }
 0x3d7   : > { %1245 = vmatpush.msra.mxu3 %v1223_v60  ;;  %1294 = vmatpush.msra.mxu0 %v1283_v20 }
 0x3d9   : > { %1579 = vmatmul.msk.f32.vlgmr.msrb.gmra.mxu2 %vm875_vm6, %v1113_v34  ;;  %1246 = vmatpush.msra.mxu3 %v1222_v61 }
 0x3da   : > { %1295 = vmatpush.msra.mxu0 %v1282_v21 }
 0x3dc   : > { %1296 = vmatpush.msra.mxu0 %v1281_v22 }
 0x3de   : > { %1297 = vmatpush.msra.mxu0 %v1280_v23 }
 0x3e0   : > { %1298 = vmatpush.msra.mxu0 %v1279_v24 }
 0x3e2   : > { %1299 = vmatpush.msra.mxu0 %v1278_v25 }
 0x3e4   : > { %1300 = vmatpush.msra.mxu0 %v1277_v26 }
 0x3e6   : > { %1301 = vmatpush.msra.mxu0 %v1276_v27 }
 0x3e8   : > { %1302 = vmatpush.msra.mxu0 %v1275_v28 }
 0x3ea   : > { %1303 = vmatpush.msra.mxu0 %v1274_v30 }
 0x3ec   : > { %1304 = vmatpush.msra.mxu0 %v1273_v32 }
 0x441   : > { %v936_v35 = vpop.f32.mrf.mxu2 }
 0x454   : > { %v1003_v36 = vpop.f32.mrf.mxu2 }
 0x455   : > { %1141 = vrot.lane.b32.xlu0 %v1003_v36, %s1735_s30 }
 0x457   : > { %v1070_v37 = vpop.f32.mrf.mxu3 }
 0x458   : > { %1145 = vrot.lane.b32.xlu1 %v1070_v37, %s1736_s15  ;;  %s2162_s15 = sld [smem:[#allocation15_spill]] (!%p1583_p8) }
 0x45c   : > { %v1137_v38 = vpop.f32.mrf.mxu2 }
 0x45d   : > { %1149 = vrot.lane.b32.xlu2 %v1137_v38, %s1737_s14 }
 0x4b7   : > { %v1150_v46 = vpop.permute.xlu2 %1149 }
 0x4c7   : > { %v1142_v43 = vpop.permute.xlu0 %1141 }
 0x4c8   : > { %v1152_v44 = vsel %vm875_vm6, %v936_v35, %v1142_v43 }
 0x4ca   : > { %v1146_v45 = vpop.permute.xlu1 %1145 }
 0x4cb   : > { %v1154_v47 = vsel %vm1153_vm7, %v1152_v44, %v1146_v45 }
 0x4cc   : > { %v1156_v48 = vsel %vm1155_vm8, %v1154_v47, %v1150_v46 }
 0x4cd   : > { %1580 = vmatmul.msk.f32.vlgmr.msrb.gmra.mxu1 %vm802_vm1, %v1156_v48 }
 0x54a   : > { %v1185_v50 = vpop.f32.mrf.mxu1 }
 0x54b   : > { %v1186_v51 = vadd.f32 %v1648_v49, %v1185_v50  ;;  %v1652_v49 = vld [vmem:[%s787_s18] ss:$0 sm:$0xff] }
 0x54d   : > { %v2023_v52 = vadd.f32 %v1186_v51, %v1942_v1  ;;  %v1221_v1 = vld [vmem:[%s1917_s28] sm:$0xff] }
 0x54e   : > { %1247 = vmatpush.msra.mxu3 %v1221_v1 }
 0x54f   : > { %v1191_v53 = vsel %vm802_vm1, %v2023_v52, 0.0 }
 0x550   : > { %1192 = vadd.xlane.f32.xlu0 %v1191_v53 }
 0x5c3   : > { %v1193_v54 = vpop.xlane.xlu0 %1192 }
 0x5c4   : > { %v1194_v55 = vmul.f32 %v1193_v54, %v1946_v9 }
 0x5c6   : > { %v1195_v56 = vsub.f32 %v2023_v52, %v1194_v55 }
 0x5c8   : > { %v1196_v57 = vmul.f32 %v1195_v56, %v1195_v56 }
 0x5ca   : > { %v1197_v58 = vsel %vm802_vm1, %v1196_v57, 0.0 }
 0x5cb   : > { %1198 = vadd.xlane.f32.xlu1 %v1197_v58 }
 0x63e   : > { %v1199_v62 = vpop.xlane.xlu1 %1198 }
 0x63f   : > { %v1200_v63 = vmul.f32 %v1199_v62, %v1946_v9 }
 0x641   : > { %v1201_v0 = vadd.f32 1e-05, %v1200_v63 }
 0x643   : > { %1673 = vrsqrt.f32 %v1201_v0  ;;  %vm1208_vm10 = vweird.f32 %v1201_v0 }
 0x649   : > { %v1674_v2 = vpop.eup %1673 }
 0x64a   : > { %v1203_v3 = vmul.f32 %v1674_v2, %v1201_v0  ;;  %vm1209_vm9 = vweird.f32 %v1674_v2 }
 0x64b   : > { %vm1210_vm11 = vmor %vm1208_vm10, %vm1209_vm9 }
 0x64c   : > { %v1204_v4 = vmul.f32 %v1674_v2, %v1203_v3 }
 0x64e   : > { %v1205_v5 = vmul.f32 0.5, %v1204_v4 }
 0x650   : > { %v1206_v6 = vsub.f32 1.5, %v1205_v5 }
 0x652   : > { %v1207_v7 = vmul.f32 %v1674_v2, %v1206_v6 }
 0x654   : > { %v1211_v10 = vsel %vm1210_vm11, %v1674_v2, %v1207_v7 }
 0x655   : > { %v1212_v11 = vmul.f32 %v1211_v10, %v1195_v56 }
 0x657   : > { %v1216_v13 = vmul.f32 %v1649_v8, %v1212_v11 }
 0x659   : > { %v1220_v14 = vadd.f32 %v1650_v12, %v1216_v13 }
 0x65b   : > { %1581 = vmatmul.msk.f32.vlgmr.msra.gmra.mxu3 %vm802_vm1, %v1220_v14 }
 0x6de   : > { %v1249_v31 = vpop.f32.mrf.mxu3 }
 0x6df   : > { %v1250_v33 = vadd.f32 %v1651_v29, %v1249_v31 }
 0x6e1   : > { %v1582_v34 = vmul.f32 -1.702, %v1250_v33 }
 0x6e3   : > { %v1254_v35 = vmul.f32 1.442695, %v1582_v34 }
 0x6e5   : > { %1675 = vpow2.f32 %v1254_v35 }
 0x6eb   : > { %v1676_v36 = vpop.eup %1675 }
 0x6ec   : > { %v1256_v37 = vadd.f32 1.0, %v1676_v36 }
 0x6ee   : > { %1677 = vrcp.f32 %v1256_v37  ;;  %v1268_v41 = vand.u32 2147483648, %v1256_v37  ;;  %v1266_v43 = vand.u32 2147483647, %v1256_v37  ;;  %vm1262_vm13 = vweird.f32 %v1256_v37 }
 0x6f0   : > { %v1269_v45 = vor.u32 1.1754944e-38, %v1268_v41  ;;  %vm1267_vm15 = vcmp.eq.f32.partialorder %v1266_v43, 8.507059e+37 }
 0x6f4   : > { %v1678_v38 = vpop.eup %1677 }
 0x6f5   : > { %v1258_v39 = vmul.f32 %v1678_v38, %v1256_v37  ;;  %vm1263_vm12 = vweird.f32 %v1678_v38 }
 0x6f6   : > { %vm1264_vm14 = vmor %vm1262_vm13, %vm1263_vm12 }
 0x6f7   : > { %v1259_v40 = vsub.f32 1.0, %v1258_v39 }
 0x6f9   : > { %v1260_v42 = vmul.f32 %v1678_v38, %v1259_v40 }
 0x6fb   : > { %v1261_v44 = vadd.f32 %v1678_v38, %v1260_v42 }
 0x6fd   : > { %v1265_v46 = vsel %vm1264_vm14, %v1678_v38, %v1261_v44 }
 0x6fe   : > { %v1270_v47 = vsel %vm1267_vm15, %v1269_v45, %v1265_v46 }
 0x6ff   : > { %v1272_v48 = vmul.f32 %v1270_v47, %v1250_v33 }
 0x701   : > { %1305 = vmatmul.f32.vlgmr.msra.gmra.mxu0 %v1272_v48 }
 0x77e   : > { %v1306_v50 = vpop.f32.mrf.mxu0 }
 0x77f   : > { %v1309_v51 = vadd.f32 %v1306_v50, %v2023_v52  ;;  %1319 = sbr.rel (%p1583_p8) target bundleno = 2200 (0x898), region = 100 }
 0x781   : > { %v1314_v53 = vadd.f32 %v1652_v49, %v1309_v51 }
 0x783   : > { %1315 = vst.msk [vmem:[%s1937_s21] sm:$0xff] %vm802_vm1, %v1314_v53 }
 0x784   : > { %v1679_v5 = vld [vmem:[%s2161_s23] ss:$0 sm:$0xff] }
 0x78a   : > { %v1320_v54 = vld [vmem:[%s1937_s21] sm:$0xff] }
 0x78b   : > { %v1323_v55 = vsel %vm802_vm1, %v1320_v54, 0.0 }
 0x78c   : > { %1324 = vadd.xlane.f32.xlu0 %v1323_v55 }
 0x7ff   : > { %v1325_v56 = vpop.xlane.xlu0 %1324 }
 0x800   : > { %v1326_v57 = vmul.f32 %v1325_v56, %v1946_v9 }
 0x802   : > { %v1327_v58 = vsub.f32 %v1320_v54, %v1326_v57 }
 0x804   : > { %v1328_v59 = vmul.f32 %v1327_v58, %v1327_v58 }
 0x806   : > { %v1329_v60 = vsel %vm802_vm1, %v1328_v59, 0.0 }
 0x807   : > { %1330 = vadd.xlane.f32.xlu0 %v1329_v60 }
 0x87a   : > { %v1331_v52 = vpop.xlane.xlu0 %1330 }
 0x87b   : > { %v1332_v61 = vmul.f32 %v1331_v52, %v1946_v9  ;;  %v1680_v9 = vld [vmem:[%s2162_s15] ss:$0 sm:$0xff] }
 0x87d   : > { %v1333_v1 = vadd.f32 1e-05, %v1332_v61 }
 0x87f   : > { %1681 = vrsqrt.f32 %v1333_v1  ;;  %vm1340_vm2 = vweird.f32 %v1333_v1 }
 0x885   : > { %v1682_v62 = vpop.eup %1681 }
 0x886   : > { %v1335_v63 = vmul.f32 %v1682_v62, %v1333_v1  ;;  %vm1341_vm0 = vweird.f32 %v1682_v62 }
 0x887   : > { %vm1342_vm3 = vmor %vm1340_vm2, %vm1341_vm0 }
 0x888   : > { %v1336_v0 = vmul.f32 %v1682_v62, %v1335_v63 }
 0x88a   : > { %v1337_v2 = vmul.f32 0.5, %v1336_v0 }
 0x88c   : > { %v1338_v3 = vsub.f32 1.5, %v1337_v2 }
 0x88e   : > { %v1339_v4 = vmul.f32 %v1682_v62, %v1338_v3 }
 0x890   : > { %v1343_v6 = vsel %vm1342_vm3, %v1682_v62, %v1339_v4 }
 0x891   : > { %v1344_v7 = vmul.f32 %v1343_v6, %v1327_v58 }
 0x893   : > { %v1348_v8 = vmul.f32 %v1679_v5, %v1344_v7 }
 0x895   : > { %v1352_v10 = vadd.f32 %v1680_v9, %v1348_v8 }
 0x897   : > { %1353 = vst.msk [vmem:[%s1937_s21] sm:$0xff] %vm802_vm1, %v1352_v10 }
 0x898 PF: > { %s2163_s14 = sld [smem:[#allocation5_spill]] }
 0x899   : > { %s2164_s27 = sld [smem:[#allocation3_spill]] }
 0x89a   : > { %s2165_s28 = sld [smem:[#allocation4_spill]] }
 0x89b   : > { %s2166_s29 = sld [smem:[#allocation6_spill]] }
 0x89c   : > { %s2167_s30 = sld [smem:[#allocation7_spill]] }
 0x89e   : > { %s28_s14 = sadd.s32 1, %s2163_s14  }
 0x89f   : > { %p25_p9 = scmp.ge.s32.totalorder %s28_s14, 6  }
 0x8a1   :  { %27 = sbr.rel (!%p25_p9) target bundleno = 10 (0xa), region = 169 }

</bundles_post_ra>
